<compile_context>
chip_gen: v7x
topology: tpu7x:2x2x1
jax: 0.10.0
libtpu: 0.0.40
codegen_flags: <defaults>
</compile_context>

<pallas_src>
import functools

import jax
import jax.numpy as jnp
from jax.experimental import pallas as pl
from jax.experimental.pallas import tpu as pltpu

CIN = 3        # image channels (NCHW input, like PyTorch)
C_REAL = 32    # backbone feature width
C_PAD = 128    # lane-dense channel padding (extra channels stay exactly zero)
_LPAD = 8      # left spatial pad in the W (sublane) dim: keeps interior stores
               # (8,128)-tile aligned; only 1 of these columns is the conv halo.


# ----------------------------------------------------------------------------
# Fused kernel: stem conv -> basic block (conv1, conv2 + residual) -> GAP.
# One grid step == one image.  Activations live in two ping-pong VMEM scratch
# buffers shaped (H+2, W+2*_LPAD, C) whose borders are zero ("same" padding).
# ----------------------------------------------------------------------------
def _fused_backbone_kernel(x_ref, w0_ref, s0_ref, b0_ref,
                           w1_ref, s1_ref, b1_ref,
                           w2_ref, s2_ref, b2_ref,
                           o_ref, pa_ref, pb_ref, *, H, W):
    C = o_ref.shape[-1]                       # == C_PAD (lane-dense)

    def write_interior(dst_ref, val_hwc):
        # Tile-aligned interior store: col offset _LPAD is a multiple of 8,
        # full 128 lanes -> plain (unmasked) vector stores.
        dst_ref[1:H + 1, _LPAD:_LPAD + W, :] = val_hwc

    def conv3x3(src_ref, w_ref, s_ref, b_ref, residual=None):
        # im2col: 9 shifted (H, W, C) views concatenated on the lane axis give
        # one (H*W, 9*C) x (9*C, C) matmul (K = 1152) on the MXU.
        cols = [
            src_ref[dy:dy + H, _LPAD - 1 + dx:_LPAD - 1 + dx + W, :]
            .astype(jnp.bfloat16)
            for dy in range(3) for dx in range(3)
        ]
        patches = jnp.concatenate(cols, axis=-1).reshape(H * W, 9 * C)
        acc = jnp.dot(patches, w_ref[...], preferred_element_type=jnp.float32)
        y = acc * s_ref[...] + b_ref[...]     # folded eval-mode BN, f32 epilogue
        if residual is not None:
            y = y + residual                  # identity skip, added before ReLU
        return jnp.maximum(y, 0.0)            # (H*W, C) f32

    # In-kernel zero-halo "same" padding (halo + unused pad columns stay 0).
    pa_ref[...] = jnp.zeros_like(pa_ref)
    pb_ref[...] = jnp.zeros_like(pb_ref)
    write_interior(pa_ref, x_ref[0])

    h = conv3x3(pa_ref, w0_ref, s0_ref, b0_ref)                 # stem conv+BN+ReLU
    write_interior(pb_ref, h.reshape(H, W, C))
    h1 = conv3x3(pb_ref, w1_ref, s1_ref, b1_ref)                # block conv1+BN+ReLU
    write_interior(pa_ref, h1.reshape(H, W, C))
    h2 = conv3x3(pa_ref, w2_ref, s2_ref, b2_ref, residual=h)    # conv2+BN + skip + ReLU

    # Fused global average pool epilogue -> lane-dense (1, 1, C) feature row.
    o_ref[...] = (jnp.sum(h2, axis=0, keepdims=True)
                  * (1.0 / float(H * W))).reshape(1, 1, C)


def _fused_backbone(x_nhwc, p):
    """x_nhwc: (N, H, W, C_PAD) f32 -> (N, 1, C_PAD) f32 pooled features."""
    N, H, W, C = x_nhwc.shape
    assert C == C_PAD
    kernel = functools.partial(_fused_backbone_kernel, H=H, W=W)
    wspec = pl.BlockSpec((9 * C, C), lambda i: (0, 0))   # constant block -> fetched once
    vspec = pl.BlockSpec((1, C), lambda i: (0, 0))
    return pl.pallas_call(
        kernel,
        grid=(N,),
        in_specs=[pl.BlockSpec((1, H, W, C), lambda i: (i, 0, 0, 0)),
                  wspec, vspec, vspec,
                  wspec, vspec, vspec,
                  wspec, vspec, vspec],
        out_specs=pl.BlockSpec((1, 1, C), lambda i: (i, 0, 0)),
        out_shape=jax.ShapeDtypeStruct((N, 1, C), jnp.float32),
        scratch_shapes=[
            pltpu.VMEM((H + 2, W + 2 * _LPAD, C), jnp.float32),
            pltpu.VMEM((H + 2, W + 2 * _LPAD, C), jnp.float32),
        ],
        compiler_params=pltpu.CompilerParams(
            dimension_semantics=("parallel",),   # 2-way: both v7x TensorCores
            vmem_limit_bytes=32 * 1024 * 1024,
        ),
    )(x_nhwc, p["w0"], p["s0"], p["b0"],
      p["w1"], p["s1"], p["b1"],
      p["w2"], p["s2"], p["b2"])


# ----------------------------------------------------------------------------
# VisualModule.forward: return backbone(x); fc == Identity -> pooled (N, 32).
# ----------------------------------------------------------------------------
def visual_module_forward(x_nchw, params):
    n, cin, _, _ = x_nchw.shape
    x = jnp.transpose(x_nchw, (0, 2, 3, 1)).astype(jnp.float32)       # NHWC
    x = jnp.pad(x, ((0, 0), (0, 0), (0, 0), (0, C_PAD - cin)))        # lane-dense C
    feats = _fused_backbone(x, params)                                # (N, 1, C_PAD)
    return feats.reshape(n, C_PAD)[:, :C_REAL]                        # fc = Identity


# ----------------------------------------------------------------------------
# Deterministic frozen parameters (eval-mode BN folded into scale/bias), padded
# to lane-dense shapes for the kernel; raw copies kept for the pure-JAX check.
# ----------------------------------------------------------------------------
def _folded_bn(key, c, eps=1e-5):
    k1, k2, k3, k4 = jax.random.split(key, 4)
    gamma = 1.0 + 0.1 * jax.random.normal(k1, (c,), jnp.float32)
    beta = 0.1 * jax.random.normal(k2, (c,), jnp.float32)
    mean = 0.1 * jax.random.normal(k3, (c,), jnp.float32)
    var = jnp.abs(jax.random.normal(k4, (c,), jnp.float32)) + 0.5
    scale = gamma / jnp.sqrt(var + eps)
    bias = beta - mean * scale
    return scale, bias


def _pad_vec(v):
    return jnp.pad(v, (0, C_PAD - v.shape[0])).reshape(1, C_PAD).astype(jnp.float32)


def _pad_flatten_w(w):
    kh, kw, cin, cout = w.shape
    w = jnp.pad(w, ((0, 0), (0, 0), (0, C_PAD - cin), (0, C_PAD - cout)))
    return w.reshape(kh * kw * C_PAD, C_PAD).astype(jnp.bfloat16)     # bf16 MXU operand


def make_params(key):
    ks = jax.random.split(key, 6)
    w0 = 0.1 * jax.random.normal(ks[0], (3, 3, CIN, C_REAL), jnp.float32)
    s0, b0 = _folded_bn(ks[1], C_REAL)
    w1 = 0.1 * jax.random.normal(ks[2], (3, 3, C_REAL, C_REAL), jnp.float32)
    s1, b1 = _folded_bn(ks[3], C_REAL)
    w2 = 0.1 * jax.random.normal(ks[4], (3, 3, C_REAL, C_REAL), jnp.float32)
    s2, b2 = _folded_bn(ks[5], C_REAL)
    raw = dict(w0=w0, s0=s0, b0=b0, w1=w1, s1=s1, b1=b1, w2=w2, s2=s2, b2=b2)
    kernel_params = dict(
        w0=_pad_flatten_w(w0), s0=_pad_vec(s0), b0=_pad_vec(b0),
        w1=_pad_flatten_w(w1), s1=_pad_vec(s1), b1=_pad_vec(b1),
        w2=_pad_flatten_w(w2), s2=_pad_vec(s2), b2=_pad_vec(b2))
    return kernel_params, raw


def _reference_forward(x_nchw, raw):
    """Pure-JAX (lax.conv) reference, independent of the Pallas path."""
    x = jnp.transpose(x_nchw, (0, 2, 3, 1)).astype(jnp.float32)

    def conv_bn(h, w, s, b, res=None):
        w = w.astype(jnp.bfloat16).astype(jnp.float32)   # kernel stores bf16 weights
        y = jax.lax.conv_general_dilated(
            h, w, window_strides=(1, 1), padding="SAME",
            dimension_numbers=("NHWC", "HWIO", "NHWC"))
        y = y * s + b
        if res is not None:
            y = y + res
        return jnp.maximum(y, 0.0)

    h = conv_bn(x, raw["w0"], raw["s0"], raw["b0"])
    h1 = conv_bn(h, raw["w1"], raw["s1"], raw["b1"])
    h2 = conv_bn(h1, raw["w2"], raw["s2"], raw["b2"], res=h)
    return jnp.mean(h2, axis=(1, 2))


if __name__ == "__main__":
    key = jax.random.PRNGKey(0)
    kx, kp = jax.random.split(key)
    # PyTorch-style NCHW input: batch=2, channels=3, spatial=16x16.
    x = jax.random.normal(kx, (2, 3, 16, 16), jnp.float32)
    params, raw_params = make_params(kp)

    feats = jax.jit(visual_module_forward)(x, params)
    feats = jax.block_until_ready(feats)

    assert feats.shape == (2, C_REAL) and feats.dtype == jnp.float32
    assert bool(jnp.all(jnp.isfinite(feats)))

    ref = _reference_forward(x, raw_params)
    max_err = float(jnp.max(jnp.abs(feats - ref)))
    assert max_err < 5e-2, f"max |pallas - reference| = {max_err}"
    print("KERNEL_OK")
</pallas_src>

<mosaic_0001>
module attributes {stable_mosaic.version = 11 : i64} {
  func.func @_fused_backbone_kernel(%arg0: i32, %arg1: memref<1x16x16x128xf32, #tpu.memory_space<vmem>>, %arg2: memref<1152x128xbf16, #tpu.memory_space<vmem>>, %arg3: memref<1x128xf32, #tpu.memory_space<vmem>>, %arg4: memref<1x128xf32, #tpu.memory_space<vmem>>, %arg5: memref<1152x128xbf16, #tpu.memory_space<vmem>>, %arg6: memref<1x128xf32, #tpu.memory_space<vmem>>, %arg7: memref<1x128xf32, #tpu.memory_space<vmem>>, %arg8: memref<1152x128xbf16, #tpu.memory_space<vmem>>, %arg9: memref<1x128xf32, #tpu.memory_space<vmem>>, %arg10: memref<1x128xf32, #tpu.memory_space<vmem>>, %arg11: memref<1x1x128xf32, #tpu.memory_space<vmem>>, %arg12: memref<18x32x128xf32, #tpu.memory_space<vmem>>, %arg13: memref<18x32x128xf32, #tpu.memory_space<vmem>>) attributes {dimension_semantics = [#tpu.dimension_semantics<parallel>], iteration_bounds = array<i64: 2>, scalar_prefetch = 0 : i64, scratch_operands = 2 : i64, tpu.core_type = #tpu.core_type<tc>, window_params = [{transform_indices = @transform_0, window_bounds = array<i64: 1, 16, 16, 128>}, {pipeline_mode = #tpu.pipeline_mode<synchronous>, transform_indices = @transform_1, window_bounds = array<i64: 1152, 128>}, {pipeline_mode = #tpu.pipeline_mode<synchronous>, transform_indices = @transform_2, window_bounds = array<i64: 1, 128>}, {pipeline_mode = #tpu.pipeline_mode<synchronous>, transform_indices = @transform_3, window_bounds = array<i64: 1, 128>}, {pipeline_mode = #tpu.pipeline_mode<synchronous>, transform_indices = @transform_4, window_bounds = array<i64: 1152, 128>}, {pipeline_mode = #tpu.pipeline_mode<synchronous>, transform_indices = @transform_5, window_bounds = array<i64: 1, 128>}, {pipeline_mode = #tpu.pipeline_mode<synchronous>, transform_indices = @transform_6, window_bounds = array<i64: 1, 128>}, {pipeline_mode = #tpu.pipeline_mode<synchronous>, transform_indices = @transform_7, window_bounds = array<i64: 1152, 128>}, {pipeline_mode = #tpu.pipeline_mode<synchronous>, transform_indices = @transform_8, window_bounds = array<i64: 1, 128>}, {pipeline_mode = #tpu.pipeline_mode<synchronous>, transform_indices = @transform_9, window_bounds = array<i64: 1, 128>}, {transform_indices = @transform_10, window_bounds = array<i64: 1, 1, 128>}]} {
    %cst = arith.constant 0.000000e+00 : f32
    %0 = vector.broadcast %cst : f32 to vector<18x32x128xf32>
    %c0 = arith.constant 0 : index
    %c0_0 = arith.constant 0 : index
    %c0_1 = arith.constant 0 : index
    %1 = vector.load %arg12[%c0, %c0_0, %c0_1] : memref<18x32x128xf32, #tpu.memory_space<vmem>>, vector<18x32x128xf32>
    tpu.vector_store %arg12[%c0, %c0_0, %c0_1], %0 {strides = array<i32>} : memref<18x32x128xf32, #tpu.memory_space<vmem>>, vector<18x32x128xf32>,
    %cst_2 = arith.constant 0.000000e+00 : f32
    %2 = vector.broadcast %cst_2 : f32 to vector<18x32x128xf32>
    %c0_3 = arith.constant 0 : index
    %c0_4 = arith.constant 0 : index
    %c0_5 = arith.constant 0 : index
    %3 = vector.load %arg13[%c0_3, %c0_4, %c0_5] : memref<18x32x128xf32, #tpu.memory_space<vmem>>, vector<18x32x128xf32>
    tpu.vector_store %arg13[%c0_3, %c0_4, %c0_5], %2 {strides = array<i32>} : memref<18x32x128xf32, #tpu.memory_space<vmem>>, vector<18x32x128xf32>,
    %c0_6 = arith.constant 0 : index
    %c0_7 = arith.constant 0 : index
    %c0_8 = arith.constant 0 : index
    %c0_9 = arith.constant 0 : index
    %4 = vector.load %arg1[%c0_6, %c0_7, %c0_8, %c0_9] : memref<1x16x16x128xf32, #tpu.memory_space<vmem>>, vector<1x16x16x128xf32>
    %5 = vector.shape_cast %4 : vector<1x16x16x128xf32> to vector<16x16x128xf32>
    %c1 = arith.constant 1 : index
    %c8 = arith.constant 8 : index
    %c0_10 = arith.constant 0 : index
    %6 = vector.load %arg12[%c1, %c8, %c0_10] : memref<18x32x128xf32, #tpu.memory_space<vmem>>, vector<16x16x128xf32>
    tpu.vector_store %arg12[%c1, %c8, %c0_10], %5 {strides = array<i32>} : memref<18x32x128xf32, #tpu.memory_space<vmem>>, vector<16x16x128xf32>,
    %c0_11 = arith.constant 0 : index
    %c7 = arith.constant 7 : index
    %c0_12 = arith.constant 0 : index
    %7 = vector.load %arg12[%c0_11, %c7, %c0_12] : memref<18x32x128xf32, #tpu.memory_space<vmem>>, vector<16x16x128xf32>
    %8 = arith.truncf %7 : vector<16x16x128xf32> to vector<16x16x128xbf16>
    %c0_13 = arith.constant 0 : index
    %c8_14 = arith.constant 8 : index
    %c0_15 = arith.constant 0 : index
    %9 = vector.load %arg12[%c0_13, %c8_14, %c0_15] : memref<18x32x128xf32, #tpu.memory_space<vmem>>, vector<16x16x128xf32>
    %10 = arith.truncf %9 : vector<16x16x128xf32> to vector<16x16x128xbf16>
    %c0_16 = arith.constant 0 : index
    %c9 = arith.constant 9 : index
    %c0_17 = arith.constant 0 : index
    %11 = vector.load %arg12[%c0_16, %c9, %c0_17] : memref<18x32x128xf32, #tpu.memory_space<vmem>>, vector<16x16x128xf32>
    %12 = arith.truncf %11 : vector<16x16x128xf32> to vector<16x16x128xbf16>
    %c1_18 = arith.constant 1 : index
    %c7_19 = arith.constant 7 : index
    %c0_20 = arith.constant 0 : index
    %13 = vector.load %arg12[%c1_18, %c7_19, %c0_20] : memref<18x32x128xf32, #tpu.memory_space<vmem>>, vector<16x16x128xf32>
    %14 = arith.truncf %13 : vector<16x16x128xf32> to vector<16x16x128xbf16>
    %c1_21 = arith.constant 1 : index
    %c8_22 = arith.constant 8 : index
    %c0_23 = arith.constant 0 : index
    %15 = vector.load %arg12[%c1_21, %c8_22, %c0_23] : memref<18x32x128xf32, #tpu.memory_space<vmem>>, vector<16x16x128xf32>
    %16 = arith.truncf %15 : vector<16x16x128xf32> to vector<16x16x128xbf16>
    %c1_24 = arith.constant 1 : index
    %c9_25 = arith.constant 9 : index
    %c0_26 = arith.constant 0 : index
    %17 = vector.load %arg12[%c1_24, %c9_25, %c0_26] : memref<18x32x128xf32, #tpu.memory_space<vmem>>, vector<16x16x128xf32>
    %18 = arith.truncf %17 : vector<16x16x128xf32> to vector<16x16x128xbf16>
    %c2 = arith.constant 2 : index
    %c7_27 = arith.constant 7 : index
    %c0_28 = arith.constant 0 : index
    %19 = vector.load %arg12[%c2, %c7_27, %c0_28] : memref<18x32x128xf32, #tpu.memory_space<vmem>>, vector<16x16x128xf32>
    %20 = arith.truncf %19 : vector<16x16x128xf32> to vector<16x16x128xbf16>
    %c2_29 = arith.constant 2 : index
    %c8_30 = arith.constant 8 : index
    %c0_31 = arith.constant 0 : index
    %21 = vector.load %arg12[%c2_29, %c8_30, %c0_31] : memref<18x32x128xf32, #tpu.memory_space<vmem>>, vector<16x16x128xf32>
    %22 = arith.truncf %21 : vector<16x16x128xf32> to vector<16x16x128xbf16>
    %c2_32 = arith.constant 2 : index
    %c9_33 = arith.constant 9 : index
    %c0_34 = arith.constant 0 : index
    %23 = vector.load %arg12[%c2_32, %c9_33, %c0_34] : memref<18x32x128xf32, #tpu.memory_space<vmem>>, vector<16x16x128xf32>
    %24 = arith.truncf %23 : vector<16x16x128xf32> to vector<16x16x128xbf16>
    %25 = tpu.concatenate %8, %10, %12, %14, %16, %18, %20, %22, %24 in 2 : vector<16x16x128xbf16>, vector<16x16x128xbf16>, vector<16x16x128xbf16>, vector<16x16x128xbf16>, vector<16x16x128xbf16>, vector<16x16x128xbf16>, vector<16x16x128xbf16>, vector<16x16x128xbf16>, vector<16x16x128xbf16> -> vector<16x16x1152xbf16>
    %26 = vector.shape_cast %25 : vector<16x16x1152xbf16> to vector<256x1152xbf16>
    %c0_35 = arith.constant 0 : index
    %c0_36 = arith.constant 0 : index
    %27 = vector.load %arg2[%c0_35, %c0_36] : memref<1152x128xbf16, #tpu.memory_space<vmem>>, vector<1152x128xbf16>
    %cst_37 = arith.constant dense<0.000000e+00> : vector<256x128xf32>
    %28 = tpu.matmul %26, %27, %cst_37 {dimension_numbers = #tpu.dot_dimension_numbers<[1], [0], [0], [1], [0, 0, 1, 1], [], []>} : vector<256x1152xbf16>, vector<1152x128xbf16>, vector<256x128xf32> -> vector<256x128xf32>
    %c0_38 = arith.constant 0 : index
    %c0_39 = arith.constant 0 : index
    %29 = vector.load %arg3[%c0_38, %c0_39] : memref<1x128xf32, #tpu.memory_space<vmem>>, vector<1x128xf32>
    %30 = vector.broadcast %29 : vector<1x128xf32> to vector<256x128xf32>
    %31 = arith.mulf %28, %30 : vector<256x128xf32>
    %c0_40 = arith.constant 0 : index
    %c0_41 = arith.constant 0 : index
    %32 = vector.load %arg4[%c0_40, %c0_41] : memref<1x128xf32, #tpu.memory_space<vmem>>, vector<1x128xf32>
    %33 = vector.broadcast %32 : vector<1x128xf32> to vector<256x128xf32>
    %34 = arith.addf %31, %33 : vector<256x128xf32>
    %cst_42 = arith.constant 0.000000e+00 : f32
    %35 = vector.broadcast %cst_42 : f32 to vector<256x128xf32>
    %36 = arith.maximumf %34, %35 : vector<256x128xf32>
    %37 = vector.shape_cast %36 : vector<256x128xf32> to vector<16x16x128xf32>
    %c1_43 = arith.constant 1 : index
    %c8_44 = arith.constant 8 : index
    %c0_45 = arith.constant 0 : index
    %38 = vector.load %arg13[%c1_43, %c8_44, %c0_45] : memref<18x32x128xf32, #tpu.memory_space<vmem>>, vector<16x16x128xf32>
    tpu.vector_store %arg13[%c1_43, %c8_44, %c0_45], %37 {strides = array<i32>} : memref<18x32x128xf32, #tpu.memory_space<vmem>>, vector<16x16x128xf32>,
    %c0_46 = arith.constant 0 : index
    %c7_47 = arith.constant 7 : index
    %c0_48 = arith.constant 0 : index
    %39 = vector.load %arg13[%c0_46, %c7_47, %c0_48] : memref<18x32x128xf32, #tpu.memory_space<vmem>>, vector<16x16x128xf32>
    %40 = arith.truncf %39 : vector<16x16x128xf32> to vector<16x16x128xbf16>
    %c0_49 = arith.constant 0 : index
    %c8_50 = arith.constant 8 : index
    %c0_51 = arith.constant 0 : index
    %41 = vector.load %arg13[%c0_49, %c8_50, %c0_51] : memref<18x32x128xf32, #tpu.memory_space<vmem>>, vector<16x16x128xf32>
    %42 = arith.truncf %41 : vector<16x16x128xf32> to vector<16x16x128xbf16>
    %c0_52 = arith.constant 0 : index
    %c9_53 = arith.constant 9 : index
    %c0_54 = arith.constant 0 : index
    %43 = vector.load %arg13[%c0_52, %c9_53, %c0_54] : memref<18x32x128xf32, #tpu.memory_space<vmem>>, vector<16x16x128xf32>
    %44 = arith.truncf %43 : vector<16x16x128xf32> to vector<16x16x128xbf16>
    %c1_55 = arith.constant 1 : index
    %c7_56 = arith.constant 7 : index
    %c0_57 = arith.constant 0 : index
    %45 = vector.load %arg13[%c1_55, %c7_56, %c0_57] : memref<18x32x128xf32, #tpu.memory_space<vmem>>, vector<16x16x128xf32>
    %46 = arith.truncf %45 : vector<16x16x128xf32> to vector<16x16x128xbf16>
    %c1_58 = arith.constant 1 : index
    %c8_59 = arith.constant 8 : index
    %c0_60 = arith.constant 0 : index
    %47 = vector.load %arg13[%c1_58, %c8_59, %c0_60] : memref<18x32x128xf32, #tpu.memory_space<vmem>>, vector<16x16x128xf32>
    %48 = arith.truncf %47 : vector<16x16x128xf32> to vector<16x16x128xbf16>
    %c1_61 = arith.constant 1 : index
    %c9_62 = arith.constant 9 : index
    %c0_63 = arith.constant 0 : index
    %49 = vector.load %arg13[%c1_61, %c9_62, %c0_63] : memref<18x32x128xf32, #tpu.memory_space<vmem>>, vector<16x16x128xf32>
    %50 = arith.truncf %49 : vector<16x16x128xf32> to vector<16x16x128xbf16>
    %c2_64 = arith.constant 2 : index
    %c7_65 = arith.constant 7 : index
    %c0_66 = arith.constant 0 : index
    %51 = vector.load %arg13[%c2_64, %c7_65, %c0_66] : memref<18x32x128xf32, #tpu.memory_space<vmem>>, vector<16x16x128xf32>
    %52 = arith.truncf %51 : vector<16x16x128xf32> to vector<16x16x128xbf16>
    %c2_67 = arith.constant 2 : index
    %c8_68 = arith.constant 8 : index
    %c0_69 = arith.constant 0 : index
    %53 = vector.load %arg13[%c2_67, %c8_68, %c0_69] : memref<18x32x128xf32, #tpu.memory_space<vmem>>, vector<16x16x128xf32>
    %54 = arith.truncf %53 : vector<16x16x128xf32> to vector<16x16x128xbf16>
    %c2_70 = arith.constant 2 : index
    %c9_71 = arith.constant 9 : index
    %c0_72 = arith.constant 0 : index
    %55 = vector.load %arg13[%c2_70, %c9_71, %c0_72] : memref<18x32x128xf32, #tpu.memory_space<vmem>>, vector<16x16x128xf32>
    %56 = arith.truncf %55 : vector<16x16x128xf32> to vector<16x16x128xbf16>
    %57 = tpu.concatenate %40, %42, %44, %46, %48, %50, %52, %54, %56 in 2 : vector<16x16x128xbf16>, vector<16x16x128xbf16>, vector<16x16x128xbf16>, vector<16x16x128xbf16>, vector<16x16x128xbf16>, vector<16x16x128xbf16>, vector<16x16x128xbf16>, vector<16x16x128xbf16>, vector<16x16x128xbf16> -> vector<16x16x1152xbf16>
    %58 = vector.shape_cast %57 : vector<16x16x1152xbf16> to vector<256x1152xbf16>
    %c0_73 = arith.constant 0 : index
    %c0_74 = arith.constant 0 : index
    %59 = vector.load %arg5[%c0_73, %c0_74] : memref<1152x128xbf16, #tpu.memory_space<vmem>>, vector<1152x128xbf16>
    %cst_75 = arith.constant dense<0.000000e+00> : vector<256x128xf32>
    %60 = tpu.matmul %58, %59, %cst_75 {dimension_numbers = #tpu.dot_dimension_numbers<[1], [0], [0], [1], [0, 0, 1, 1], [], []>} : vector<256x1152xbf16>, vector<1152x128xbf16>, vector<256x128xf32> -> vector<256x128xf32>
    %c0_76 = arith.constant 0 : index
    %c0_77 = arith.constant 0 : index
    %61 = vector.load %arg6[%c0_76, %c0_77] : memref<1x128xf32, #tpu.memory_space<vmem>>, vector<1x128xf32>
    %62 = vector.broadcast %61 : vector<1x128xf32> to vector<256x128xf32>
    %63 = arith.mulf %60, %62 : vector<256x128xf32>
    %c0_78 = arith.constant 0 : index
    %c0_79 = arith.constant 0 : index
    %64 = vector.load %arg7[%c0_78, %c0_79] : memref<1x128xf32, #tpu.memory_space<vmem>>, vector<1x128xf32>
    %65 = vector.broadcast %64 : vector<1x128xf32> to vector<256x128xf32>
    %66 = arith.addf %63, %65 : vector<256x128xf32>
    %cst_80 = arith.constant 0.000000e+00 : f32
    %67 = vector.broadcast %cst_80 : f32 to vector<256x128xf32>
    %68 = arith.maximumf %66, %67 : vector<256x128xf32>
    %69 = vector.shape_cast %68 : vector<256x128xf32> to vector<16x16x128xf32>
    %c1_81 = arith.constant 1 : index
    %c8_82 = arith.constant 8 : index
    %c0_83 = arith.constant 0 : index
    %70 = vector.load %arg12[%c1_81, %c8_82, %c0_83] : memref<18x32x128xf32, #tpu.memory_space<vmem>>, vector<16x16x128xf32>
    tpu.vector_store %arg12[%c1_81, %c8_82, %c0_83], %69 {strides = array<i32>} : memref<18x32x128xf32, #tpu.memory_space<vmem>>, vector<16x16x128xf32>,
    %c0_84 = arith.constant 0 : index
    %c7_85 = arith.constant 7 : index
    %c0_86 = arith.constant 0 : index
    %71 = vector.load %arg12[%c0_84, %c7_85, %c0_86] : memref<18x32x128xf32, #tpu.memory_space<vmem>>, vector<16x16x128xf32>
    %72 = arith.truncf %71 : vector<16x16x128xf32> to vector<16x16x128xbf16>
    %c0_87 = arith.constant 0 : index
    %c8_88 = arith.constant 8 : index
    %c0_89 = arith.constant 0 : index
    %73 = vector.load %arg12[%c0_87, %c8_88, %c0_89] : memref<18x32x128xf32, #tpu.memory_space<vmem>>, vector<16x16x128xf32>
    %74 = arith.truncf %73 : vector<16x16x128xf32> to vector<16x16x128xbf16>
    %c0_90 = arith.constant 0 : index
    %c9_91 = arith.constant 9 : index
    %c0_92 = arith.constant 0 : index
    %75 = vector.load %arg12[%c0_90, %c9_91, %c0_92] : memref<18x32x128xf32, #tpu.memory_space<vmem>>, vector<16x16x128xf32>
    %76 = arith.truncf %75 : vector<16x16x128xf32> to vector<16x16x128xbf16>
    %c1_93 = arith.constant 1 : index
    %c7_94 = arith.constant 7 : index
    %c0_95 = arith.constant 0 : index
    %77 = vector.load %arg12[%c1_93, %c7_94, %c0_95] : memref<18x32x128xf32, #tpu.memory_space<vmem>>, vector<16x16x128xf32>
    %78 = arith.truncf %77 : vector<16x16x128xf32> to vector<16x16x128xbf16>
    %c1_96 = arith.constant 1 : index
    %c8_97 = arith.constant 8 : index
    %c0_98 = arith.constant 0 : index
    %79 = vector.load %arg12[%c1_96, %c8_97, %c0_98] : memref<18x32x128xf32, #tpu.memory_space<vmem>>, vector<16x16x128xf32>
    %80 = arith.truncf %79 : vector<16x16x128xf32> to vector<16x16x128xbf16>
    %c1_99 = arith.constant 1 : index
    %c9_100 = arith.constant 9 : index
    %c0_101 = arith.constant 0 : index
    %81 = vector.load %arg12[%c1_99, %c9_100, %c0_101] : memref<18x32x128xf32, #tpu.memory_space<vmem>>, vector<16x16x128xf32>
    %82 = arith.truncf %81 : vector<16x16x128xf32> to vector<16x16x128xbf16>
    %c2_102 = arith.constant 2 : index
    %c7_103 = arith.constant 7 : index
    %c0_104 = arith.constant 0 : index
    %83 = vector.load %arg12[%c2_102, %c7_103, %c0_104] : memref<18x32x128xf32, #tpu.memory_space<vmem>>, vector<16x16x128xf32>
    %84 = arith.truncf %83 : vector<16x16x128xf32> to vector<16x16x128xbf16>
    %c2_105 = arith.constant 2 : index
    %c8_106 = arith.constant 8 : index
    %c0_107 = arith.constant 0 : index
    %85 = vector.load %arg12[%c2_105, %c8_106, %c0_107] : memref<18x32x128xf32, #tpu.memory_space<vmem>>, vector<16x16x128xf32>
    %86 = arith.truncf %85 : vector<16x16x128xf32> to vector<16x16x128xbf16>
    %c2_108 = arith.constant 2 : index
    %c9_109 = arith.constant 9 : index
    %c0_110 = arith.constant 0 : index
    %87 = vector.load %arg12[%c2_108, %c9_109, %c0_110] : memref<18x32x128xf32, #tpu.memory_space<vmem>>, vector<16x16x128xf32>
    %88 = arith.truncf %87 : vector<16x16x128xf32> to vector<16x16x128xbf16>
    %89 = tpu.concatenate %72, %74, %76, %78, %80, %82, %84, %86, %88 in 2 : vector<16x16x128xbf16>, vector<16x16x128xbf16>, vector<16x16x128xbf16>, vector<16x16x128xbf16>, vector<16x16x128xbf16>, vector<16x16x128xbf16>, vector<16x16x128xbf16>, vector<16x16x128xbf16>, vector<16x16x128xbf16> -> vector<16x16x1152xbf16>
    %90 = vector.shape_cast %89 : vector<16x16x1152xbf16> to vector<256x1152xbf16>
    %c0_111 = arith.constant 0 : index
    %c0_112 = arith.constant 0 : index
    %91 = vector.load %arg8[%c0_111, %c0_112] : memref<1152x128xbf16, #tpu.memory_space<vmem>>, vector<1152x128xbf16>
    %cst_113 = arith.constant dense<0.000000e+00> : vector<256x128xf32>
    %92 = tpu.matmul %90, %91, %cst_113 {dimension_numbers = #tpu.dot_dimension_numbers<[1], [0], [0], [1], [0, 0, 1, 1], [], []>} : vector<256x1152xbf16>, vector<1152x128xbf16>, vector<256x128xf32> -> vector<256x128xf32>
    %c0_114 = arith.constant 0 : index
    %c0_115 = arith.constant 0 : index
    %93 = vector.load %arg9[%c0_114, %c0_115] : memref<1x128xf32, #tpu.memory_space<vmem>>, vector<1x128xf32>
    %94 = vector.broadcast %93 : vector<1x128xf32> to vector<256x128xf32>
    %95 = arith.mulf %92, %94 : vector<256x128xf32>
    %c0_116 = arith.constant 0 : index
    %c0_117 = arith.constant 0 : index
    %96 = vector.load %arg10[%c0_116, %c0_117] : memref<1x128xf32, #tpu.memory_space<vmem>>, vector<1x128xf32>
    %97 = vector.broadcast %96 : vector<1x128xf32> to vector<256x128xf32>
    %98 = arith.addf %95, %97 : vector<256x128xf32>
    %99 = arith.addf %98, %36 : vector<256x128xf32>
    %cst_118 = arith.constant 0.000000e+00 : f32
    %100 = vector.broadcast %cst_118 : f32 to vector<256x128xf32>
    %101 = arith.maximumf %99, %100 : vector<256x128xf32>
    %cst_119 = arith.constant dense<0.000000e+00> : vector<128xf32>
    %102 = vector.multi_reduction <add>, %101, %cst_119 [0] : vector<256x128xf32> to vector<128xf32>
    %103 = vector.shape_cast %102 : vector<128xf32> to vector<1x128xf32>
    %cst_120 = arith.constant 3.906250e-03 : f32
    %104 = vector.broadcast %cst_120 : f32 to vector<1x128xf32>
    %105 = arith.mulf %103, %104 : vector<1x128xf32>
    %106 = vector.shape_cast %105 : vector<1x128xf32> to vector<1x1x128xf32>
    %c0_121 = arith.constant 0 : index
    %c0_122 = arith.constant 0 : index
    %c0_123 = arith.constant 0 : index
    %107 = vector.load %arg11[%c0_121, %c0_122, %c0_123] : memref<1x1x128xf32, #tpu.memory_space<vmem>>, vector<1x1x128xf32>
    tpu.vector_store %arg11[%c0_121, %c0_122, %c0_123], %106 {strides = array<i32>} : memref<1x1x128xf32, #tpu.memory_space<vmem>>, vector<1x1x128xf32>,
    return
  }
  func.func @transform_0(%arg0: i32) -> (i32, i32, i32, i32) {
    %c0_i32 = arith.constant 0 : i32
    %c0_i32_0 = arith.constant 0 : i32
    %c0_i32_1 = arith.constant 0 : i32
    %c0_i32_2 = arith.constant 0 : i32
    return %arg0, %c0_i32, %c0_i32_0, %c0_i32_1 : i32, i32, i32, i32
  }
  func.func @transform_1(%arg0: i32) -> (i32, i32) {
    %c0_i32 = arith.constant 0 : i32
    %c0_i32_0 = arith.constant 0 : i32
    %c0_i32_1 = arith.constant 0 : i32
    return %c0_i32, %c0_i32_0 : i32, i32
  }
  func.func @transform_2(%arg0: i32) -> (i32, i32) {
    %c0_i32 = arith.constant 0 : i32
    %c0_i32_0 = arith.constant 0 : i32
    %c0_i32_1 = arith.constant 0 : i32
    return %c0_i32, %c0_i32_0 : i32, i32
  }
  func.func @transform_3(%arg0: i32) -> (i32, i32) {
    %c0_i32 = arith.constant 0 : i32
    %c0_i32_0 = arith.constant 0 : i32
    %c0_i32_1 = arith.constant 0 : i32
    return %c0_i32, %c0_i32_0 : i32, i32
  }
  func.func @transform_4(%arg0: i32) -> (i32, i32) {
    %c0_i32 = arith.constant 0 : i32
    %c0_i32_0 = arith.constant 0 : i32
    %c0_i32_1 = arith.constant 0 : i32
    return %c0_i32, %c0_i32_0 : i32, i32
  }
  func.func @transform_5(%arg0: i32) -> (i32, i32) {
    %c0_i32 = arith.constant 0 : i32
    %c0_i32_0 = arith.constant 0 : i32
    %c0_i32_1 = arith.constant 0 : i32
    return %c0_i32, %c0_i32_0 : i32, i32
  }
  func.func @transform_6(%arg0: i32) -> (i32, i32) {
    %c0_i32 = arith.constant 0 : i32
    %c0_i32_0 = arith.constant 0 : i32
    %c0_i32_1 = arith.constant 0 : i32
    return %c0_i32, %c0_i32_0 : i32, i32
  }
  func.func @transform_7(%arg0: i32) -> (i32, i32) {
    %c0_i32 = arith.constant 0 : i32
    %c0_i32_0 = arith.constant 0 : i32
    %c0_i32_1 = arith.constant 0 : i32
    return %c0_i32, %c0_i32_0 : i32, i32
  }
  func.func @transform_8(%arg0: i32) -> (i32, i32) {
    %c0_i32 = arith.constant 0 : i32
    %c0_i32_0 = arith.constant 0 : i32
    %c0_i32_1 = arith.constant 0 : i32
    return %c0_i32, %c0_i32_0 : i32, i32
  }
  func.func @transform_9(%arg0: i32) -> (i32, i32) {
    %c0_i32 = arith.constant 0 : i32
    %c0_i32_0 = arith.constant 0 : i32
    %c0_i32_1 = arith.constant 0 : i32
    return %c0_i32, %c0_i32_0 : i32, i32
  }
  func.func @transform_10(%arg0: i32) -> (i32, i32, i32) {
    %c0_i32 = arith.constant 0 : i32
    %c0_i32_0 = arith.constant 0 : i32
    %c0_i32_1 = arith.constant 0 : i32
    return %arg0, %c0_i32, %c0_i32_0 : i32, i32, i32
  }
}

</mosaic_0001>

<bundles_post_ra>
// kernel: visual_module_forward.1
= control target key start
LH: loop header
LB: loop body
LE: loop exit
PB: predicated region body
PF: predicated region fallthrough
CT: control target
= control target key end

     0   :  { %15 = vsyncpa [#allocation5], 0  ;;  %s11298_s0 = inlined_call_operand.vmem [shape: f32[2,16,16,128], index: 0, kind: input, shape index: {}]   ;;  %s11299_s1 = inlined_call_operand.vmem [shape: bf16[1152,128], index: 1, kind: input, shape index: {}]   ;;  %s11300_s2 = inlined_call_operand.vmem [shape: f32[1,128], index: 2, kind: input, shape index: {}]   ;;  %s11301_s3 = inlined_call_operand.vmem [shape: f32[1,128], index: 3, kind: input, shape index: {}]   ;;  %s11302_s4 = inlined_call_operand.vmem [shape: bf16[1152,128], index: 4, kind: input, shape index: {}]   ;;  %s11303_s5 = inlined_call_operand.vmem [shape: f32[1,128], index: 5, kind: input, shape index: {}]   ;;  %s11304_s6 = inlined_call_operand.vmem [shape: f32[1,128], index: 6, kind: input, shape index: {}]   ;;  %s11305_s7 = inlined_call_operand.hbm [shape: bf16[1152,128], index: 7, kind: input, shape index: {}]   ;;  %s11306_s8 = inlined_call_operand.vmem [shape: f32[1,128], index: 8, kind: input, shape index: {}]   ;;  %s11307_s9 = inlined_call_operand.vmem [shape: f32[1,128], index: 9, kind: input, shape index: {}]   ;;  %s11308_s10 = inlined_call_operand.hbm [shape: f32[2,1,128], index: 10, kind: output, shape index: {}]  }
   0x1   :  { %16 = vsyncpa [#allocation6], 0 }
   0x2   :  { %18 = vsyncpa [#allocation6 + $0x1], 0  ;;  %s8840_s13 = smov 0   ;;  %s8842_s14 = smov 0  }
   0x3   :  { %s8844_s15 = smov 0   ;;  %s8846_s16 = smov 0  }
   0x4 LB: > { %s8861_s17 = sadd.s32 4294967295, %s8777_s16   ;;  %s6569_s18 = sadd.s32 4294967294, %s8777_s16   ;;  %s8777_s16 = sphi %s8846_s16, %s11328_s16   ;;  %s8773_s15 = sphi %s8844_s15, %s11327_s15   ;;  %s8769_s14 = sphi %s8842_s14, %s11326_s14   ;;  %s8765_s13 = sphi %s8840_s13, %s11325_s13  }
   0x5   : > { %s8865_s19 = sadd.s32 1, %s8777_s16   ;;  %s246_s20 = sadd.s32 1, %s8773_s15 }
   0x6   : > { %s243_s21 = ssub.s32 %s8777_s16, %s8865_s19  ;;  %p256_p0 = scmp.ne.s32.totalorder %s8773_s15, %s8769_s14 }
   0x7   : > { %p244_p1 = scmp.eq.s32.totalorder %s243_s21, 0  ;;  %p257_p2 = scmp.eq.s32.totalorder %s8861_s17, 1 }
   0x8   : > { %p262_p3 = scmp.ne.s32.totalorder %s8769_s14, %s8765_s13  ;;  %p263_p4 = scmp.eq.s32.totalorder %s6569_s18, 1 }
   0x9   : > { %s8876_s22 = scalar_select %p244_p1, %s8773_s15, %s246_s20  }
   0xa   : > { %p8878_p5 = por %p257_p2, %p256_p0  ;;  %p8882_p6 = por %p263_p4, %p262_p3 }
   0xb   : > { %p6570_p7 = scmp.ge.s32.totalorder %s8777_s16, 1  ;;  %p270_p8 = scmp.lt.s32.totalorder %s8777_s16, 3 }
   0xc   : > { %s11314_s23 = scalar_select %p8878_p5, 1, 0 }
   0xd   : > { %s11315_s24 = scalar_select %p8882_p6, 1, 0 }
   0xe   : > { %p11309_p9 = scmp.eq.s32.totalorder %s8861_s17, 0  ;;  %p8889_p10 = pnand %p6570_p7, %p270_p8 }
   0xf   : > { %s8779_s26 = smov [#allocation4]   ;;  %s8683_s11 = scalar_lea.hbm %s11305_s7, 9216 }
  0x10   : > { %s11316_s25 = scalar_select %p8889_p10, 1, 0 }
  0x11   : > { %s300_s27 = sshll.u32 %s8779_s26, 4  ;;  %p8385_p11 = pneg %p8889_p10  ;;  %s301_s27 = int_to_ptr.vmem [resolvable:$true] %s300_s27 }
  0x12   : > { %p8684_p13 = scmp.ne.s32.totalorder %s11305_s7, %s8683_s11  ;;  %p8690_p3 = scmp.lt.u32.totalorder %s8683_s11, %s11305_s7 }
  0x13   : > { %p8897_p12 = pnand %p11309_p9, %p8385_p11 }
  0x15   : > { %p8685_p0 = pneg %p8897_p12 }
  0x17   : > { %p8686_p1 = pnand %p8685_p0, %p8684_p13 }
  0x19   : > { %p8687_p2 = pneg %p8686_p1 }
  0x1b   : > { %p8692_p4 = pnand %p8690_p3, %p8687_p2 }
  0x1d   : > { %8695 = shalt.err (!%p8692_p4)
}
  0x1e   : > { %s8696_s26 = scalar_lea.vmem %s301_s27, 9216  ;;  %p8704_p9 = scmp.lt.s32.totalorder %s301_s27, %s301_s27 }
  0x1f   : > { %p8697_p7 = scmp.ne.s32.totalorder %s301_s27, %s8696_s26  ;;  %p8705_p6 = scmp.lt.s32.totalorder %s8696_s26, %s8696_s26 }
  0x21   : > { %p8699_p8 = pnand %p8697_p7, %p8685_p0  ;;  %p8706_p5 = por %p8705_p6, %p8704_p9 }
  0x23   : > { %p8700_p11 = pneg %p8699_p8 }
  0x25   : > { %p8707_p10 = pnand %p8706_p5, %p8700_p11 }
  0x27   : > { %8710 = shalt.err (!%p8707_p10)
}
  0x28   : > { %s8780_s29 = smov 64   ;;  %s8781_s30 = smov 4  }
  0x29   : > { %8388 = dma.hbm_to_vmem [thread:$0]  (!%p8897_p12), %s11305_s7, 9216, %s301_s27, [#allocation5], %s8780_s29, %s8780_s29, %s8781_s30  }
  0x2a   : > { %p11318_p13 = scmp.ne.s32.totalorder %s11316_s25, 0 }
  0x2b   : > { %p11319_p1 = scmp.eq.s32.totalorder (!%p11318_p13), %s8861_s17, 0 }
  0x2c   : > { %330 = sbr.rel (%p11318_p13) target bundleno = 1602 (0x642), region = 60 }
  0x33   : > { %8756 = dma.done.wait (%p11319_p1), [#allocation5], 9216   ;;  %p11320_p0 = pmov %p11319_p1 }
  0x34   : > { %v8782_v0 = vmov 0.0   ;;  %v8783_v1 = vmov 0.0|0.0   ;;  %v8432_v2 = vld [vmem:[%s11299_s1 + $0x40] sm:$0xff]   ;;  %v8434_v4 = vld [vmem:[%s11299_s1 + $0x48] sm:$0xff]   ;;  %p367_p5 = scmp.lt.s32.totalorder %s8861_s17, 1  ;;  %v8436_v6 = vld [vmem:[%s11299_s1 + $0x50] sm:$0xff]  }
  0x35   : > { %8758 = vsyncadd (%p11320_p0), [#allocation5], 4294958080  ;;  %374 = vst [vmem:[#allocation2 + $0x8] sm:$0xff] %v8782_v0  ;;  %1623 = vmatprep.mubr.bf16.mxu0 %v8783_v1  ;;  %v8433_v3 = vld [vmem:[%s11299_s1] sm:$0xff]   ;;  %6803 = vmatprep.subr.bf16.mxu0 %v8432_v2  ;;  %v8435_v5 = vld [vmem:[%s11299_s1 + $0x8] sm:$0xff]   ;;  %s6799_s29 = sshll.u32 %s8861_s17, 4 }
  0x36   : > { %375 = vst [vmem:[#allocation2 + $0x10] sm:$0xff] %v8782_v0  ;;  %373 = vst [vmem:[#allocation2] sm:$0xff] %v8782_v0  ;;  %8363 = vmatprep.subr.bf16.mxu1 %v8432_v2  ;;  %6804 = vmatpush3.bf16.msra.mxu0 %v8433_v3  ;;  %s368_s18 = scalar_select %p367_p5, %s8861_s17, 1  ;;  %v8437_v7 = vld [vmem:[%s11299_s1 + $0x10] sm:$0xff]   ;;  %v8438_v8 = vld [vmem:[%s11299_s1 + $0x58] sm:$0xff]  }
  0x37   : > { %376 = vst [vmem:[#allocation2 + $0x18] sm:$0xff] %v8782_v0  ;;  %377 = vst [vmem:[#allocation2 + $0x20] sm:$0xff] %v8782_v0  ;;  %8371 = vmatpush3.bf16.msra.mxu1 %v8433_v3  ;;  %6805 = vmatprep.subr.bf16.mxu0 %v8434_v4  ;;  %v8439_v9 = vld [vmem:[%s11299_s1 + $0x18] sm:$0xff]   ;;  %v8440_v10 = vld [vmem:[%s11299_s1 + $0x60] sm:$0xff]   ;;  %s11256_s28 = scalar_lea.hbm %s11308_s10, %s6799_s29  ;;  %p11323_p9 = scmp.ne.s32.totalorder %s11314_s23, 0 }
  0x38   : > { %380 = vst [vmem:[#allocation2 + $0x38] sm:$0xff] %v8782_v0  ;;  %381 = vst [vmem:[#allocation2 + $0x40] sm:$0xff] %v8782_v0  ;;  %8364 = vmatprep.subr.bf16.mxu1 %v8434_v4  ;;  %s6802_s20 = sshll.u32 %s368_s18, 8  ;;  %v8441_v11 = vld [vmem:[%s11299_s1 + $0x20] sm:$0xff]   ;;  %v8442_v12 = vld [vmem:[%s11299_s1 + $0x68] sm:$0xff]   ;;  %s8784_s17 = smov [#allocation7]  }
  0x39   : > { %384 = vst [vmem:[#allocation2 + $0x58] sm:$0xff] %v8782_v0  ;;  %385 = vst [vmem:[#allocation2 + $0x60] sm:$0xff] %v8782_v0  ;;  %s9035_s27 = scalar_lea.vmem %s11298_s0, %s6802_s20  ;;  %v8443_v16 = vld [vmem:[%s11299_s1 + $0x28] sm:$0xff]   ;;  %v8444_v17 = vld [vmem:[%s11299_s1 + $0x70] sm:$0xff]   ;;  %s8715_s20 = sshll.u32 %s8784_s17, 4  ;;  %s8716_s20 = int_to_ptr.vmem [resolvable:$false] %s8715_s20 }
  0x3a   : > { %388 = vst [vmem:[#allocation2 + $0x78] sm:$0xff] %v8782_v0  ;;  %389 = vst [vmem:[#allocation2 + $0x80] sm:$0xff] %v8782_v0  ;;  %6806 = vmatpush3.bf16.msra.mxu0 %v8435_v5  ;;  %v539_v13 = vld [vmem:[%s9035_s27 + $0xb0] sm:$0xff]  ;;  %v540_v14 = vld [vmem:[%s9035_s27 + $0xb8] sm:$0xff]  ;;  %s8717_s26 = scalar_lea.vmem %s8716_s20, 32 }
  0x3b   : > { %392 = vst [vmem:[#allocation2 + $0x98] sm:$0xff] %v8782_v0  ;;  %393 = vst [vmem:[#allocation2 + $0xa0] sm:$0xff] %v8782_v0  ;;  %8372 = vmatpush3.bf16.msra.mxu1 %v8435_v5  ;;  %6807 = vmatprep.subr.bf16.mxu0 %v8436_v6  ;;  %v674_v15 = vpack.c.bf16 %v540_v14, %v539_v13  ;;  %v8445_v18 = vld [vmem:[%s11299_s1 + $0x30] sm:$0xff]   ;;  %v517_v19 = vld [vmem:[%s9035_s27] sm:$0xff] }
  0x3c   : > { %396 = vst [vmem:[#allocation2 + $0xb8] sm:$0xff] %v8782_v0  ;;  %397 = vst [vmem:[#allocation2 + $0xc0] sm:$0xff] %v8782_v0  ;;  %8365 = vmatprep.subr.bf16.mxu1 %v8436_v6  ;;  %v518_v20 = vld [vmem:[%s9035_s27 + $0x8] sm:$0xff]  ;;  %v8446_v21 = vld [vmem:[%s11299_s1 + $0x78] sm:$0xff]  }
  0x3d   : > { %400 = vst [vmem:[#allocation2 + $0xd8] sm:$0xff] %v8782_v0  ;;  %401 = vst [vmem:[#allocation2 + $0xe0] sm:$0xff] %v8782_v0  ;;  %1719 = vmatprep.mubr.bf16.mxu1 %v674_v15  ;;  %v541_v22 = vld [vmem:[%s9035_s27 + $0xc0] sm:$0xff]  ;;  %v8447_v23 = vld [vmem:[%s11299_s1 + $0x38] sm:$0xff]   ;;  %v9081_v36 = vpack.c.bf16 %v518_v20, %v517_v19 }
  0x3e   : > { %404 = vst [vmem:[#allocation2 + $0xf8] sm:$0xff] %v8782_v0  ;;  %405 = vst [vmem:[#allocation2 + $0x100] sm:$0xff] %v8782_v0  ;;  %6808 = vmatpush3.bf16.msra.mxu0 %v8437_v7  ;;  %v582_v24 = vld [vmem:[#allocation2 + $0x7] sm:$0xff]  ;;  %v583_v25 = vld [vmem:[#allocation2 + $0xf] sm:$0xff] }
  0x3f   : > { %408 = vst [vmem:[#allocation2 + $0x118] sm:$0xff] %v8782_v0  ;;  %409 = vst [vmem:[#allocation2 + $0x120] sm:$0xff] %v8782_v0  ;;  %8373 = vmatpush3.bf16.msra.mxu1 %v8437_v7  ;;  %6809 = vmatprep.subr.bf16.mxu0 %v8438_v8  ;;  %v542_v26 = vld [vmem:[%s9035_s27 + $0xc8] sm:$0xff]  ;;  %v8448_v28 = vld [vmem:[%s11299_s1 + $0xc0] sm:$0xff]   ;;  %v614_v31 = vpack.c.bf16 %v583_v25, %v582_v24 }
  0x40   : > { %412 = vst [vmem:[#allocation2 + $0x138] sm:$0xff] %v8782_v0  ;;  %413 = vst [vmem:[#allocation2 + $0x140] sm:$0xff] %v8782_v0  ;;  %8366 = vmatprep.subr.bf16.mxu1 %v8438_v8  ;;  %v8449_v30 = vld [vmem:[%s11299_s1 + $0x140] sm:$0xff]   ;;  %v8452_v35 = vld [vmem:[%s11299_s1 + $0xc8] sm:$0xff]   ;;  %v675_v41 = vpack.c.bf16 %v542_v26, %v541_v22 }
  0x41   : > { %416 = vst [vmem:[#allocation2 + $0x158] sm:$0xff] %v8782_v0  ;;  %417 = vst [vmem:[#allocation2 + $0x160] sm:$0xff] %v8782_v0  ;;  %v8450_v33 = vld [vmem:[%s11299_s1 + $0x80] sm:$0xff]   ;;  %v8457_v37 = vld [vmem:[%s11299_s1 + $0x148] sm:$0xff]  }
  0x42   : > { %420 = vst [vmem:[#allocation2 + $0x178] sm:$0xff] %v8782_v0  ;;  %421 = vst [vmem:[#allocation2 + $0x180] sm:$0xff] %v8782_v0  ;;  %6810 = vmatpush3.bf16.msra.mxu0 %v8439_v9  ;;  %v8451_v34 = vld [vmem:[%s11299_s1 + $0x100] sm:$0xff]   ;;  %v519_v38 = vld [vmem:[%s9035_s27 + $0x10] sm:$0xff] }
  0x43   : > { %424 = vst [vmem:[#allocation2 + $0x198] sm:$0xff] %v8782_v0  ;;  %425 = vst [vmem:[#allocation2 + $0x1a0] sm:$0xff] %v8782_v0  ;;  %8374 = vmatpush3.bf16.msra.mxu1 %v8439_v9  ;;  %6811 = vmatprep.subr.bf16.mxu0 %v8440_v10  ;;  %v520_v39 = vld [vmem:[%s9035_s27 + $0x18] sm:$0xff]  ;;  %v8453_v40 = vld [vmem:[%s11299_s1 + $0x88] sm:$0xff]  }
  0x44   : > { %428 = vst [vmem:[#allocation2 + $0x1b8] sm:$0xff] %v8782_v0  ;;  %429 = vst [vmem:[#allocation2 + $0x1c0] sm:$0xff] %v8782_v0  ;;  %8367 = vmatprep.subr.bf16.mxu1 %v8440_v10  ;;  %v8459_v44 = vld [vmem:[%s11299_s1 + $0x108] sm:$0xff]   ;;  %v543_v45 = vld [vmem:[%s9035_s27 + $0xd0] sm:$0xff]  ;;  %v9111_v56 = vpack.c.bf16 %v520_v39, %v519_v38 }
  0x45   : > { %432 = vst [vmem:[#allocation2 + $0x1d8] sm:$0xff] %v8782_v0  ;;  %433 = vst [vmem:[#allocation2 + $0x1e0] sm:$0xff] %v8782_v0  ;;  %v544_v46 = vld [vmem:[%s9035_s27 + $0xd8] sm:$0xff]  ;;  %v8454_v49 = vld [vmem:[%s11299_s1 + $0xd0] sm:$0xff]  }
  0x46   : > { %436 = vst [vmem:[#allocation2 + $0x1f8] sm:$0xff] %v8782_v0  ;;  %437 = vst [vmem:[#allocation2 + $0x200] sm:$0xff] %v8782_v0  ;;  %6812 = vmatpush3.bf16.msra.mxu0 %v8441_v11  ;;  %v8455_v50 = vld [vmem:[%s11299_s1 + $0x90] sm:$0xff]   ;;  %v521_v53 = vld [vmem:[%s9035_s27 + $0x20] sm:$0xff]  ;;  %v676_v59 = vpack.c.bf16 %v544_v46, %v543_v45 }
  0x47   : > { %440 = vst [vmem:[#allocation2 + $0x218] sm:$0xff] %v8782_v0  ;;  %441 = vst [vmem:[#allocation2 + $0x220] sm:$0xff] %v8782_v0  ;;  %8375 = vmatpush3.bf16.msra.mxu1 %v8441_v11  ;;  %6813 = vmatprep.subr.bf16.mxu0 %v8442_v12  ;;  %v522_v54 = vld [vmem:[%s9035_s27 + $0x28] sm:$0xff]  ;;  %v545_v55 = vld [vmem:[%s9035_s27 + $0xe0] sm:$0xff] }
  0x48   : > { %442 = vst [vmem:[#allocation2 + $0x228] sm:$0xff] %v8782_v0  ;;  %443 = vst [vmem:[#allocation2 + $0x230] sm:$0xff] %v8782_v0  ;;  %8368 = vmatprep.subr.bf16.mxu1 %v8442_v12  ;;  %v546_v57 = vld [vmem:[%s9035_s27 + $0xe8] sm:$0xff]  ;;  %v8456_v58 = vld [vmem:[%s11299_s1 + $0xd8] sm:$0xff]   ;;  %v9139_v7 = vpack.c.bf16 %v522_v54, %v521_v53 }
  0x49   : > { %444 = vst [vmem:[#allocation2 + $0x238] sm:$0xff] %v8782_v0  ;;  %445 = vst [vmem:[#allocation3] sm:$0xff] %v8782_v0  ;;  %v8458_v60 = vld [vmem:[%s11299_s1 + $0x98] sm:$0xff]   ;;  %v8465_v1 = vld [vmem:[%s11299_s1 + $0x150] sm:$0xff]   ;;  %v677_v9 = vpack.c.bf16 %v546_v57, %v545_v55 }
  0x4a   : > { %446 = vst [vmem:[#allocation3 + $0x8] sm:$0xff] %v8782_v0  ;;  %447 = vst [vmem:[#allocation3 + $0x10] sm:$0xff] %v8782_v0  ;;  %6814 = vmatpush3.bf16.msra.mxu0 %v8443_v16  ;;  %v8467_v3 = vld [vmem:[%s11299_s1 + $0x110] sm:$0xff]   ;;  %v8461_v6 = vld [vmem:[%s11299_s1 + $0xa0] sm:$0xff]  }
  0x4b   : > { %448 = vst [vmem:[#allocation3 + $0x18] sm:$0xff] %v8782_v0  ;;  %449 = vst [vmem:[#allocation3 + $0x20] sm:$0xff] %v8782_v0  ;;  %8376 = vmatpush3.bf16.msra.mxu1 %v8443_v16  ;;  %6815 = vmatprep.subr.bf16.mxu0 %v8444_v17  ;;  %v8462_v8 = vld [vmem:[%s11299_s1 + $0xe8] sm:$0xff]   ;;  %v523_v10 = vld [vmem:[%s9035_s27 + $0x30] sm:$0xff] }
  0x4c   : > { %452 = vst [vmem:[#allocation3 + $0x38] sm:$0xff] %v8782_v0  ;;  %453 = vst [vmem:[#allocation3 + $0x40] sm:$0xff] %v8782_v0  ;;  %8369 = vmatprep.subr.bf16.mxu1 %v8444_v17  ;;  %v524_v11 = vld [vmem:[%s9035_s27 + $0x38] sm:$0xff]  ;;  %v8463_v12 = vld [vmem:[%s11299_s1 + $0xa8] sm:$0xff]  }
  0x4d   : > { %456 = vst [vmem:[#allocation3 + $0x58] sm:$0xff] %v8782_v0  ;;  %457 = vst [vmem:[#allocation3 + $0x60] sm:$0xff] %v8782_v0  ;;  %v8470_v17 = vld [vmem:[%s11299_s1 + $0x158] sm:$0xff]  }
  0x4e   : > { %460 = vst [vmem:[#allocation3 + $0x78] sm:$0xff] %v8782_v0  ;;  %461 = vst [vmem:[#allocation3 + $0x80] sm:$0xff] %v8782_v0  ;;  %6816 = vmatpush3.bf16.msra.mxu0 %v8445_v18 }
  0x4f   : > { %464 = vst [vmem:[#allocation3 + $0x98] sm:$0xff] %v8782_v0  ;;  %465 = vst [vmem:[#allocation3 + $0xa0] sm:$0xff] %v8782_v0  ;;  %8377 = vmatpush3.bf16.msra.mxu1 %v8445_v18  ;;  %6817 = vmatprep.subr.bf16.mxu0 %v8446_v21  ;;  %v8471_v18 = vld [vmem:[%s11299_s1 + $0x118] sm:$0xff]  }
  0x50   : > { %468 = vst [vmem:[#allocation3 + $0xb8] sm:$0xff] %v8782_v0  ;;  %469 = vst [vmem:[#allocation3 + $0xc0] sm:$0xff] %v8782_v0  ;;  %8370 = vmatprep.subr.bf16.mxu1 %v8446_v21  ;;  %v8464_v21 = vld [vmem:[%s11299_s1 + $0xf0] sm:$0xff]  }
  0x51   : > { %472 = vst [vmem:[#allocation3 + $0xd8] sm:$0xff] %v8782_v0  ;;  %473 = vst [vmem:[#allocation3 + $0xe0] sm:$0xff] %v8782_v0 }
  0x52   : > { %476 = vst [vmem:[#allocation3 + $0xf8] sm:$0xff] %v8782_v0  ;;  %477 = vst [vmem:[#allocation3 + $0x100] sm:$0xff] %v8782_v0  ;;  %6818 = vmatpush3.bf16.msra.mxu0 %v8447_v23 }
  0x53   : > { %480 = vst [vmem:[#allocation3 + $0x118] sm:$0xff] %v8782_v0  ;;  %481 = vst [vmem:[#allocation3 + $0x120] sm:$0xff] %v8782_v0  ;;  %8378 = vmatpush3.bf16.msra.mxu1 %v8447_v23  ;;  %7027 = vmatprep.subr.bf16.mxu0 %v8449_v30  ;;  %v9167_v23 = vld [vmem:[%s9035_s27 + $0x58] sm:$0xff]  ;;  %v9187_v30 = vld [vmem:[%s9035_s27 + $0x60] sm:$0xff] }
  0x54   : > { %484 = vst [vmem:[#allocation3 + $0x138] sm:$0xff] %v8782_v0  ;;  %485 = vst [vmem:[#allocation3 + $0x140] sm:$0xff] %v8782_v0  ;;  %6915 = vmatprep.subr.bf16.mxu1 %v8448_v28  ;;  %v9181_v28 = vpack.c.bf16 %v524_v11, %v523_v10 }
  0x55   : > { %488 = vst [vmem:[#allocation3 + $0x158] sm:$0xff] %v8782_v0  ;;  %489 = vst [vmem:[#allocation3 + $0x160] sm:$0xff] %v8782_v0  ;;  %1624 = vmatmul.mubr.bf16.vlgmr.msra.gmra.mrb[0].mxu0 %v614_v31  ;;  %v8469_v31 = vld [vmem:[%s11299_s1 + $0xb8] sm:$0xff]  }
  0x56   : > { %492 = vst [vmem:[#allocation3 + $0x178] sm:$0xff] %v8782_v0  ;;  %493 = vst [vmem:[#allocation3 + $0x180] sm:$0xff] %v8782_v0  ;;  %7028 = vmatpush3.bf16.msra.mxu0 %v8451_v34  ;;  %1631 = vmatprep.mubr.bf16.mxu0 %v9081_v36  ;;  %v679_v34 = vld [vmem:[#allocation2 + $0x11] sm:$0xff] }
  0x57   : > { %496 = vst [vmem:[#allocation3 + $0x198] sm:$0xff] %v8782_v0  ;;  %497 = vst [vmem:[#allocation3 + $0x1a0] sm:$0xff] %v8782_v0  ;;  %7029 = vmatprep.subr.bf16.mxu0 %v8457_v37  ;;  %v9196_v37 = vld [vmem:[%s9035_s27 + $0x68] sm:$0xff] }
  0x58   : > { %500 = vst [vmem:[#allocation3 + $0x1b8] sm:$0xff] %v8782_v0  ;;  %501 = vst [vmem:[#allocation3 + $0x1c0] sm:$0xff] %v8782_v0 }
  0x59   : > { %504 = vst [vmem:[#allocation3 + $0x1d8] sm:$0xff] %v8782_v0  ;;  %505 = vst [vmem:[#allocation3 + $0x1e0] sm:$0xff] %v8782_v0 }
  0x5a   : > { %508 = vst [vmem:[#allocation3 + $0x1f8] sm:$0xff] %v8782_v0  ;;  %509 = vst [vmem:[#allocation3 + $0x200] sm:$0xff] %v8782_v0  ;;  %7030 = vmatpush3.bf16.msra.mxu0 %v8459_v44 }
  0x5b   : > { %512 = vst [vmem:[#allocation3 + $0x218] sm:$0xff] %v8782_v0  ;;  %513 = vst [vmem:[#allocation3 + $0x220] sm:$0xff] %v8782_v0  ;;  %7031 = vmatprep.subr.bf16.mxu0 %v8465_v1  ;;  %v9265_v1 = vld [vmem:[%s9035_s27 + $0xa8] sm:$0xff] }
  0x5c   : > { %514 = vst [vmem:[#allocation3 + $0x228] sm:$0xff] %v8782_v0  ;;  %515 = vst [vmem:[#allocation3 + $0x230] sm:$0xff] %v8782_v0 }
  0x5d   : > { %516 = vst [vmem:[#allocation3 + $0x238] sm:$0xff] %v8782_v0  ;;  %572 = vst [vmem:[#allocation2 + $0x188] sm:$0xff] %v539_v13  ;;  %v8460_v0 = vld [vmem:[%s11299_s1 + $0xe0] sm:$0xff]  }
  0x5e   : > { %573 = vst [vmem:[#allocation2 + $0x190] sm:$0xff] %v540_v14  ;;  %550 = vst [vmem:[#allocation2 + $0x28] sm:$0xff] %v517_v19  ;;  %7032 = vmatpush3.bf16.msra.mxu0 %v8467_v3  ;;  %v525_v19 = vld [vmem:[%s9035_s27 + $0x40] sm:$0xff] }
  0x5f   : > { %551 = vst [vmem:[#allocation2 + $0x30] sm:$0xff] %v518_v20  ;;  %574 = vst [vmem:[#allocation2 + $0x1a8] sm:$0xff] %v541_v22  ;;  %v526_v20 = vld [vmem:[%s9035_s27 + $0x48] sm:$0xff]  ;;  %v9164_v22 = vld [vmem:[%s9035_s27 + $0x50] sm:$0xff]  ;;  %7033 = vmatprep.subr.bf16.mxu0 %v8470_v17 }
  0x60   : > { %575 = vst [vmem:[#allocation2 + $0x1b0] sm:$0xff] %v542_v26  ;;  %552 = vst [vmem:[#allocation2 + $0x48] sm:$0xff] %v519_v38  ;;  %v8472_v26 = vld [vmem:[%s11299_s1 + $0x160] sm:$0xff]   ;;  %v8474_v38 = vld [vmem:[%s11299_s1 + $0x168] sm:$0xff]  }
  0x61   : > { %553 = vst [vmem:[#allocation2 + $0x50] sm:$0xff] %v520_v39  ;;  %576 = vst [vmem:[#allocation2 + $0x1c8] sm:$0xff] %v543_v45 }
  0x62   : > { %577 = vst [vmem:[#allocation2 + $0x1d0] sm:$0xff] %v544_v46  ;;  %554 = vst [vmem:[#allocation2 + $0x68] sm:$0xff] %v521_v53  ;;  %7034 = vmatpush3.bf16.msra.mxu0 %v8471_v18  ;;  %v9221_v46 = vld [vmem:[%s9035_s27 + $0x80] sm:$0xff]  ;;  %v8477_v53 = vld [vmem:[%s11299_s1 + $0x130] sm:$0xff]  }
  0x63   : > { %555 = vst [vmem:[#allocation2 + $0x70] sm:$0xff] %v522_v54  ;;  %578 = vst [vmem:[#allocation2 + $0x1e8] sm:$0xff] %v545_v55  ;;  %7035 = vmatprep.subr.bf16.mxu0 %v8472_v26  ;;  %v9238_v54 = vld [vmem:[%s9035_s27 + $0x90] sm:$0xff] }
  0x64   : > { %v606_v27 = vld [vmem:[#allocation2 + $0x187] sm:$0xff]  ;;  %579 = vst [vmem:[#allocation2 + $0x1f0] sm:$0xff] %v546_v57  ;;  %556 = vst [vmem:[#allocation2 + $0x88] sm:$0xff] %v523_v10 }
  0x65   : > { %v607_v29 = vld [vmem:[#allocation2 + $0x18f] sm:$0xff]  ;;  %v584_v42 = vld [vmem:[#allocation2 + $0x27] sm:$0xff]  ;;  %557 = vst [vmem:[#allocation2 + $0x90] sm:$0xff] %v524_v11  ;;  %558 = vst [vmem:[#allocation2 + $0xa8] sm:$0xff] %v525_v19 }
  0x66   : > { %v9070_v32 = vpack.c.bf16 %v607_v29, %v606_v27  ;;  %v585_v43 = vld [vmem:[#allocation2 + $0x2f] sm:$0xff]  ;;  %v608_v47 = vld [vmem:[#allocation2 + $0x1a7] sm:$0xff]  ;;  %559 = vst [vmem:[#allocation2 + $0xb0] sm:$0xff] %v526_v20  ;;  %560 = vst [vmem:[#allocation2 + $0xc8] sm:$0xff] %v9164_v22 }
  0x67   : > { %v609_v48 = vld [vmem:[#allocation2 + $0x1af] sm:$0xff]  ;;  %v9104_v51 = vpack.c.bf16 %v585_v43, %v584_v42  ;;  %v586_v61 = vld [vmem:[#allocation2 + $0x47] sm:$0xff]  ;;  %561 = vst [vmem:[#allocation2 + $0xd0] sm:$0xff] %v9167_v23  ;;  %v8468_v29 = vld [vmem:[%s11299_s1 + $0xf8] sm:$0xff]  }
  0x68   : > { %1720 = vmatmul.mubr.bf16.vlgmr.msra.gmra.mrb[0].mxu1 %v9070_v32  ;;  %v9106_v52 = vpack.c.bf16 %v609_v48, %v608_v47  ;;  %v587_v62 = vld [vmem:[#allocation2 + $0x4f] sm:$0xff]  ;;  %v610_v63 = vld [vmem:[#allocation2 + $0x1c7] sm:$0xff]  ;;  %562 = vst [vmem:[#allocation2 + $0xe8] sm:$0xff] %v9187_v30  ;;  %563 = vst [vmem:[#allocation2 + $0xf0] sm:$0xff] %v9196_v37  ;;  %v9223_v47 = vpack.c.bf16 %v526_v20, %v525_v19 }
  0x69   : > { %6916 = vmatpush3.bf16.msra.mxu1 %v8450_v33  ;;  %1727 = vmatprep.mubr.bf16.mxu1 %v675_v41  ;;  %v611_v2 = vld [vmem:[#allocation2 + $0x1cf] sm:$0xff]  ;;  %v9132_v4 = vpack.c.bf16 %v587_v62, %v586_v61  ;;  %v588_v13 = vld [vmem:[#allocation2 + $0x67] sm:$0xff]  ;;  %v9214_v43 = vld [vmem:[%s9035_s27 + $0x78] sm:$0xff]  ;;  %566 = vst [vmem:[#allocation2 + $0x128] sm:$0xff] %v9221_v46 }
  0x6a   : > { %6917 = vmatprep.subr.bf16.mxu1 %v8452_v35  ;;  %1632 = vmatmul.mubr.bf16.gmra.mrb[4].mxu0 %v9104_v51  ;;  %v9134_v5 = vpack.c.bf16 %v611_v2, %v610_v63  ;;  %v589_v14 = vld [vmem:[#allocation2 + $0x6f] sm:$0xff]  ;;  %v612_v15 = vld [vmem:[#allocation2 + $0x1e7] sm:$0xff]  ;;  %565 = vst [vmem:[#allocation2 + $0x110] sm:$0xff] %v9214_v43  ;;  %568 = vst [vmem:[#allocation2 + $0x148] sm:$0xff] %v9238_v54  ;;  %v9259_v63 = vpack.c.bf16 %v9167_v23, %v9164_v22 }
  0x6b   : > { %1639 = vmatprep.mubr.bf16.mxu0 %v9111_v56  ;;  %v613_v16 = vld [vmem:[#allocation2 + $0x1ef] sm:$0xff]  ;;  %v9170_v24 = vpack.c.bf16 %v589_v14, %v588_v13  ;;  %v8473_v35 = vld [vmem:[%s11299_s1 + $0x120] sm:$0xff]   ;;  %v8479_v62 = vld [vmem:[%s11299_s1 + $0x138] sm:$0xff]   ;;  %571 = vst [vmem:[#allocation2 + $0x170] sm:$0xff] %v9265_v1 }
  0x6c   : > { %v9172_v25 = vpack.c.bf16 %v613_v16, %v612_v15  ;;  %v8466_v27 = vld [vmem:[%s11299_s1 + $0xb0] sm:$0xff]   ;;  %v590_v39 = vld [vmem:[#allocation2 + $0x87] sm:$0xff]  ;;  %7036 = vmatpush3.bf16.msra.mxu0 %v8473_v35  ;;  %v9294_v15 = vpack.c.bf16 %v9196_v37, %v9187_v30  ;;  %v8490_v30 = vld [vmem:[%s11299_s1 + $0x198] sm:$0xff]  }
  0x6d   : > { %6918 = vmatpush3.bf16.msra.mxu1 %v8453_v40  ;;  %v678_v33 = vld [vmem:[#allocation2 + $0x9] sm:$0xff]  ;;  %7037 = vmatprep.subr.bf16.mxu0 %v8474_v38  ;;  %v8480_v2 = vld [vmem:[%s11299_s1 + $0x1c0] sm:$0xff]   ;;  %v683_v10 = vld [vmem:[#allocation2 + $0x51] sm:$0xff] }
  0x6e   : > { %6919 = vmatprep.subr.bf16.mxu1 %v8454_v49  ;;  %v591_v40 = vld [vmem:[#allocation2 + $0x8f] sm:$0xff]  ;;  %v710_v45 = vpack.c.bf16 %v679_v34, %v678_v33  ;;  %v592_v55 = vld [vmem:[#allocation2 + $0xa7] sm:$0xff] }
  0x6f   : > { %v8475_v41 = vld [vmem:[%s11299_s1 + $0x128] sm:$0xff]   ;;  %v9211_v42 = vld [vmem:[%s9035_s27 + $0x70] sm:$0xff]  ;;  %v9216_v44 = vpack.c.bf16 %v591_v40, %v590_v39  ;;  %v9282_v11 = vld [vmem:[%s11299_s1 + $0x200] sm:$0xff]  }
  0x70   : > { %1728 = vmatmul.mubr.bf16.gmra.mrb[4].mxu1 %v9106_v52  ;;  %564 = vst [vmem:[#allocation2 + $0x108] sm:$0xff] %v9211_v42  ;;  %v9226_v48 = vld [vmem:[%s9035_s27 + $0x88] sm:$0xff]  ;;  %7038 = vmatpush3.bf16.msra.mxu0 %v8475_v41  ;;  %v685_v18 = vld [vmem:[#allocation2 + $0x71] sm:$0xff]  ;;  %v8491_v35 = vld [vmem:[%s11299_s1 + $0x1e0] sm:$0xff]  }
  0x71   : > { %6920 = vmatpush3.bf16.msra.mxu1 %v8455_v50  ;;  %1735 = vmatprep.mubr.bf16.mxu1 %v676_v59  ;;  %567 = vst [vmem:[#allocation2 + $0x130] sm:$0xff] %v9226_v48  ;;  %v680_v49 = vld [vmem:[#allocation2 + $0x29] sm:$0xff]  ;;  %v681_v50 = vld [vmem:[#allocation2 + $0x31] sm:$0xff]  ;;  %v8493_v38 = vld [vmem:[%s11299_s1 + $0x1a0] sm:$0xff]  }
  0x72   : > { %6921 = vmatprep.subr.bf16.mxu1 %v8456_v58  ;;  %1640 = vmatmul.mubr.bf16.gmra.mrb[8].mxu0 %v9132_v4  ;;  %v593_v57 = vld [vmem:[#allocation2 + $0xaf] sm:$0xff]  ;;  %v9243_v58 = vld [vmem:[%s9035_s27 + $0x98] sm:$0xff]  ;;  %v9252_v61 = vpack.c.bf16 %v681_v50, %v680_v49  ;;  %v596_v19 = vld [vmem:[#allocation2 + $0xe7] sm:$0xff] }
  0x73   : > { %1647 = vmatprep.mubr.bf16.mxu0 %v9139_v7  ;;  %569 = vst [vmem:[#allocation2 + $0x150] sm:$0xff] %v9243_v58  ;;  %v8478_v59 = vld [vmem:[%s11299_s1 + $0x178] sm:$0xff]   ;;  %v682_v3 = vld [vmem:[#allocation2 + $0x49] sm:$0xff] }
  0x74   : > { %v9286_v13 = vpack.c.bf16 %v683_v10, %v682_v3  ;;  %v8483_v14 = vld [vmem:[%s11299_s1 + $0x1c8] sm:$0xff]   ;;  %v8487_v22 = vld [vmem:[%s11299_s1 + $0x190] sm:$0xff]   ;;  %v8499_v3 = vld [vmem:[%s11299_s1 + $0x1b8] sm:$0xff]  }
  0x75   : > { %6922 = vmatpush3.bf16.msra.mxu1 %v8458_v60  ;;  %v9250_v60 = vpack.c.bf16 %v593_v57, %v592_v55  ;;  %v8484_v16 = vld [vmem:[%s11299_s1 + $0x188] sm:$0xff]   ;;  %v687_v34 = vld [vmem:[#allocation2 + $0x91] sm:$0xff] }
  0x76   : > { %6923 = vmatprep.subr.bf16.mxu1 %v8460_v0  ;;  %v9262_v0 = vld [vmem:[%s9035_s27 + $0xa0] sm:$0xff]  ;;  %v684_v17 = vld [vmem:[#allocation2 + $0x69] sm:$0xff]  ;;  %v8498_v57 = vld [vmem:[%s11299_s1 + $0x1f8] sm:$0xff]  }
  0x77   : > { %570 = vst [vmem:[#allocation2 + $0x168] sm:$0xff] %v9262_v0  ;;  %v597_v20 = vld [vmem:[#allocation2 + $0xef] sm:$0xff]  ;;  %v9311_v26 = vpack.c.bf16 %v685_v18, %v684_v17 }
  0x78   : > { %1736 = vmatmul.mubr.bf16.gmra.mrb[8].mxu1 %v9134_v5  ;;  %v9309_v23 = vpack.c.bf16 %v597_v20, %v596_v19  ;;  %v686_v33 = vld [vmem:[#allocation2 + $0x89] sm:$0xff]  ;;  %v693_v18 = vld [vmem:[#allocation2 + $0xf1] sm:$0xff] }
  0x79   : > { %6924 = vmatpush3.bf16.msra.mxu1 %v8461_v6  ;;  %1743 = vmatprep.mubr.bf16.mxu1 %v677_v9  ;;  %v8481_v6 = vld [vmem:[%s11299_s1 + $0x180] sm:$0xff]   ;;  %v595_v9 = vld [vmem:[#allocation2 + $0xcf] sm:$0xff]  ;;  %v9338_v41 = vpack.c.bf16 %v687_v34, %v686_v33 }
  0x7a   : > { %6925 = vmatprep.subr.bf16.mxu1 %v8462_v8  ;;  %1648 = vmatmul.mubr.bf16.gmra.mrb[12].mxu0 %v9170_v24  ;;  %v594_v8 = vld [vmem:[#allocation2 + $0xc7] sm:$0xff]  ;;  %v599_v37 = vld [vmem:[#allocation2 + $0x10f] sm:$0xff] }
  0x7b   : > { %1655 = vmatprep.mubr.bf16.mxu0 %v9181_v28  ;;  %v8494_v39 = vld [vmem:[%s11299_s1 + $0x1e8] sm:$0xff]   ;;  %v8497_v55 = vld [vmem:[%s11299_s1 + $0x1b0] sm:$0xff]  }
  0x7c   : > { %v8495_v49 = vld [vmem:[%s11299_s1 + $0x1a8] sm:$0xff]   ;;  %v697_v33 = vld [vmem:[#allocation2 + $0x131] sm:$0xff] }
  0x7d   : > { %6926 = vmatpush3.bf16.msra.mxu1 %v8463_v12  ;;  %v9284_v12 = vpack.c.bf16 %v595_v9, %v594_v8  ;;  %v688_v50 = vld [vmem:[#allocation2 + $0xa9] sm:$0xff]  ;;  %v691_v8 = vld [vmem:[#allocation2 + $0xd1] sm:$0xff] }
  0x7e   : > { %6927 = vmatprep.subr.bf16.mxu1 %v8464_v21  ;;  %v8486_v21 = vld [vmem:[%s11299_s1 + $0x1d0] sm:$0xff]   ;;  %v602_v9 = vld [vmem:[#allocation2 + $0x147] sm:$0xff] }
  0x7f   : > { %v603_v10 = vld [vmem:[#allocation2 + $0x14f] sm:$0xff] }
  0x80   : > { %1744 = vmatmul.mubr.bf16.gmra.mrb[12].mxu1 %v9172_v25  ;;  %v692_v17 = vld [vmem:[#allocation2 + $0xe9] sm:$0xff] }
  0x81   : > { %6928 = vmatpush3.bf16.msra.mxu1 %v8466_v27  ;;  %1784 = vmatprep.mubr.bf16.mxu1 %v9104_v51  ;;  %v8476_v51 = vld [vmem:[%s11299_s1 + $0x170] sm:$0xff]   ;;  %v9315_v27 = vpack.c.bf16 %v9214_v43, %v9211_v42  ;;  %v9343_v43 = vpack.c.bf16 %v9226_v48, %v9221_v46  ;;  %v600_v46 = vld [vmem:[#allocation2 + $0x127] sm:$0xff] }
  0x82   : > { %6929 = vmatprep.subr.bf16.mxu1 %v8468_v29  ;;  %1656 = vmatmul.mubr.bf16.gmra.mrb[16].mxu0 %v9216_v44  ;;  %v8489_v29 = vld [vmem:[%s11299_s1 + $0x1d8] sm:$0xff]   ;;  %v547_v42 = vld [vmem:[%s9035_s27 + $0xf0] sm:$0xff] }
  0x83   : > { %1663 = vmatprep.mubr.bf16.mxu0 %v9223_v47  ;;  %7039 = vmatprep.subr.bf16.mxu0 %v8476_v51  ;;  %580 = vst [vmem:[#allocation2 + $0x208] sm:$0xff] %v547_v42  ;;  %v689_v51 = vld [vmem:[#allocation2 + $0xb1] sm:$0xff] }
  0x84   : > { %7040 = vmatpush3.bf16.msra.mxu0 %v8477_v53  ;;  %v8496_v53 = vld [vmem:[%s11299_s1 + $0x1f0] sm:$0xff]  }
  0x85   : > { %6930 = vmatpush3.bf16.msra.mxu1 %v8469_v31  ;;  %7041 = vmatprep.subr.bf16.mxu0 %v8478_v59  ;;  %v598_v31 = vld [vmem:[#allocation2 + $0x107] sm:$0xff]  ;;  %v601_v48 = vld [vmem:[#allocation2 + $0x12f] sm:$0xff] }
  0x86   : > { %7139 = vmatprep.subr.bf16.mxu1 %v8480_v2  ;;  %v9336_v40 = vpack.c.bf16 %v599_v37, %v598_v31  ;;  %v9362_v59 = vpack.c.bf16 %v601_v48, %v600_v46  ;;  %v9368_v2 = vpack.c.bf16 %v9243_v58, %v9238_v54  ;;  %v9377_v54 = vpack.c.bf16 %v603_v10, %v602_v9  ;;  %v605_v19 = vld [vmem:[#allocation2 + $0x16f] sm:$0xff] }
  0x87   : > { %v696_v31 = vld [vmem:[#allocation2 + $0x129] sm:$0xff]  ;;  %v699_v37 = vld [vmem:[#allocation2 + $0x151] sm:$0xff] }
  0x88   : > { %1785 = vmatmul.mubr.bf16.vlgmr.msra.gmra.mrb[16].mxu1 %v710_v45  ;;  %7042 = vmatpush3.bf16.msra.mxu0 %v8479_v62  ;;  %v548_v45 = vld [vmem:[%s9035_s27 + $0xf8] sm:$0xff]  ;;  %v9364_v62 = vpack.c.bf16 %v689_v51, %v688_v50  ;;  %v8488_v34 = vld [vmem:[%s11299_s1 + $0x210] sm:$0xff]   ;;  %s365_s27 = sand.u32 1, %s8769_s14  }
  0x89   : > { %1792 = vmatprep.mubr.bf16.mxu1 %v9132_v4  ;;  %7140 = vmatpush3.bf16.msra.mxu1 %v8481_v6  ;;  %581 = vst [vmem:[#allocation2 + $0x210] sm:$0xff] %v548_v45  ;;  %v690_v6 = vld [vmem:[#allocation2 + $0xc9] sm:$0xff]  ;;  %v8503_v50 = vld [vmem:[%s11299_s1 + $0x238] sm:$0xff]   ;;  %s366_s30 = scalar_lea.vmem [#allocation7], %s365_s27  ;;  %s6490_s11 = scalar_lea.sflag [#allocation6], %s365_s27 }
  0x8a   : > { %1664 = vmatmul.mubr.bf16.gmra.mrb[20].mxu0 %v9250_v60  ;;  %8219 = vmatprep.subr.bf16.mxu0 %v9282_v11  ;;  %v9379_v58 = vpack.c.bf16 %v691_v8, %v690_v6  ;;  %v702_v51 = vld [vmem:[#allocation2 + $0x189] sm:$0xff]  ;;  %v705_v48 = vld [vmem:[#allocation2 + $0x1b1] sm:$0xff]  ;;  %s6502_s12 = sshll.u32 %s366_s30, 4  ;;  %s11258_s12 = int_to_ptr.vmem [resolvable:$true] %s6502_s12 }
  0x8b   : > { %1671 = vmatprep.mubr.bf16.mxu0 %v9259_v63  ;;  %7141 = vmatprep.subr.bf16.mxu1 %v8483_v14  ;;  %v9383_v14 = vpack.c.bf16 %v9265_v1, %v9262_v0  ;;  %v694_v0 = vld [vmem:[#allocation2 + $0x109] sm:$0xff]  ;;  %v695_v1 = vld [vmem:[#allocation2 + $0x111] sm:$0xff]  ;;  %s8711_s21 = scalar_lea.vmem %s11258_s12, 16  ;;  %p8718_p2 = scmp.lt.s32.totalorder %s11258_s12, %s8716_s20 }
  0x8c   : > { %v704_v46 = vld [vmem:[#allocation2 + $0x1a9] sm:$0xff]  ;;  %v709_v10 = vld [vmem:[#allocation2 + $0x1f1] sm:$0xff]  ;;  %p8712_p6 = scmp.ne.s32.totalorder %s11258_s12, %s8711_s21  ;;  %p8719_p3 = scmp.lt.s32.totalorder %s8717_s26, %s8711_s21 }
  0x8d   : > { %7142 = vmatpush3.bf16.msra.mxu1 %v8484_v16  ;;  %v604_v16 = vld [vmem:[#allocation2 + $0x167] sm:$0xff] }
  0x8e   : > { %7143 = vmatprep.subr.bf16.mxu1 %v8486_v21  ;;  %v9389_v20 = vpack.c.bf16 %v605_v19, %v604_v16  ;;  %v9391_v21 = vpack.c.bf16 %v693_v18, %v692_v17  ;;  %p8713_p10 = pnand %p8712_p6, %p11323_p9  ;;  %p8720_p4 = por %p8719_p3, %p8718_p2 }
  0x90   : > { %1793 = vmatmul.mubr.bf16.gmra.mrb[20].mxu1 %v9252_v61  ;;  %v757_v6 = vld [vmem:[#allocation2 + $0x20f] sm:$0xff]  ;;  %p8714_p12 = pneg %p8713_p10 }
  0x91   : > { %1800 = vmatprep.mubr.bf16.mxu1 %v9170_v24  ;;  %7144 = vmatpush3.bf16.msra.mxu1 %v8487_v22  ;;  %v9393_v22 = vpack.c.bf16 %v548_v45, %v547_v42  ;;  %v701_v42 = vld [vmem:[#allocation2 + $0x171] sm:$0xff]  ;;  %v852_v18 = vld [vmem:[#allocation2 + $0x209] sm:$0xff] }
  0x92   : > { %1672 = vmatmul.mubr.bf16.gmra.mrb[24].mxu0 %v9284_v12  ;;  %7145 = vmatprep.subr.bf16.mxu1 %v8489_v29  ;;  %v9399_v29 = vpack.c.bf16 %v695_v1, %v694_v0  ;;  %v8502_v45 = vld [vmem:[%s11299_s1 + $0x230] sm:$0xff]   ;;  %p8721_p7 = pnand %p8720_p4, %p8714_p12 }
  0x93   : > { %1679 = vmatprep.mubr.bf16.mxu0 %v9294_v15  ;;  %v853_v19 = vld [vmem:[#allocation2 + $0x211] sm:$0xff] }
  0x94   : > { %v9509_v1 = vpack.c.bf16 %v853_v19, %v852_v18  ;;  %v891_v18 = vld [vmem:[#allocation2 + $0x187] sm:$0xff]  ;;  %v892_v19 = vld [vmem:[#allocation2 + $0x18f] sm:$0xff] }
  0x95   : > { %7146 = vmatpush3.bf16.msra.mxu1 %v8490_v30  ;;  %v8485_v30 = vld [vmem:[%s11299_s1 + $0x208] sm:$0xff]  }
  0x96   : > { %7147 = vmatprep.subr.bf16.mxu1 %v8491_v35  ;;  %v8492_v35 = vld [vmem:[%s11299_s1 + $0x218] sm:$0xff]  }
  0x98   : > { %1801 = vmatmul.mubr.bf16.gmra.mrb[24].mxu1 %v9286_v13 }
  0x99   : > { %1808 = vmatprep.mubr.bf16.mxu1 %v9216_v44  ;;  %7148 = vmatpush3.bf16.msra.mxu1 %v8493_v38  ;;  %v8501_v38 = vld [vmem:[%s11299_s1 + $0x228] sm:$0xff]  }
  0x9a   : > { %1680 = vmatmul.mubr.bf16.gmra.mrb[28].mxu0 %v9309_v23  ;;  %7149 = vmatprep.subr.bf16.mxu1 %v8494_v39  ;;  %v700_v39 = vld [vmem:[#allocation2 + $0x169] sm:$0xff] }
  0x9b   : > { %1687 = vmatprep.mubr.bf16.mxu0 %v9315_v27 }
  0x9d   : > { %7150 = vmatpush3.bf16.msra.mxu1 %v8495_v49  ;;  %v9436_v49 = vpack.c.bf16 %v701_v42, %v700_v39 }
  0x9e   : > { %7151 = vmatprep.subr.bf16.mxu1 %v8496_v53  ;;  %v703_v53 = vld [vmem:[#allocation2 + $0x191] sm:$0xff] }
  0xa0   : > { %1809 = vmatmul.mubr.bf16.gmra.mrb[28].mxu1 %v9311_v26 }
  0xa1   : > { %1816 = vmatprep.mubr.bf16.mxu1 %v9250_v60  ;;  %7152 = vmatpush3.bf16.msra.mxu1 %v8497_v55  ;;  %v9451_v55 = vpack.c.bf16 %v705_v48, %v704_v46 }
  0xa2   : > { %1688 = vmatmul.mubr.bf16.gmra.mrb[32].mxu0 %v9336_v40  ;;  %7153 = vmatprep.subr.bf16.mxu1 %v8498_v57  ;;  %v707_v57 = vld [vmem:[#allocation2 + $0x1d1] sm:$0xff] }
  0xa3   : > { %1695 = vmatprep.mubr.bf16.mxu0 %v9343_v43 }
  0xa5   : > { %7154 = vmatpush3.bf16.msra.mxu1 %v8499_v3  ;;  %v756_v3 = vld [vmem:[#allocation2 + $0x207] sm:$0xff] }
  0xa6   : > { %v9459_v9 = vpack.c.bf16 %v757_v6, %v756_v3 }
  0xa8   : > { %1817 = vmatmul.mubr.bf16.gmra.mrb[32].mxu1 %v9338_v41 }
  0xa9   : > { %1824 = vmatprep.mubr.bf16.mxu1 %v9284_v12 }
  0xaa   : > { %1696 = vmatmul.mubr.bf16.gmra.mrb[36].mxu0 %v9362_v59 }
  0xab   : > { %1703 = vmatprep.mubr.bf16.mxu0 %v9368_v2 }
  0xb0   : > { %1825 = vmatmul.mubr.bf16.gmra.mrb[36].mxu1 %v9364_v62 }
  0xb1   : > { %1832 = vmatprep.mubr.bf16.mxu1 %v9309_v23 }
  0xb2   : > { %1704 = vmatmul.mubr.bf16.gmra.mrb[40].mxu0 %v9377_v54 }
  0xb3   : > { %1711 = vmatprep.mubr.bf16.mxu0 %v9383_v14 }
  0xb8   : > { %1833 = vmatmul.mubr.bf16.gmra.mrb[40].mxu1 %v9379_v58 }
  0xb9   : > { %1840 = vmatprep.mubr.bf16.mxu1 %v9336_v40 }
  0xba   : > { %1712 = vmatmul.mubr.bf16.gmra.mrb[44].mxu0 %v9389_v20 }
  0xbb   : > { %1945 = vmatprep.mubr.bf16.mxu0 %v9252_v61  ;;  %v9412_v61 = vpack.c.bf16 %v697_v33, %v696_v31 }
  0xc0   : > { %1841 = vmatmul.mubr.bf16.gmra.mrb[44].mxu1 %v9391_v21 }
  0xc1   : > { %1848 = vmatprep.mubr.bf16.mxu1 %v9362_v59 }
  0xc2   : > { %1946 = vmatmul.mubr.bf16.vlgmr.msra.gmra.mrb[48].mxu0 %v9081_v36  ;;  %v698_v36 = vld [vmem:[#allocation2 + $0x149] sm:$0xff] }
  0xc3   : > { %8220 = vmatpush3.bf16.msra.mxu0 %v9282_v11  ;;  %1953 = vmatprep.mubr.bf16.mxu0 %v9286_v13  ;;  %v8500_v11 = vld [vmem:[%s11299_s1 + $0x220] sm:$0xff]   ;;  %v9424_v13 = vpack.c.bf16 %v699_v37, %v698_v36 }
  0xc4   : > { %8221 = vmatprep.subr.bf16.mxu0 %v8485_v30 }
  0xc7   : > { %8222 = vmatpush3.bf16.msra.mxu0 %v8485_v30  ;;  %v968_v30 = vld [vmem:[#allocation2 + $0x51] sm:$0xff] }
  0xc8   : > { %1849 = vmatmul.mubr.bf16.gmra.mrb[48].mxu1 %v9399_v29  ;;  %8223 = vmatprep.subr.bf16.mxu0 %v8488_v34 }
  0xc9   : > { %1856 = vmatprep.mubr.bf16.mxu1 %v9377_v54 }
  0xca   : > { %1954 = vmatmul.mubr.bf16.gmra.mrb[52].mxu0 %v9111_v56 }
  0xcb   : > { %1961 = vmatprep.mubr.bf16.mxu0 %v9311_v26  ;;  %8224 = vmatpush3.bf16.msra.mxu0 %v8488_v34  ;;  %v8507_v34 = vld [vmem:[%s11302_s4 + $0x8] sm:$0xff]  }
  0xcc   : > { %8225 = vmatprep.subr.bf16.mxu0 %v8492_v35 }
  0xcf   : > { %8226 = vmatpush3.bf16.msra.mxu0 %v8492_v35 }
  0xd0   : > { %1857 = vmatmul.mubr.bf16.gmra.mrb[52].mxu1 %v9412_v61  ;;  %8227 = vmatprep.subr.bf16.mxu0 %v8500_v11 }
  0xd1   : > { %1864 = vmatprep.mubr.bf16.mxu1 %v9389_v20 }
  0xd2   : > { %1962 = vmatmul.mubr.bf16.gmra.mrb[56].mxu0 %v9139_v7 }
  0xd3   : > { %1969 = vmatprep.mubr.bf16.mxu0 %v9338_v41  ;;  %8228 = vmatpush3.bf16.msra.mxu0 %v8500_v11 }
  0xd4   : > { %8229 = vmatprep.subr.bf16.mxu0 %v8501_v38 }
  0xd7   : > { %8230 = vmatpush3.bf16.msra.mxu0 %v8501_v38 }
  0xd8   : > { %1865 = vmatmul.mubr.bf16.gmra.mrb[56].mxu1 %v9424_v13  ;;  %8231 = vmatprep.subr.bf16.mxu0 %v8502_v45 }
  0xd9   : > { %1872 = vmatprep.mubr.bf16.mxu1 %v9070_v32  ;;  %v9445_v32 = vpack.c.bf16 %v703_v53, %v702_v51 }
  0xda   : > { %1970 = vmatmul.mubr.bf16.gmra.mrb[60].mxu0 %v9181_v28 }
  0xdb   : > { %1977 = vmatprep.mubr.bf16.mxu0 %v9364_v62  ;;  %8232 = vmatpush3.bf16.msra.mxu0 %v8502_v45 }
  0xdc   : > { %8233 = vmatprep.subr.bf16.mxu0 %v8503_v50 }
  0xdf   : > { %8234 = vmatpush3.bf16.msra.mxu0 %v8503_v50 }
  0xe0   : > { %1873 = vmatmul.mubr.bf16.gmra.mrb[60].mxu1 %v9436_v49 }
  0xe1   : > { %1880 = vmatprep.mubr.bf16.mxu1 %v9106_v52  ;;  %v706_v52 = vld [vmem:[#allocation2 + $0x1c9] sm:$0xff] }
  0xe2   : > { %1978 = vmatmul.mubr.bf16.gmra.mrb[64].mxu0 %v9223_v47  ;;  %v9457_v8 = vpack.c.bf16 %v707_v57, %v706_v52 }
  0xe3   : > { %1985 = vmatprep.mubr.bf16.mxu0 %v9379_v58 }
  0xe8   : > { %1881 = vmatmul.mubr.bf16.gmra.mrb[64].mxu1 %v9445_v32 }
  0xe9   : > { %1888 = vmatprep.mubr.bf16.mxu1 %v9134_v5  ;;  %v708_v5 = vld [vmem:[#allocation2 + $0x1e9] sm:$0xff] }
  0xea   : > { %1986 = vmatmul.mubr.bf16.gmra.mrb[68].mxu0 %v9259_v63  ;;  %v9465_v16 = vpack.c.bf16 %v709_v10, %v708_v5 }
  0xeb   : > { %1993 = vmatprep.mubr.bf16.mxu0 %v9391_v21 }
  0xf0   : > { %1889 = vmatmul.mubr.bf16.gmra.mrb[68].mxu1 %v9451_v55 }
  0xf1   : > { %1896 = vmatprep.mubr.bf16.mxu1 %v9172_v25 }
  0xf2   : > { %1994 = vmatmul.mubr.bf16.gmra.mrb[72].mxu0 %v9294_v15 }
  0xf3   : > { %2001 = vmatprep.mubr.bf16.mxu0 %v9399_v29 }
  0xf8   : > { %1897 = vmatmul.mubr.bf16.gmra.mrb[72].mxu1 %v9457_v8 }
  0xf9   : > { %1904 = vmatprep.mubr.bf16.mxu1 %v9459_v9 }
  0xfa   : > { %2002 = vmatmul.mubr.bf16.gmra.mrb[76].mxu0 %v9315_v27 }
  0xfb   : > { %2009 = vmatprep.mubr.bf16.mxu0 %v9412_v61 }
 0x100   : > { %1905 = vmatmul.mubr.bf16.gmra.mrb[76].mxu1 %v9465_v16 }
 0x101   : > { %2106 = vmatprep.mubr.bf16.mxu1 %v9111_v56  ;;  %v796_v56 = vld [vmem:[#allocation2 + $0x188] sm:$0xff] }
 0x102   : > { %2010 = vmatmul.mubr.bf16.gmra.mrb[80].mxu0 %v9343_v43 }
 0x103   : > { %2017 = vmatprep.mubr.bf16.mxu0 %v9424_v13 }
 0x108   : > { %2107 = vmatmul.mubr.bf16.vlgmr.msra.gmra.mrb[80].mxu1 %v9132_v4  ;;  %v797_v4 = vld [vmem:[#allocation2 + $0x190] sm:$0xff] }
 0x109   : > { %2114 = vmatprep.mubr.bf16.mxu1 %v9139_v7  ;;  %v9483_v25 = vpack.c.bf16 %v797_v4, %v796_v56  ;;  %v798_v7 = vld [vmem:[#allocation2 + $0x1a8] sm:$0xff] }
 0x10a   : > { %2018 = vmatmul.mubr.bf16.gmra.mrb[84].mxu0 %v9368_v2 }
 0x10b   : > { %2025 = vmatprep.mubr.bf16.mxu0 %v9436_v49 }
 0x110   : > { %2115 = vmatmul.mubr.bf16.gmra.mrb[84].mxu1 %v9170_v24  ;;  %v799_v24 = vld [vmem:[#allocation2 + $0x1b0] sm:$0xff] }
 0x111   : > { %2122 = vmatprep.mubr.bf16.mxu1 %v9181_v28  ;;  %v9489_v28 = vpack.c.bf16 %v799_v24, %v798_v7  ;;  %v8509_v24 = vld [vmem:[%s11302_s4 + $0x10] sm:$0xff]  }
 0x112   : > { %2026 = vmatmul.mubr.bf16.gmra.mrb[88].mxu0 %v9383_v14 }
 0x113   : > { %2033 = vmatprep.mubr.bf16.mxu0 %v9445_v32 }
 0x118   : > { %2123 = vmatmul.mubr.bf16.gmra.mrb[88].mxu1 %v9216_v44  ;;  %v800_v44 = vld [vmem:[#allocation2 + $0x1c8] sm:$0xff] }
 0x119   : > { %2130 = vmatprep.mubr.bf16.mxu1 %v9223_v47  ;;  %v801_v47 = vld [vmem:[#allocation2 + $0x1d0] sm:$0xff] }
 0x11a   : > { %2034 = vmatmul.mubr.bf16.gmra.mrb[92].mxu0 %v9483_v25  ;;  %v9501_v17 = vpack.c.bf16 %v801_v47, %v800_v44 }
 0x11b   : > { %2041 = vmatprep.mubr.bf16.mxu0 %v9451_v55 }
 0x120   : > { %2131 = vmatmul.mubr.bf16.gmra.mrb[92].mxu1 %v9250_v60  ;;  %v8504_v60 = vld [vmem:[%s11302_s4 + $0x40] sm:$0xff]  }
 0x121   : > { %2138 = vmatprep.mubr.bf16.mxu1 %v9259_v63  ;;  %7275 = vmatprep.subr.bf16.mxu1 %v8504_v60  ;;  %v8505_v63 = vld [vmem:[%s11302_s4] sm:$0xff]  }
 0x122   : > { %2042 = vmatmul.mubr.bf16.gmra.mrb[96].mxu0 %v9489_v28  ;;  %7276 = vmatpush3.bf16.msra.mxu1 %v8505_v63 }
 0x123   : > { %2049 = vmatprep.mubr.bf16.mxu0 %v9457_v8 }
 0x128   : > { %2139 = vmatmul.mubr.bf16.gmra.mrb[96].mxu1 %v9284_v12  ;;  %v802_v12 = vld [vmem:[#allocation2 + $0x1e8] sm:$0xff]  ;;  %v6819_v31 = vpop.f32.mrb[0].mxu0 }
 0x129   : > { %2146 = vmatprep.mubr.bf16.mxu1 %v9294_v15  ;;  %v803_v15 = vld [vmem:[#allocation2 + $0x1f0] sm:$0xff]  ;;  %v6820_v35 = vpop.f32.mrb[1].mxu0 }
 0x12a   : > { %2050 = vmatmul.mubr.bf16.gmra.mrb[100].mxu0 %v9501_v17  ;;  %v9507_v0 = vpack.c.bf16 %v803_v15, %v802_v12  ;;  %v6822_v37 = vpop.f32.mrb[2].mxu0 }
 0x12b   : > { %2057 = vmatprep.mubr.bf16.mxu0 %v9465_v16  ;;  %v6823_v39 = vpop.f32.mrb[3].mxu0 }
 0x12c   : > { %v9525_v45 = vadd.f32 %v6823_v39, %v6822_v37  ;;  %v8510_v39 = vld [vmem:[%s11302_s4 + $0x58] sm:$0xff]  }
 0x130   : > { %2147 = vmatmul.mubr.bf16.gmra.mrb[100].mxu1 %v9309_v23  ;;  %v8506_v23 = vld [vmem:[%s11302_s4 + $0x48] sm:$0xff]  }
 0x131   : > { %2154 = vmatprep.mubr.bf16.mxu1 %v9315_v27  ;;  %v967_v27 = vld [vmem:[#allocation2 + $0x49] sm:$0xff]  ;;  %7277 = vmatprep.subr.bf16.mxu1 %v8506_v23 }
 0x132   : > { %2058 = vmatmul.mubr.bf16.gmra.mrb[104].mxu0 %v9507_v0  ;;  %v999_v11 = vpack.c.bf16 %v968_v30, %v967_v27  ;;  %7278 = vmatpush3.bf16.msra.mxu1 %v8507_v34 }
 0x133   : > { %2065 = vmatprep.mubr.bf16.mxu0 %v9509_v1 }
 0x138   : > { %2155 = vmatmul.mubr.bf16.gmra.mrb[104].mxu1 %v9336_v40  ;;  %v9521_v40 = vadd.f32 %v6820_v35, %v6819_v31 }
 0x139   : > { %2162 = vmatprep.mubr.bf16.mxu1 %v9343_v43 }
 0x13a   : > { %2066 = vmatmul.mubr.bf16.gmra.mrb[108].mxu0 %v9393_v22 }
 0x13b   : > { %v6891_v33 = vpop.f32.mrb[0].mxu1  ;;  %8235 = vmatprep.mubr.bf16.mxu0 %v999_v11 }
 0x13c   : > { %v6892_v36 = vpop.f32.mrb[1].mxu1 }
 0x13d   : > { %v9523_v43 = vadd.f32 %v6892_v36, %v6891_v33  ;;  %v6894_v38 = vpop.f32.mrb[2].mxu1  ;;  %v6825_v51 = vpop.f32.mrb[4].mxu0  ;;  %v913_v33 = vpack.c.bf16 %v892_v19, %v891_v18 }
 0x13e   : > { %v6895_v42 = vpop.f32.mrb[3].mxu1  ;;  %v6826_v46 = vpop.f32.mrb[5].mxu0 }
 0x13f   : > { %v9527_v50 = vadd.f32 %v6895_v42, %v6894_v38  ;;  %v9532_v52 = vadd.f32 %v6826_v46, %v6825_v51  ;;  %v6828_v57 = vpop.f32.mrb[6].mxu0  ;;  %v894_v38 = vld [vmem:[#allocation2 + $0x1af] sm:$0xff] }
 0x140   : > { %2163 = vmatmul.mubr.bf16.gmra.mrb[108].mxu1 %v9362_v59  ;;  %v6829_v5 = vpop.f32.mrb[7].mxu0  ;;  %v8508_v59 = vld [vmem:[%s11302_s4 + $0x50] sm:$0xff]  }
 0x141   : > { %2170 = vmatprep.mubr.bf16.mxu1 %v9368_v2  ;;  %v9536_v56 = vadd.f32 %v6829_v5, %v6828_v57  ;;  %7279 = vmatprep.subr.bf16.mxu1 %v8508_v59 }
 0x142   : > { %8236 = vmatmul.mubr.bf16.vlgmr.msra.gmra.mrb[112].mxu0 %v9311_v26  ;;  %7280 = vmatpush3.bf16.msra.mxu1 %v8509_v24 }
 0x143   : > { %v6897_v53 = vpop.f32.mrb[4].mxu1  ;;  %8239 = vmatprep.mubr.bf16.mxu0 %v9338_v41  ;;  %7281 = vmatprep.subr.bf16.mxu1 %v8510_v39 }
 0x144   : > { %v6898_v48 = vpop.f32.mrb[5].mxu1 }
 0x145   : > { %v9534_v3 = vadd.f32 %v6898_v48, %v6897_v53  ;;  %v6900_v6 = vpop.f32.mrb[6].mxu1  ;;  %v6831_v2 = vpop.f32.mrb[8].mxu0  ;;  %v8511_v53 = vld [vmem:[%s11302_s4 + $0x18] sm:$0xff]  }
 0x146   : > { %v6901_v10 = vpop.f32.mrb[7].mxu1  ;;  %v6832_v44 = vpop.f32.mrb[9].mxu0  ;;  %7282 = vmatpush3.bf16.msra.mxu1 %v8511_v53 }
 0x147   : > { %v9538_v4 = vadd.f32 %v6901_v10, %v6900_v6  ;;  %v6834_v26 = vpop.f32.mrb[10].mxu0 }
 0x148   : > { %2171 = vmatmul.mubr.bf16.gmra.mrb[112].mxu1 %v9377_v54  ;;  %v9550_v54 = vadd.f32 %v6832_v44, %v6831_v2  ;;  %v6835_v41 = vpop.f32.mrb[11].mxu0  ;;  %v895_v44 = vld [vmem:[#allocation2 + $0x1c7] sm:$0xff] }
 0x149   : > { %2178 = vmatprep.mubr.bf16.mxu1 %v9383_v14  ;;  %v9554_v12 = vadd.f32 %v6835_v41, %v6834_v26 }
 0x14a   : > { %8240 = vmatmul.mubr.bf16.gmra.mrb[116].mxu0 %v9364_v62 }
 0x14b   : > { %v6903_v7 = vpop.f32.mrb[8].mxu1  ;;  %8243 = vmatprep.mubr.bf16.mxu0 %v9379_v58  ;;  %v893_v58 = vld [vmem:[#allocation2 + $0x1a7] sm:$0xff] }
 0x14c   : > { %v6904_v47 = vpop.f32.mrb[9].mxu1 }
 0x14d   : > { %v9552_v60 = vadd.f32 %v6904_v47, %v6903_v7  ;;  %v6906_v14 = vpop.f32.mrb[10].mxu1  ;;  %v6837_v23 = vpop.f32.mrb[12].mxu0  ;;  %v896_v47 = vld [vmem:[#allocation2 + $0x1cf] sm:$0xff] }
 0x14e   : > { %v6907_v63 = vpop.f32.mrb[11].mxu1  ;;  %v6838_v30 = vpop.f32.mrb[13].mxu0 }
 0x14f   : > { %v9556_v15 = vadd.f32 %v6907_v63, %v6906_v14  ;;  %v9562_v34 = vadd.f32 %v6838_v30, %v6837_v23  ;;  %v6840_v35 = vpop.f32.mrb[14].mxu0  ;;  %v915_v63 = vpack.c.bf16 %v896_v47, %v895_v44  ;;  %v8648_v47 = vld [vmem:[#allocation2 + $0x8] sm:$0xff] }
 0x150   : > { %2179 = vmatmul.mubr.bf16.gmra.mrb[116].mxu1 %v9389_v20  ;;  %v6841_v20 = vpop.f32.mrb[15].mxu0 }
 0x151   : > { %2186 = vmatprep.mubr.bf16.mxu1 %v9483_v25  ;;  %v9566_v62 = vadd.f32 %v6841_v20, %v6840_v35  ;;  %v898_v35 = vld [vmem:[#allocation2 + $0x1ef] sm:$0xff] }
 0x152   : > { %8244 = vmatmul.mubr.bf16.gmra.mrb[120].mxu0 %v9391_v21  ;;  %v914_v21 = vpack.c.bf16 %v894_v38, %v893_v58 }
 0x153   : > { %v6909_v27 = vpop.f32.mrb[12].mxu1  ;;  %8247 = vmatprep.mubr.bf16.mxu0 %v9399_v29 }
 0x154   : > { %v6910_v31 = vpop.f32.mrb[13].mxu1 }
 0x155   : > { %v9564_v36 = vadd.f32 %v6910_v31, %v6909_v27  ;;  %v6912_v37 = vpop.f32.mrb[14].mxu1  ;;  %v6843_v42 = vpop.f32.mrb[16].mxu0 }
 0x156   : > { %v6913_v11 = vpop.f32.mrb[15].mxu1  ;;  %v6844_v46 = vpop.f32.mrb[17].mxu0 }
 0x157   : > { %v9568_v25 = vadd.f32 %v6913_v11, %v6912_v37  ;;  %v9579_v57 = vadd.f32 %v6844_v46, %v6843_v42  ;;  %v6846_v29 = vpop.f32.mrb[18].mxu0 }
 0x158   : > { %2187 = vmatmul.mubr.bf16.gmra.mrb[120].mxu1 %v913_v33  ;;  %v6847_v5 = vpop.f32.mrb[19].mxu0  ;;  %v897_v33 = vld [vmem:[#allocation2 + $0x1e7] sm:$0xff] }
 0x159   : > { %2194 = vmatprep.mubr.bf16.mxu1 %v9489_v28  ;;  %v9584_v2 = vadd.f32 %v6847_v5, %v6846_v29  ;;  %v916_v58 = vpack.c.bf16 %v898_v35, %v897_v33 }
 0x15a   : > { %8248 = vmatmul.mubr.bf16.gmra.mrb[124].mxu0 %v9412_v61 }
 0x15b   : > { %v6931_v51 = vpop.f32.mrb[16].mxu1  ;;  %8251 = vmatprep.mubr.bf16.mxu0 %v9424_v13 }
 0x15c   : > { %v6932_v48 = vpop.f32.mrb[17].mxu1 }
 0x15d   : > { %v6933_v28 = vadd.f32 %v6932_v48, %v6931_v51  ;;  %v6934_v6 = vpop.f32.mrb[18].mxu1  ;;  %v6849_v26 = vpop.f32.mrb[20].mxu0 }
 0x15e   : > { %v6935_v10 = vpop.f32.mrb[19].mxu1  ;;  %v6850_v41 = vpop.f32.mrb[21].mxu0 }
 0x15f   : > { %v9582_v59 = vadd.f32 %v6933_v28, %v9521_v40  ;;  %v6936_v7 = vadd.f32 %v6935_v10, %v6934_v6  ;;  %v9592_v18 = vadd.f32 %v6850_v41, %v6849_v26  ;;  %v6852_v23 = vpop.f32.mrb[22].mxu0  ;;  %v966_v26 = vpack.c.bf16 %v8648_v47, %v8648_v47 }
 0x160   : > { %2195 = vmatmul.mubr.bf16.gmra.mrb[124].mxu1 %v914_v21  ;;  %v6853_v61 = vpop.f32.mrb[23].mxu0 }
 0x161   : > { %v9588_v24 = vadd.f32 %v6936_v7, %v9525_v45  ;;  %2202 = vmatprep.mubr.bf16.mxu1 %v9501_v17  ;;  %v9597_v17 = vadd.f32 %v6853_v61, %v6852_v23  ;;  %v998_v23 = vld [vmem:[#allocation2 + $0x231] sm:$0xff] }
 0x162   : > { %8252 = vmatmul.mubr.bf16.gmra.mrb[128].mxu0 %v9436_v49  ;;  %v8513_v49 = vld [vmem:[%s11302_s4 + $0x20] sm:$0xff]  }
 0x163   : > { %v6937_v14 = vpop.f32.mrb[20].mxu1  ;;  %8255 = vmatprep.mubr.bf16.mxu0 %v9445_v32 }
 0x164   : > { %v6938_v40 = vpop.f32.mrb[21].mxu1 }
 0x165   : > { %v6939_v19 = vadd.f32 %v6938_v40, %v6937_v14  ;;  %v6940_v27 = vpop.f32.mrb[22].mxu1  ;;  %v6855_v37 = vpop.f32.mrb[24].mxu0  ;;  %v902_v40 = vld [vmem:[#allocation2 + $0x22f] sm:$0xff] }
 0x166   : > { %v6941_v30 = vpop.f32.mrb[23].mxu1  ;;  %v6856_v11 = vpop.f32.mrb[25].mxu0 }
 0x167   : > { %v9595_v45 = vadd.f32 %v6939_v19, %v9532_v52  ;;  %v6942_v13 = vadd.f32 %v6941_v30, %v6940_v27  ;;  %v8512_v52 = vld [vmem:[%s11302_s4 + $0x60] sm:$0xff]   ;;  %v9611_v38 = vadd.f32 %v6856_v11, %v6855_v37  ;;  %v6858_v32 = vpop.f32.mrb[26].mxu0  ;;  %v997_v19 = vld [vmem:[#allocation2 + $0x229] sm:$0xff] }
 0x168   : > { %2203 = vmatmul.mubr.bf16.gmra.mrb[128].mxu1 %v915_v63  ;;  %7283 = vmatprep.subr.bf16.mxu1 %v8512_v52  ;;  %v6859_v42 = vpop.f32.mrb[27].mxu0 }
 0x169   : > { %v9601_v31 = vadd.f32 %v6942_v13, %v9536_v56  ;;  %2210 = vmatprep.mubr.bf16.mxu1 %v9507_v0  ;;  %7284 = vmatpush3.bf16.msra.mxu1 %v8513_v49  ;;  %v9616_v46 = vadd.f32 %v6859_v42, %v6858_v32  ;;  %v1014_v13 = vpack.c.bf16 %v998_v23, %v997_v19 }
 0x16a   : > { %8256 = vmatmul.mubr.bf16.gmra.mrb[132].mxu0 %v9451_v55 }
 0x16b   : > { %v6943_v20 = vpop.f32.mrb[24].mxu1  ;;  %8259 = vmatprep.mubr.bf16.mxu0 %v9457_v8  ;;  %v901_v8 = vld [vmem:[#allocation2 + $0x227] sm:$0xff] }
 0x16c   : > { %v6944_v56 = vpop.f32.mrb[25].mxu1 }
 0x16d   : > { %v6945_v0 = vadd.f32 %v6944_v56, %v6943_v20  ;;  %v6946_v39 = vpop.f32.mrb[26].mxu1  ;;  %v6861_v28 = vpop.f32.mrb[28].mxu0 }
 0x16e   : > { %v6947_v51 = vpop.f32.mrb[27].mxu1  ;;  %v6862_v6 = vpop.f32.mrb[29].mxu0 }
 0x16f   : > { %v9614_v53 = vadd.f32 %v6945_v0, %v9550_v54  ;;  %v6948_v48 = vadd.f32 %v6947_v51, %v6946_v39  ;;  %v9624_v10 = vadd.f32 %v6862_v6, %v6861_v28  ;;  %v6864_v7 = vpop.f32.mrb[30].mxu0 }
 0x170   : > { %2211 = vmatmul.mubr.bf16.gmra.mrb[132].mxu1 %v916_v58  ;;  %v6865_v14 = vpop.f32.mrb[31].mxu0 }
 0x171   : > { %v9620_v21 = vadd.f32 %v6948_v48, %v9554_v12  ;;  %2218 = vmatprep.mubr.bf16.mxu1 %v9393_v22  ;;  %v9629_v41 = vadd.f32 %v6865_v14, %v6864_v7  ;;  %v8517_v14 = vld [vmem:[%s11302_s4 + $0x30] sm:$0xff]  }
 0x172   : > { %8260 = vmatmul.mubr.bf16.gmra.mrb[136].mxu0 %v9465_v16 }
 0x173   : > { %v6949_v29 = vpop.f32.mrb[28].mxu1  ;;  %8263 = vmatprep.mubr.bf16.mxu0 %v9509_v1 }
 0x174   : > { %v6950_v5 = vpop.f32.mrb[29].mxu1 }
 0x175   : > { %v6951_v54 = vadd.f32 %v6950_v5, %v6949_v29  ;;  %v6952_v44 = vpop.f32.mrb[30].mxu1  ;;  %v6867_v27 = vpop.f32.mrb[32].mxu0 }
 0x176   : > { %v6953_v55 = vpop.f32.mrb[31].mxu1  ;;  %v6868_v16 = vpop.f32.mrb[33].mxu0 }
 0x177   : > { %v9627_v12 = vadd.f32 %v6951_v54, %v9562_v34  ;;  %v6954_v22 = vadd.f32 %v6953_v55, %v6952_v44  ;;  %v8514_v34 = vld [vmem:[%s11302_s4 + $0x68] sm:$0xff]   ;;  %v9643_v33 = vadd.f32 %v6868_v16, %v6867_v27  ;;  %v6870_v35 = vpop.f32.mrb[34].mxu0  ;;  %v8516_v44 = vld [vmem:[%s11302_s4 + $0x70] sm:$0xff]  }
 0x178   : > { %2219 = vmatmul.mubr.bf16.gmra.mrb[136].mxu1 %v9459_v9  ;;  %7285 = vmatprep.subr.bf16.mxu1 %v8514_v34  ;;  %v8515_v9 = vld [vmem:[%s11302_s4 + $0x28] sm:$0xff]   ;;  %v6871_v37 = vpop.f32.mrb[35].mxu0 }
 0x179   : > { %v9634_v63 = vadd.f32 %v6954_v22, %v9566_v62  ;;  %2226 = vmatprep.mubr.bf16.mxu1 %v966_v26  ;;  %v918_v62 = vpack.c.bf16 %v902_v40, %v901_v8  ;;  %7286 = vmatpush3.bf16.msra.mxu1 %v8515_v9  ;;  %v9648_v11 = vadd.f32 %v6871_v37, %v6870_v35  ;;  %v8518_v9 = vld [vmem:[%s11302_s4 + $0xc0] sm:$0xff]   ;;  %v8520_v35 = vld [vmem:[%s11302_s4 + $0xc8] sm:$0xff]  }
 0x17a   : > { %8264 = vmatmul.mubr.bf16.gmra.mrb[140].mxu0 %v1014_v13  ;;  %7287 = vmatprep.subr.bf16.mxu1 %v8516_v44 }
 0x17b   : > { %v6955_v61 = vpop.f32.mrb[32].mxu1  ;;  %7387 = vmatprep.subr.bf16.mxu0 %v8518_v9 }
 0x17c   : > { %v6956_v30 = vpop.f32.mrb[33].mxu1 }
 0x17d   : > { %v6957_v1 = vadd.f32 %v6956_v30, %v6955_v61  ;;  %v6958_v52 = vpop.f32.mrb[34].mxu1  ;;  %v6873_v0 = vpop.f32.mrb[36].mxu0  ;;  %7288 = vmatpush3.bf16.msra.mxu1 %v8517_v14  ;;  %v8519_v30 = vld [vmem:[%s11302_s4 + $0x80] sm:$0xff]  }
 0x17e   : > { %v6959_v20 = vpop.f32.mrb[35].mxu1  ;;  %v6874_v39 = vpop.f32.mrb[37].mxu0  ;;  %7388 = vmatpush3.bf16.msra.mxu0 %v8519_v30  ;;  %v8528_v30 = vld [vmem:[%s11302_s4 + $0xe0] sm:$0xff]  }
 0x17f   : > { %v9646_v49 = vadd.f32 %v6957_v1, %v9579_v57  ;;  %v6960_v56 = vadd.f32 %v6959_v20, %v6958_v52  ;;  %v9653_v51 = vadd.f32 %v6874_v39, %v6873_v0  ;;  %v6876_v28 = vpop.f32.mrb[38].mxu0  ;;  %7389 = vmatprep.subr.bf16.mxu0 %v8520_v35  ;;  %v2539_v35 = vld [vmem:[#allocation3 + $0x7] sm:$0xff] }
 0x180   : > { %2227 = vmatmul.mubr.bf16.gmra.mrb[140].mxu1 %v918_v62  ;;  %v6877_v57 = vpop.f32.mrb[39].mxu0 }
 0x181   : > { %v9651_v58 = vadd.f32 %v6960_v56, %v9584_v2  ;;  %3580 = vmatprep.mubr.bf16.mxu1 %v966_v26  ;;  %v9658_v54 = vadd.f32 %v6877_v57, %v6876_v28  ;;  %v8521_v56 = vld [vmem:[%s11302_s4 + $0x88] sm:$0xff]   ;;  %v8523_v28 = vld [vmem:[%s11302_s4 + $0xd0] sm:$0xff]   ;;  %v8522_v57 = vld [vmem:[%s11302_s4 + $0x78] sm:$0xff]  }
 0x182   : > { %7390 = vmatpush3.bf16.msra.mxu0 %v8521_v56  ;;  %7289 = vmatprep.subr.bf16.mxu1 %v8522_v57 }
 0x183   : > { %v6961_v32 = vpop.f32.mrb[36].mxu1  ;;  %7391 = vmatprep.subr.bf16.mxu0 %v8523_v28  ;;  %v8531_v28 = vld [vmem:[%s11302_s4 + $0xa8] sm:$0xff]  }
 0x184   : > { %v6962_v42 = vpop.f32.mrb[37].mxu1 }
 0x185   : > { %v6963_v48 = vadd.f32 %v6962_v42, %v6961_v32  ;;  %v6964_v29 = vpop.f32.mrb[38].mxu1  ;;  %v6879_v47 = vpop.f32.mrb[40].mxu0 }
 0x186   : > { %v6965_v6 = vpop.f32.mrb[39].mxu1  ;;  %v6880_v55 = vpop.f32.mrb[41].mxu0 }
 0x187   : > { %v9656_v5 = vadd.f32 %v6963_v48, %v9592_v18  ;;  %v6966_v7 = vadd.f32 %v6965_v6, %v6964_v29  ;;  %v9669_v22 = vadd.f32 %v6880_v55, %v6879_v47  ;;  %v6882_v40 = vpop.f32.mrb[42].mxu0 }
 0x189   : > { %v9661_v2 = vadd.f32 %v6966_v7, %v9597_v17  ;;  %v6883_v17 = vpop.f32.mrb[43].mxu0 }
 0x18a   : > { %v9674_v27 = vadd.f32 %v6883_v17, %v6882_v40 }
 0x18b   : > { %v6967_v26 = vpop.f32.mrb[40].mxu1 }
 0x18c   : > { %v6968_v18 = vpop.f32.mrb[41].mxu1 }
 0x18d   : > { %v6969_v8 = vadd.f32 %v6968_v18, %v6967_v26  ;;  %v6970_v19 = vpop.f32.mrb[42].mxu1  ;;  %v6885_v62 = vpop.f32.mrb[44].mxu0 }
 0x18e   : > { %v6971_v23 = vpop.f32.mrb[43].mxu1 }
 0x18f   : > { %v9672_v34 = vadd.f32 %v6969_v8, %v9611_v38  ;;  %v6972_v61 = vadd.f32 %v6971_v23, %v6970_v19  ;;  %v6886_v38 = vpop.f32.mrb[45].mxu0  ;;  %v8527_v8 = vld [vmem:[%s11302_s4 + $0x98] sm:$0xff]  }
 0x190   : > { %v9688_v52 = vadd.f32 %v6886_v38, %v6885_v62  ;;  %v6888_v20 = vpop.f32.mrb[46].mxu0 }
 0x191   : > { %v9680_v16 = vadd.f32 %v6972_v61, %v9616_v46  ;;  %v6889_v0 = vpop.f32.mrb[47].mxu0 }
 0x192   : > { %v9696_v42 = vadd.f32 %v6889_v0, %v6888_v20 }
 0x193   : > { %v6973_v13 = vpop.f32.mrb[44].mxu1 }
 0x194   : > { %v6974_v1 = vpop.f32.mrb[45].mxu1 }
 0x195   : > { %v6975_v37 = vadd.f32 %v6974_v1, %v6973_v13  ;;  %v6976_v46 = vpop.f32.mrb[46].mxu1  ;;  %v7043_v7 = vpop.f32.mrb[48].mxu0 }
 0x196   : > { %v6977_v32 = vpop.f32.mrb[47].mxu1  ;;  %v7044_v47 = vpop.f32.mrb[49].mxu0 }
 0x197   : > { %v9694_v39 = vadd.f32 %v6975_v37, %v9624_v10  ;;  %v6978_v48 = vadd.f32 %v6977_v32, %v6976_v46  ;;  %v8525_v10 = vld [vmem:[%s11302_s4 + $0x90] sm:$0xff]   ;;  %v7045_v14 = vadd.f32 %v7044_v47, %v7043_v7  ;;  %v7046_v18 = vpop.f32.mrb[50].mxu0 }
 0x198   : > { %7392 = vmatpush3.bf16.msra.mxu0 %v8525_v10  ;;  %v7047_v19 = vpop.f32.mrb[51].mxu0  ;;  %v2540_v37 = vld [vmem:[#allocation3 + $0xf] sm:$0xff] }
 0x199   : > { %v9702_v29 = vadd.f32 %v6978_v48, %v9629_v41  ;;  %v8526_v41 = vld [vmem:[%s11302_s4 + $0xd8] sm:$0xff]   ;;  %v9720_v23 = vadd.f32 %v7045_v14, %v9582_v59  ;;  %v7048_v9 = vadd.f32 %v7047_v19, %v7046_v18  ;;  %v8529_v59 = vld [vmem:[%s11302_s4 + $0xa0] sm:$0xff]   ;;  %v2571_v46 = vpack.c.bf16 %v2540_v37, %v2539_v35 }
 0x19a   : > { %7393 = vmatprep.subr.bf16.mxu0 %v8526_v41  ;;  %v8532_v41 = vld [vmem:[%s11302_s4 + $0xf0] sm:$0xff]   ;;  %v8533_v37 = vld [vmem:[%s11302_s4 + $0x140] sm:$0xff]  }
 0x19b   : > { %v6979_v6 = vpop.f32.mrb[48].mxu1  ;;  %v9729_v13 = vadd.f32 %v7048_v9, %v9588_v24  ;;  %v8530_v24 = vld [vmem:[%s11302_s4 + $0xe8] sm:$0xff]  }
 0x19c   : > { %v6980_v44 = vpop.f32.mrb[49].mxu1  ;;  %7394 = vmatpush3.bf16.msra.mxu0 %v8527_v8 }
 0x19d   : > { %v6981_v26 = vadd.f32 %v6980_v44, %v6979_v6  ;;  %v6982_v55 = vpop.f32.mrb[50].mxu1  ;;  %7395 = vmatprep.subr.bf16.mxu0 %v8528_v30  ;;  %v7049_v1 = vpop.f32.mrb[52].mxu0 }
 0x19e   : > { %v6983_v40 = vpop.f32.mrb[51].mxu1  ;;  %v7050_v20 = vpop.f32.mrb[53].mxu0 }
 0x19f   : > { %v9717_v17 = vadd.f32 %v6981_v26, %v9643_v33  ;;  %v6984_v61 = vadd.f32 %v6983_v40, %v6982_v55  ;;  %v8524_v33 = vld [vmem:[%s11302_s4 + $0x38] sm:$0xff]   ;;  %v7051_v0 = vadd.f32 %v7050_v20, %v7049_v1  ;;  %v7052_v48 = vpop.f32.mrb[54].mxu0 }
 0x1a0   : > { %7290 = vmatpush3.bf16.msra.mxu1 %v8524_v33  ;;  %7396 = vmatpush3.bf16.msra.mxu0 %v8529_v59  ;;  %v7053_v10 = vpop.f32.mrb[55].mxu0  ;;  %v8536_v40 = vld [vmem:[%s11302_s4 + $0xf8] sm:$0xff]  }
 0x1a1   : > { %v9726_v62 = vadd.f32 %v6984_v61, %v9648_v11  ;;  %7397 = vmatprep.subr.bf16.mxu0 %v8530_v24  ;;  %v9747_v7 = vadd.f32 %v7051_v0, %v9595_v45  ;;  %v7054_v47 = vadd.f32 %v7053_v10, %v7052_v48  ;;  %7499 = vmatprep.subr.bf16.mxu1 %v8533_v37 }
 0x1a3   : > { %v6985_v38 = vpop.f32.mrb[52].mxu1  ;;  %3581 = vmatmul.mubr.bf16.vlgmr.msra.gmra.mrb[144].mxu1 %v2571_v46  ;;  %v9756_v14 = vadd.f32 %v7054_v47, %v9601_v31  ;;  %v8537_v31 = vld [vmem:[%s11302_s4 + $0xb8] sm:$0xff]  }
 0x1a4   : > { %v6986_v11 = vpop.f32.mrb[53].mxu1  ;;  %7398 = vmatpush3.bf16.msra.mxu0 %v8531_v28 }
 0x1a5   : > { %v6987_v56 = vadd.f32 %v6986_v11, %v6985_v38  ;;  %v6988_v32 = vpop.f32.mrb[54].mxu1  ;;  %7399 = vmatprep.subr.bf16.mxu0 %v8532_v41  ;;  %v7055_v55 = vpop.f32.mrb[56].mxu0 }
 0x1a6   : > { %v6989_v57 = vpop.f32.mrb[55].mxu1  ;;  %v7056_v8 = vpop.f32.mrb[57].mxu0 }
 0x1a7   : > { %v9744_v6 = vadd.f32 %v6987_v56, %v9653_v51  ;;  %v6990_v44 = vadd.f32 %v6989_v57, %v6988_v32  ;;  %v8534_v51 = vld [vmem:[%s11302_s4 + $0xb0] sm:$0xff]   ;;  %v7058_v9 = vpop.f32.mrb[58].mxu0 }
 0x1a8   : > { %7400 = vmatpush3.bf16.msra.mxu0 %v8534_v51  ;;  %v7059_v33 = vpop.f32.mrb[59].mxu0 }
 0x1a9   : > { %v9753_v26 = vadd.f32 %v6990_v44, %v9658_v54  ;;  %v7057_v54 = vadd.f32 %v7056_v8, %v7055_v55  ;;  %7401 = vmatprep.subr.bf16.mxu0 %v8536_v40  ;;  %v7060_v35 = vadd.f32 %v7059_v33, %v7058_v9 }
 0x1ab   : > { %v6991_v45 = vpop.f32.mrb[56].mxu1  ;;  %v9771_v38 = vadd.f32 %v7057_v54, %v9614_v53  ;;  %v9780_v20 = vadd.f32 %v7060_v35, %v9620_v21  ;;  %v8535_v53 = vld [vmem:[%s11302_s4 + $0x100] sm:$0xff]  }
 0x1ac   : > { %v6992_v18 = vpop.f32.mrb[57].mxu1  ;;  %7402 = vmatpush3.bf16.msra.mxu0 %v8537_v31  ;;  %7500 = vmatpush3.bf16.msra.mxu1 %v8535_v53 }
 0x1ad   : > { %v6993_v19 = vadd.f32 %v6992_v18, %v6991_v45  ;;  %v6994_v61 = vpop.f32.mrb[58].mxu1 }
 0x1ae   : > { %v6995_v30 = vpop.f32.mrb[59].mxu1 }
 0x1af   : > { %v9768_v59 = vadd.f32 %v6993_v19, %v9669_v22  ;;  %v6996_v1 = vadd.f32 %v6995_v30, %v6994_v61  ;;  %v7061_v22 = vpop.f32.mrb[60].mxu0 }
 0x1b0   : > { %v7062_v56 = vpop.f32.mrb[61].mxu0 }
 0x1b1   : > { %v9777_v11 = vadd.f32 %v6996_v1, %v9674_v27  ;;  %v7063_v32 = vadd.f32 %v7062_v56, %v7061_v22  ;;  %v7064_v28 = vpop.f32.mrb[62].mxu0 }
 0x1b2   : > { %v7065_v10 = vpop.f32.mrb[63].mxu0 }
 0x1b3   : > { %v6997_v24 = vpop.f32.mrb[60].mxu1  ;;  %v9789_v21 = vadd.f32 %v7063_v32, %v9627_v12  ;;  %v7066_v47 = vadd.f32 %v7065_v10, %v7064_v28 }
 0x1b4   : > { %v6998_v46 = vpop.f32.mrb[61].mxu1 }
 0x1b5   : > { %v6999_v0 = vadd.f32 %v6998_v46, %v6997_v24  ;;  %v7000_v48 = vpop.f32.mrb[62].mxu1  ;;  %v9795_v51 = vadd.f32 %v7066_v47, %v9634_v63  ;;  %v7067_v55 = vpop.f32.mrb[64].mxu0  ;;  %v8538_v63 = vld [vmem:[%s11302_s4 + $0x148] sm:$0xff]  }
 0x1b6   : > { %v7001_v57 = vpop.f32.mrb[63].mxu1  ;;  %v7068_v8 = vpop.f32.mrb[65].mxu0  ;;  %7501 = vmatprep.subr.bf16.mxu1 %v8538_v63 }
 0x1b7   : > { %v9786_v27 = vadd.f32 %v6999_v0, %v9688_v52  ;;  %v7002_v44 = vadd.f32 %v7001_v57, %v7000_v48  ;;  %v7069_v19 = vadd.f32 %v7068_v8, %v7067_v55  ;;  %v7070_v52 = vpop.f32.mrb[66].mxu0 }
 0x1b8   : > { %v7071_v9 = vpop.f32.mrb[67].mxu0 }
 0x1b9   : > { %v9792_v41 = vadd.f32 %v7002_v44, %v9696_v42  ;;  %v9801_v31 = vadd.f32 %v7069_v19, %v9646_v49  ;;  %v7072_v30 = vadd.f32 %v7071_v9, %v7070_v52  ;;  %v8539_v49 = vld [vmem:[%s11302_s4 + $0x108] sm:$0xff]  }
 0x1ba   : > { %7502 = vmatpush3.bf16.msra.mxu1 %v8539_v49 }
 0x1bb   : > { %v7003_v45 = vpop.f32.mrb[64].mxu1  ;;  %v9810_v1 = vadd.f32 %v7072_v30, %v9651_v58 }
 0x1bc   : > { %v7004_v18 = vpop.f32.mrb[65].mxu1 }
 0x1bd   : > { %v7005_v40 = vadd.f32 %v7004_v18, %v7003_v45  ;;  %v7006_v54 = vpop.f32.mrb[66].mxu1  ;;  %v7073_v37 = vpop.f32.mrb[68].mxu0 }
 0x1be   : > { %v7007_v61 = vpop.f32.mrb[67].mxu1  ;;  %v7074_v24 = vpop.f32.mrb[69].mxu0 }
 0x1bf   : > { %v9798_v12 = vadd.f32 %v7005_v40, %v9523_v43  ;;  %v7008_v42 = vadd.f32 %v7007_v61, %v7006_v54  ;;  %v7075_v46 = vadd.f32 %v7074_v24, %v7073_v37  ;;  %v7076_v53 = vpop.f32.mrb[70].mxu0 }
 0x1c0   : > { %v7077_v32 = vpop.f32.mrb[71].mxu0 }
 0x1c1   : > { %v9807_v33 = vadd.f32 %v7008_v42, %v9527_v50  ;;  %v9819_v58 = vadd.f32 %v7075_v46, %v9656_v5  ;;  %v7078_v28 = vadd.f32 %v7077_v32, %v7076_v53 }
 0x1c3   : > { %v7009_v35 = vpop.f32.mrb[68].mxu1  ;;  %v9825_v10 = vadd.f32 %v7078_v28, %v9661_v2  ;;  %v8540_v2 = vld [vmem:[%s11302_s4 + $0x150] sm:$0xff]  }
 0x1c4   : > { %v7010_v43 = vpop.f32.mrb[69].mxu1  ;;  %7503 = vmatprep.subr.bf16.mxu1 %v8540_v2  ;;  %v8542_v2 = vld [vmem:[%s11302_s4 + $0x158] sm:$0xff]  }
 0x1c5   : > { %v7011_v22 = vadd.f32 %v7010_v43, %v7009_v35  ;;  %v7012_v56 = vpop.f32.mrb[70].mxu1  ;;  %v7079_v47 = vpop.f32.mrb[72].mxu0 }
 0x1c6   : > { %v7013_v0 = vpop.f32.mrb[71].mxu1  ;;  %v7080_v55 = vpop.f32.mrb[73].mxu0 }
 0x1c7   : > { %v9816_v50 = vadd.f32 %v7011_v22, %v9534_v3  ;;  %v7014_v48 = vadd.f32 %v7013_v0, %v7012_v56  ;;  %v7081_v8 = vadd.f32 %v7080_v55, %v7079_v47  ;;  %v7082_v3 = vpop.f32.mrb[74].mxu0 }
 0x1c8   : > { %v7083_v54 = vpop.f32.mrb[75].mxu0 }
 0x1c9   : > { %v9822_v57 = vadd.f32 %v7014_v48, %v9538_v4  ;;  %v9831_v52 = vadd.f32 %v7081_v8, %v9672_v34  ;;  %v7084_v61 = vadd.f32 %v7083_v54, %v7082_v3  ;;  %v8541_v34 = vld [vmem:[%s11302_s4 + $0x110] sm:$0xff]  }
 0x1ca   : > { %7504 = vmatpush3.bf16.msra.mxu1 %v8541_v34 }
 0x1cb   : > { %v7015_v44 = vpop.f32.mrb[72].mxu1  ;;  %v9840_v42 = vadd.f32 %v7084_v61, %v9680_v16  ;;  %7505 = vmatprep.subr.bf16.mxu1 %v8542_v2 }
 0x1cc   : > { %v7016_v45 = vpop.f32.mrb[73].mxu1 }
 0x1cd   : > { %v7017_v18 = vadd.f32 %v7016_v45, %v7015_v44  ;;  %v7018_v40 = vpop.f32.mrb[74].mxu1  ;;  %v7085_v63 = vpop.f32.mrb[76].mxu0 }
 0x1ce   : > { %v7019_v19 = vpop.f32.mrb[75].mxu1  ;;  %v7086_v35 = vpop.f32.mrb[77].mxu0 }
 0x1cf   : > { %v9828_v5 = vadd.f32 %v7017_v18, %v9552_v60  ;;  %v7020_v4 = vadd.f32 %v7019_v19, %v7018_v40  ;;  %v7087_v43 = vadd.f32 %v7086_v35, %v7085_v63  ;;  %v7088_v49 = vpop.f32.mrb[78].mxu0 }
 0x1d0   : > { %v7089_v46 = vpop.f32.mrb[79].mxu0 }
 0x1d1   : > { %v9837_v9 = vadd.f32 %v7020_v4, %v9556_v15  ;;  %v9849_v16 = vadd.f32 %v7087_v43, %v9694_v39  ;;  %v7090_v53 = vadd.f32 %v7089_v46, %v7088_v49 }
 0x1d3   : > { %v7021_v30 = vpop.f32.mrb[76].mxu1  ;;  %v9855_v32 = vadd.f32 %v7090_v53, %v9702_v29 }
 0x1d4   : > { %v7022_v60 = vpop.f32.mrb[77].mxu1 }
 0x1d5   : > { %v7023_v37 = vadd.f32 %v7022_v60, %v7021_v30  ;;  %v7024_v24 = vpop.f32.mrb[78].mxu1  ;;  %v7091_v48 = vpop.f32.mrb[80].mxu0 }
 0x1d6   : > { %v7025_v22 = vpop.f32.mrb[79].mxu1  ;;  %v7092_v44 = vpop.f32.mrb[81].mxu0 }
 0x1d7   : > { %v9846_v15 = vadd.f32 %v7023_v37, %v9564_v36  ;;  %v7026_v56 = vadd.f32 %v7025_v22, %v7024_v24  ;;  %v7093_v45 = vadd.f32 %v7092_v44, %v7091_v48  ;;  %v7094_v18 = vpop.f32.mrb[82].mxu0 }
 0x1d8   : > { %v7095_v8 = vpop.f32.mrb[83].mxu0 }
 0x1d9   : > { %v9852_v0 = vadd.f32 %v7026_v56, %v9568_v25  ;;  %v9858_v39 = vadd.f32 %v7093_v45, %v9717_v17  ;;  %v7096_v3 = vadd.f32 %v7095_v8, %v7094_v18  ;;  %v8543_v17 = vld [vmem:[%s11302_s4 + $0x118] sm:$0xff]   ;;  %v8544_v56 = vld [vmem:[%s11302_s4 + $0x160] sm:$0xff]  }
 0x1da   : > { %7506 = vmatpush3.bf16.msra.mxu1 %v8543_v17 }
 0x1db   : > { %v7155_v28 = vpop.f32.mrb[80].mxu1  ;;  %v9864_v29 = vadd.f32 %v7096_v3, %v9726_v62  ;;  %7507 = vmatprep.subr.bf16.mxu1 %v8544_v56 }
 0x1dc   : > { %v7156_v47 = vpop.f32.mrb[81].mxu1 }
 0x1dd   : > { %v7157_v55 = vadd.f32 %v7156_v47, %v7155_v28  ;;  %v7158_v36 = vpop.f32.mrb[82].mxu1  ;;  %v7097_v4 = vpop.f32.mrb[84].mxu0 }
 0x1de   : > { %v7159_v40 = vpop.f32.mrb[83].mxu1  ;;  %v7098_v30 = vpop.f32.mrb[85].mxu0 }
 0x1df   : > { %v7160_v19 = vadd.f32 %v7159_v40, %v7158_v36  ;;  %v9861_v25 = vadd.f32 %v7157_v55, %v9720_v23  ;;  %v7099_v23 = vadd.f32 %v7098_v30, %v7097_v4  ;;  %v7100_v35 = vpop.f32.mrb[86].mxu0 }
 0x1e0   : > { %v7101_v34 = vpop.f32.mrb[87].mxu0 }
 0x1e1   : > { %v9867_v54 = vadd.f32 %v7160_v19, %v9729_v13  ;;  %v9876_v37 = vadd.f32 %v7099_v23, %v9744_v6  ;;  %v7102_v43 = vadd.f32 %v7101_v34, %v7100_v35  ;;  %v8545_v6 = vld [vmem:[%s11302_s4 + $0x120] sm:$0xff]  }
 0x1e2   : > { %7508 = vmatpush3.bf16.msra.mxu1 %v8545_v6 }
 0x1e3   : > { %v7161_v61 = vpop.f32.mrb[84].mxu1  ;;  %v9882_v22 = vadd.f32 %v7102_v43, %v9753_v26  ;;  %v8546_v43 = vld [vmem:[%s11302_s4 + $0x168] sm:$0xff]  }
 0x1e4   : > { %v7162_v63 = vpop.f32.mrb[85].mxu1  ;;  %7509 = vmatprep.subr.bf16.mxu1 %v8546_v43 }
 0x1e5   : > { %v7163_v60 = vadd.f32 %v7162_v63, %v7161_v61  ;;  %v7164_v62 = vpop.f32.mrb[86].mxu1  ;;  %v7103_v53 = vpop.f32.mrb[88].mxu0 }
 0x1e6   : > { %v7165_v13 = vpop.f32.mrb[87].mxu1  ;;  %v7104_v28 = vpop.f32.mrb[89].mxu0 }
 0x1e7   : > { %v7166_v24 = vadd.f32 %v7165_v13, %v7164_v62  ;;  %v9879_v49 = vadd.f32 %v7163_v60, %v9747_v7  ;;  %v7105_v7 = vadd.f32 %v7104_v28, %v7103_v53  ;;  %v7106_v26 = vpop.f32.mrb[90].mxu0 }
 0x1e9   : > { %v9885_v46 = vadd.f32 %v7166_v24, %v9756_v14  ;;  %v7107_v14 = vpop.f32.mrb[91].mxu0  ;;  %v9894_v18 = vadd.f32 %v7105_v7, %v9768_v59 }
 0x1ea   : > { %v7108_v36 = vadd.f32 %v7107_v14, %v7106_v26 }
 0x1eb   : > { %v7167_v48 = vpop.f32.mrb[88].mxu1 }
 0x1ec   : > { %v7168_v44 = vpop.f32.mrb[89].mxu1  ;;  %v9900_v3 = vadd.f32 %v7108_v36, %v9777_v11 }
 0x1ed   : > { %v7169_v47 = vadd.f32 %v7168_v44, %v7167_v48  ;;  %v7170_v45 = vpop.f32.mrb[90].mxu1  ;;  %v7109_v4 = vpop.f32.mrb[92].mxu0 }
 0x1ee   : > { %v7171_v55 = vpop.f32.mrb[91].mxu1  ;;  %v7110_v2 = vpop.f32.mrb[93].mxu0 }
 0x1ef   : > { %v7172_v8 = vadd.f32 %v7171_v55, %v7170_v45  ;;  %v9897_v40 = vadd.f32 %v7169_v47, %v9771_v38  ;;  %v7111_v30 = vadd.f32 %v7110_v2, %v7109_v4  ;;  %v7112_v23 = vpop.f32.mrb[94].mxu0 }
 0x1f0   : > { %v7113_v60 = vpop.f32.mrb[95].mxu0 }
 0x1f1   : > { %v9903_v19 = vadd.f32 %v7172_v8, %v9780_v20  ;;  %v9906_v62 = vadd.f32 %v7111_v30, %v9786_v27  ;;  %v7114_v38 = vadd.f32 %v7113_v60, %v7112_v23  ;;  %v8547_v27 = vld [vmem:[%s11302_s4 + $0x128] sm:$0xff]  }
 0x1f2   : > { %7510 = vmatpush3.bf16.msra.mxu1 %v8547_v27 }
 0x1f3   : > { %v7173_v61 = vpop.f32.mrb[92].mxu1  ;;  %v9912_v20 = vadd.f32 %v7114_v38, %v9792_v41  ;;  %v8548_v38 = vld [vmem:[%s11302_s4 + $0x170] sm:$0xff]  }
 0x1f4   : > { %v7174_v17 = vpop.f32.mrb[93].mxu1  ;;  %7511 = vmatprep.subr.bf16.mxu1 %v8548_v38 }
 0x1f5   : > { %v7175_v63 = vadd.f32 %v7174_v17, %v7173_v61  ;;  %v7176_v59 = vpop.f32.mrb[94].mxu1  ;;  %v7115_v24 = vpop.f32.mrb[96].mxu0 }
 0x1f6   : > { %v7177_v35 = vpop.f32.mrb[95].mxu1  ;;  %v7116_v53 = vpop.f32.mrb[97].mxu0 }
 0x1f7   : > { %v7178_v34 = vadd.f32 %v7177_v35, %v7176_v59  ;;  %v9909_v11 = vadd.f32 %v7175_v63, %v9789_v21  ;;  %v7117_v21 = vadd.f32 %v7116_v53, %v7115_v24  ;;  %v7118_v41 = vpop.f32.mrb[98].mxu0 }
 0x1f9   : > { %v9915_v13 = vadd.f32 %v7178_v34, %v9795_v51  ;;  %v7119_v51 = vpop.f32.mrb[99].mxu0  ;;  %v9924_v7 = vadd.f32 %v7117_v21, %v9798_v12 }
 0x1fa   : > { %v7120_v47 = vadd.f32 %v7119_v51, %v7118_v41 }
 0x1fb   : > { %v7179_v56 = vpop.f32.mrb[96].mxu1 }
 0x1fc   : > { %v7180_v48 = vpop.f32.mrb[97].mxu1  ;;  %v9930_v14 = vadd.f32 %v7120_v47, %v9807_v33  ;;  %v8550_v47 = vld [vmem:[%s11302_s4 + $0x1c0] sm:$0xff]  }
 0x1fd   : > { %v7181_v6 = vadd.f32 %v7180_v48, %v7179_v56  ;;  %v7182_v28 = vpop.f32.mrb[98].mxu1  ;;  %v7121_v36 = vpop.f32.mrb[100].mxu0  ;;  %7611 = vmatprep.subr.bf16.mxu0 %v8550_v47 }
 0x1fe   : > { %v7183_v44 = vpop.f32.mrb[99].mxu1  ;;  %v7122_v4 = vpop.f32.mrb[101].mxu0 }
 0x1ff   : > { %v7184_v26 = vadd.f32 %v7183_v44, %v7182_v28  ;;  %v9927_v45 = vadd.f32 %v7181_v6, %v9801_v31  ;;  %v7123_v2 = vadd.f32 %v7122_v4, %v7121_v36  ;;  %v7124_v30 = vpop.f32.mrb[102].mxu0 }
 0x200   : > { %v7125_v63 = vpop.f32.mrb[103].mxu0 }
 0x201   : > { %v9933_v55 = vadd.f32 %v7184_v26, %v9810_v1  ;;  %v9936_v59 = vadd.f32 %v7123_v2, %v9816_v50  ;;  %v7126_v31 = vadd.f32 %v7125_v63, %v7124_v30  ;;  %v8549_v50 = vld [vmem:[%s11302_s4 + $0x130] sm:$0xff]  }
 0x202   : > { %7512 = vmatpush3.bf16.msra.mxu1 %v8549_v50  ;;  %v9995_v50 = vld [vmem:[%s11301_s3] ss:$0 sm:$0xff] }
 0x203   : > { %v7185_v8 = vpop.f32.mrb[100].mxu1  ;;  %v9942_v1 = vadd.f32 %v7126_v31, %v9822_v57 }
 0x204   : > { %v7186_v61 = vpop.f32.mrb[101].mxu1 }
 0x205   : > { %v7187_v17 = vadd.f32 %v7186_v61, %v7185_v8  ;;  %v7188_v12 = vpop.f32.mrb[102].mxu1  ;;  %v7127_v34 = vpop.f32.mrb[104].mxu0 }
 0x206   : > { %v7189_v23 = vpop.f32.mrb[103].mxu1  ;;  %v7128_v24 = vpop.f32.mrb[105].mxu0 }
 0x207   : > { %v7190_v60 = vadd.f32 %v7189_v23, %v7188_v12  ;;  %v9939_v33 = vadd.f32 %v7187_v17, %v9819_v58  ;;  %v7129_v58 = vadd.f32 %v7128_v24, %v7127_v34  ;;  %v7130_v57 = vpop.f32.mrb[106].mxu0 }
 0x209   : > { %v9945_v35 = vadd.f32 %v7190_v60, %v9825_v10  ;;  %v7131_v10 = vpop.f32.mrb[107].mxu0  ;;  %v9954_v21 = vadd.f32 %v7129_v58, %v9828_v5  ;;  %v8554_v60 = vld [vmem:[%s11302_s4 + $0x178] sm:$0xff]  }
 0x20a   : > { %v7132_v6 = vadd.f32 %v7131_v10, %v7130_v57  ;;  %7513 = vmatprep.subr.bf16.mxu1 %v8554_v60 }
 0x20b   : > { %v7191_v43 = vpop.f32.mrb[104].mxu1 }
 0x20c   : > { %v7192_v56 = vpop.f32.mrb[105].mxu1  ;;  %v9960_v51 = vadd.f32 %v7132_v6, %v9837_v9 }
 0x20d   : > { %v7193_v27 = vadd.f32 %v7192_v56, %v7191_v43  ;;  %v7194_v53 = vpop.f32.mrb[106].mxu1  ;;  %v7133_v26 = vpop.f32.mrb[108].mxu0 }
 0x20e   : > { %v7195_v48 = vpop.f32.mrb[107].mxu1  ;;  %v7134_v8 = vpop.f32.mrb[109].mxu0 }
 0x20f   : > { %v7196_v41 = vadd.f32 %v7195_v48, %v7194_v53  ;;  %v9957_v28 = vadd.f32 %v7193_v27, %v9831_v52  ;;  %v7135_v4 = vadd.f32 %v7134_v8, %v7133_v26  ;;  %v7136_v2 = vpop.f32.mrb[110].mxu0 }
 0x210   : > { %v7137_v17 = vpop.f32.mrb[111].mxu0 }
 0x211   : > { %v9963_v44 = vadd.f32 %v7196_v41, %v9840_v42  ;;  %v9969_v9 = vadd.f32 %v7135_v4, %v9846_v15  ;;  %v7138_v42 = vadd.f32 %v7137_v17, %v7136_v2  ;;  %v9986_v15 = vld [vmem:[%s11300_s2] ss:$0 sm:$0xff] }
 0x213   : > { %v7197_v36 = vpop.f32.mrb[108].mxu1  ;;  %v9975_v23 = vadd.f32 %v7138_v42, %v9852_v0 }
 0x214   : > { %v7198_v5 = vpop.f32.mrb[109].mxu1 }
 0x215   : > { %v7199_v61 = vadd.f32 %v7198_v5, %v7197_v36  ;;  %v7200_v52 = vpop.f32.mrb[110].mxu1  ;;  %v8237_v34 = vpop.f32.mrb[112].mxu0 }
 0x216   : > { %v7201_v30 = vpop.f32.mrb[111].mxu1  ;;  %v2278_v0 = vadd.f32 %v8237_v34, %v9879_v49 }
 0x217   : > { %v7202_v12 = vadd.f32 %v7201_v30, %v7200_v52  ;;  %v9972_v63 = vadd.f32 %v7199_v61, %v9849_v16  ;;  %v8556_v16 = vld [vmem:[%s11302_s4 + $0x138] sm:$0xff]  }
 0x218   : > { %7514 = vmatpush3.bf16.msra.mxu1 %v8556_v16  ;;  %v2405_v57 = vmul.f32 %v9986_v15, %v2278_v0 }
 0x219   : > { %v9978_v31 = vadd.f32 %v7202_v12, %v9855_v32  ;;  %v2269_v32 = vpop.f32.mrb[113].mxu0 }
 0x21a   : > { %v2270_v56 = vadd.f32 %v2269_v32, %v9861_v25  ;;  %v8238_v27 = vpop.f32.mrb[114].mxu0  ;;  %v10006_v26 = vadd.f32 %v9995_v50, %v2405_v57 }
 0x21b   : > { %v7203_v38 = vpop.f32.mrb[112].mxu1  ;;  %v2281_v53 = vadd.f32 %v8238_v27, %v9885_v46  ;;  %v2272_v49 = vpop.f32.mrb[115].mxu0 }
 0x21c   : > { %v7204_v43 = vpop.f32.mrb[113].mxu1  ;;  %v2403_v48 = vmul.f32 %v9986_v15, %v2270_v56  ;;  %v2273_v41 = vadd.f32 %v2272_v49, %v9867_v54  ;;  %v2476_v5 = vmax.f32 %v10006_v26, 0.0 }
 0x21d   : > { %v7205_v24 = vadd.f32 %v7204_v43, %v7203_v38  ;;  %v7206_v58 = vpop.f32.mrb[114].mxu1  ;;  %v2406_v25 = vmul.f32 %v9986_v15, %v2281_v53  ;;  %v8241_v2 = vpop.f32.mrb[116].mxu0 }
 0x21e   : > { %v7207_v10 = vpop.f32.mrb[115].mxu1  ;;  %v2442_v36 = vadd.f32 %v9995_v50, %v2403_v48  ;;  %v2404_v8 = vmul.f32 %v9986_v15, %v2273_v41  ;;  %2509 = vst [vmem:[#allocation3 + $0x48] sm:$0xff] %v2476_v5  ;;  %v2294_v17 = vadd.f32 %v8241_v2, %v9909_v11  ;;  %v10051_v48 = vld [vmem:[%s11302_s4 + $0x200] sm:$0xff]  }
 0x21f   : > { %v7208_v6 = vadd.f32 %v7207_v10, %v7206_v58  ;;  %v10003_v47 = vadd.f32 %v7205_v24, %v9858_v39  ;;  %v10016_v4 = vadd.f32 %v9995_v50, %v2406_v25  ;;  %8267 = vmatprep.subr.bf16.mxu1 %v10051_v48 }
 0x220   : > { %v2474_v54 = vmax.f32 %v2442_v36, 0.0  ;;  %v2443_v39 = vadd.f32 %v9995_v50, %v2404_v8  ;;  %v2409_v16 = vmul.f32 %v9986_v15, %v2294_v17  ;;  %v2635_v36 = vld [vmem:[#allocation3 + $0x9] sm:$0xff] }
 0x221   : > { %v10012_v46 = vadd.f32 %v7208_v6, %v9864_v29  ;;  %v2477_v52 = vmax.f32 %v10016_v4, 0.0  ;;  %v2285_v29 = vpop.f32.mrb[117].mxu0 }
 0x222   : > { %2507 = vst [vmem:[#allocation3 + $0x28] sm:$0xff] %v2474_v54  ;;  %v2475_v42 = vmax.f32 %v2443_v39, 0.0  ;;  %v2286_v60 = vadd.f32 %v2285_v29, %v9897_v40  ;;  %v8242_v34 = vpop.f32.mrb[118].mxu0  ;;  %v10031_v40 = vadd.f32 %v9995_v50, %v2409_v16 }
 0x223   : > { %v7209_v61 = vpop.f32.mrb[116].mxu1  ;;  %2510 = vst [vmem:[#allocation3 + $0x50] sm:$0xff] %v2477_v52  ;;  %v2297_v0 = vadd.f32 %v8242_v34, %v9915_v13  ;;  %v2288_v32 = vpop.f32.mrb[119].mxu0 }
 0x224   : > { %v7210_v30 = vpop.f32.mrb[117].mxu1  ;;  %2508 = vst [vmem:[#allocation3 + $0x30] sm:$0xff] %v2475_v42  ;;  %v2407_v11 = vmul.f32 %v9986_v15, %v2286_v60  ;;  %v2289_v56 = vadd.f32 %v2288_v32, %v9903_v19  ;;  %v2620_v58 = vpack.c.bf16 %v2475_v42, %v2474_v54  ;;  %v2480_v19 = vmax.f32 %v10031_v40, 0.0 }
 0x225   : > { %v7211_v12 = vadd.f32 %v7210_v30, %v7209_v61  ;;  %v7212_v38 = vpop.f32.mrb[118].mxu1  ;;  %v2410_v27 = vmul.f32 %v9986_v15, %v2297_v0  ;;  %v8245_v25 = vpop.f32.mrb[120].mxu0 }
 0x226   : > { %v7213_v43 = vpop.f32.mrb[119].mxu1  ;;  %v10038_v53 = vadd.f32 %v9995_v50, %v2407_v11  ;;  %v2408_v13 = vmul.f32 %v9986_v15, %v2289_v56  ;;  %3588 = vmatprep.mubr.bf16.mxu1 %v2620_v58  ;;  %2513 = vst [vmem:[#allocation3 + $0x88] sm:$0xff] %v2480_v19  ;;  %v2310_v54 = vadd.f32 %v8245_v25, %v9939_v33  ;;  %v2301_v61 = vpop.f32.mrb[121].mxu0  ;;  %v8551_v56 = vld [vmem:[%s11302_s4 + $0x180] sm:$0xff]  }
 0x227   : > { %v7214_v24 = vadd.f32 %v7213_v43, %v7212_v38  ;;  %v10035_v57 = vadd.f32 %v7211_v12, %v9876_v37  ;;  %v10046_v49 = vadd.f32 %v9995_v50, %v2410_v27  ;;  %v2302_v30 = vadd.f32 %v2301_v61, %v9927_v45  ;;  %v8246_v42 = vpop.f32.mrb[122].mxu0 }
 0x228   : > { %v2478_v37 = vmax.f32 %v10038_v53, 0.0  ;;  %v10055_v6 = vadd.f32 %v9995_v50, %v2408_v13  ;;  %v2413_v12 = vmul.f32 %v9986_v15, %v2310_v54  ;;  %v2313_v33 = vadd.f32 %v8246_v42, %v9945_v35  ;;  %v2304_v38 = vpop.f32.mrb[123].mxu0  ;;  %v2685_v13 = vld [vmem:[#allocation3 + $0x47] sm:$0xff] }
 0x229   : > { %v10042_v10 = vadd.f32 %v7214_v24, %v9882_v22  ;;  %v2636_v22 = vld [vmem:[#allocation3 + $0x11] sm:$0xff]  ;;  %v2481_v8 = vmax.f32 %v10046_v49, 0.0  ;;  %v2683_v34 = vld [vmem:[#allocation3 + $0x27] sm:$0xff]  ;;  %v2411_v45 = vmul.f32 %v9986_v15, %v2302_v30  ;;  %v2305_v11 = vadd.f32 %v2304_v38, %v9933_v55 }
 0x22a   : > { %2511 = vst [vmem:[#allocation3 + $0x68] sm:$0xff] %v2478_v37  ;;  %v2479_v2 = vmax.f32 %v10055_v6, 0.0  ;;  %v2667_v0 = vpack.c.bf16 %v2636_v22, %v2635_v36  ;;  %v2686_v43 = vld [vmem:[#allocation3 + $0x4f] sm:$0xff]  ;;  %v10078_v35 = vadd.f32 %v9995_v50, %v2413_v12  ;;  %v2414_v58 = vmul.f32 %v9986_v15, %v2313_v33 }
 0x22b   : > { %v7215_v41 = vpop.f32.mrb[120].mxu1  ;;  %2514 = vst [vmem:[#allocation3 + $0x90] sm:$0xff] %v2481_v8  ;;  %v2684_v16 = vld [vmem:[#allocation3 + $0x2f] sm:$0xff]  ;;  %v2621_v27 = vpack.c.bf16 %v2477_v52, %v2476_v5  ;;  %v2412_v25 = vmul.f32 %v9986_v15, %v2305_v11  ;;  %v2716_v36 = vpack.c.bf16 %v2686_v43, %v2685_v13 }
 0x22c   : > { %v7216_v39 = vpop.f32.mrb[121].mxu1  ;;  %2512 = vst [vmem:[#allocation3 + $0x70] sm:$0xff] %v2479_v2  ;;  %v2715_v24 = vpack.c.bf16 %v2684_v16, %v2683_v34  ;;  %v8552_v55 = vld [vmem:[%s11302_s4 + $0x1c8] sm:$0xff]   ;;  %v2484_v22 = vmax.f32 %v10078_v35, 0.0  ;;  %v10094_v26 = vadd.f32 %v9995_v50, %v2414_v58  ;;  %v2638_v12 = vld [vmem:[#allocation3 + $0x31] sm:$0xff] }
 0x22d   : > { %v7217_v17 = vadd.f32 %v7216_v39, %v7215_v41  ;;  %v7218_v29 = vpop.f32.mrb[122].mxu1  ;;  %v10089_v41 = vadd.f32 %v9995_v50, %v2411_v45  ;;  %v10104_v54 = vadd.f32 %v9995_v50, %v2412_v25  ;;  %v8249_v61 = vpop.f32.mrb[124].mxu0  ;;  %v8553_v30 = vld [vmem:[%s11302_s4 + $0x188] sm:$0xff]   ;;  %v8555_v33 = vld [vmem:[%s11302_s4 + $0x1d0] sm:$0xff]  }
 0x22e   : > { %v7219_v60 = vpop.f32.mrb[123].mxu1  ;;  %3741 = vmatprep.mubr.bf16.mxu0 %v2715_v24  ;;  %3589 = vmatmul.mubr.bf16.gmra.mrb[148].mxu1 %v2715_v24  ;;  %2517 = vst [vmem:[#allocation3 + $0xc8] sm:$0xff] %v2484_v22  ;;  %v2637_v42 = vld [vmem:[#allocation3 + $0x29] sm:$0xff] }
 0x22f   : > { %v7220_v32 = vadd.f32 %v7219_v60, %v7218_v29  ;;  %3742 = vmatmul.mubr.bf16.vlgmr.msra.gmra.mrb[144].mxu0 %v2667_v0  ;;  %3596 = vmatprep.mubr.bf16.mxu1 %v2621_v27  ;;  %v10097_v5 = vadd.f32 %v7217_v17, %v9894_v18  ;;  %v2482_v52 = vmax.f32 %v10089_v41, 0.0  ;;  %v2485_v18 = vmax.f32 %v10094_v26, 0.0  ;;  %v2317_v29 = vpop.f32.mrb[125].mxu0  ;;  %v8557_v27 = vld [vmem:[%s11302_s4 + $0x190] sm:$0xff]  }
 0x230   : > { %3749 = vmatprep.mubr.bf16.mxu0 %v2716_v36  ;;  %7612 = vmatpush3.bf16.msra.mxu0 %v8551_v56  ;;  %v2483_v60 = vmax.f32 %v10104_v54, 0.0  ;;  %v2318_v34 = vadd.f32 %v2317_v29, %v9957_v28  ;;  %v8250_v0 = vpop.f32.mrb[126].mxu0  ;;  %v10128_v58 = vpack.c.bf16 %v2638_v12, %v2637_v42 }
 0x231   : > { %v10100_v4 = vadd.f32 %v7220_v32, %v9900_v3  ;;  %v2326_v3 = vadd.f32 %v8249_v61, %v9972_v63  ;;  %7613 = vmatprep.subr.bf16.mxu0 %v8552_v55  ;;  %2515 = vst [vmem:[#allocation3 + $0xa8] sm:$0xff] %v2482_v52  ;;  %2518 = vst [vmem:[#allocation3 + $0xd0] sm:$0xff] %v2485_v18  ;;  %v2329_v43 = vadd.f32 %v8250_v0, %v9978_v31  ;;  %v2320_v32 = vpop.f32.mrb[127].mxu0  ;;  %v2687_v25 = vld [vmem:[#allocation3 + $0x67] sm:$0xff] }
 0x232   : > { %2516 = vst [vmem:[#allocation3 + $0xb0] sm:$0xff] %v2483_v60  ;;  %v2415_v24 = vmul.f32 %v9986_v15, %v2318_v34  ;;  %v2321_v28 = vadd.f32 %v2320_v32, %v9963_v44  ;;  %v2622_v55 = vpack.c.bf16 %v2479_v2, %v2478_v37  ;;  %v2640_v34 = vld [vmem:[#allocation3 + $0x51] sm:$0xff] }
 0x233   : > { %v7221_v39 = vpop.f32.mrb[124].mxu1  ;;  %v2417_v63 = vmul.f32 %v9986_v15, %v2326_v3  ;;  %v2688_v11 = vld [vmem:[#allocation3 + $0x6f] sm:$0xff]  ;;  %v2418_v13 = vmul.f32 %v9986_v15, %v2329_v43 }
 0x234   : > { %v7222_v17 = vpop.f32.mrb[125].mxu1  ;;  %7614 = vmatpush3.bf16.msra.mxu0 %v8553_v30  ;;  %v10148_v61 = vadd.f32 %v9995_v50, %v2415_v24  ;;  %v2416_v30 = vmul.f32 %v9986_v15, %v2321_v28  ;;  %v10151_v3 = vpack.c.bf16 %v2688_v11, %v2687_v25  ;;  %v2690_v28 = vld [vmem:[#allocation3 + $0x8f] sm:$0xff]  ;;  %v8561_v25 = vld [vmem:[%s11302_s4 + $0x1a0] sm:$0xff]  }
 0x235   : > { %v7223_v38 = vadd.f32 %v7222_v17, %v7221_v39  ;;  %v7224_v16 = vpop.f32.mrb[126].mxu1  ;;  %v10134_v31 = vadd.f32 %v9995_v50, %v2417_v63  ;;  %7615 = vmatprep.subr.bf16.mxu0 %v8555_v33  ;;  %v8558_v39 = vld [vmem:[%s11302_s4 + $0x1d8] sm:$0xff]  }
 0x236   : > { %v7225_v45 = vpop.f32.mrb[127].mxu1  ;;  %3597 = vmatmul.mubr.bf16.gmra.mrb[152].mxu1 %v2716_v36  ;;  %v2486_v6 = vmax.f32 %v10148_v61, 0.0  ;;  %v10163_v2 = vadd.f32 %v9995_v50, %v2416_v30  ;;  %v8253_v36 = vpop.f32.mrb[128].mxu0  ;;  %v2623_v30 = vpack.c.bf16 %v2481_v8, %v2480_v19 }
 0x237   : > { %v7226_v56 = vadd.f32 %v7225_v45, %v7224_v16  ;;  %v10142_v44 = vadd.f32 %v7223_v38, %v9906_v62  ;;  %v2488_v37 = vmax.f32 %v10134_v31, 0.0  ;;  %v10158_v62 = vadd.f32 %v9995_v50, %v2418_v13  ;;  %3750 = vmatmul.mubr.bf16.gmra.mrb[148].mxu0 %v10128_v58  ;;  %3604 = vmatprep.mubr.bf16.mxu1 %v2622_v55  ;;  %v2333_v33 = vpop.f32.mrb[129].mxu0  ;;  %v2639_v38 = vld [vmem:[#allocation3 + $0x49] sm:$0xff]  ;;  %v8560_v16 = vld [vmem:[%s11302_s4 + $0x1e0] sm:$0xff]  }
 0x238   : > { %3757 = vmatprep.mubr.bf16.mxu0 %v10151_v3  ;;  %7616 = vmatpush3.bf16.msra.mxu0 %v8557_v27  ;;  %v2342_v42 = vadd.f32 %v8253_v36, %v10035_v57  ;;  %2519 = vst [vmem:[#allocation3 + $0xe8] sm:$0xff] %v2486_v6  ;;  %v2487_v0 = vmax.f32 %v10163_v2, 0.0  ;;  %v2334_v43 = vadd.f32 %v2333_v33, %v10003_v47  ;;  %v8254_v32 = vpop.f32.mrb[130].mxu0  ;;  %v8562_v36 = vld [vmem:[%s11302_s4 + $0x1e8] sm:$0xff]  }
 0x239   : > { %v10154_v53 = vadd.f32 %v7226_v56, %v9912_v20  ;;  %v8559_v20 = vld [vmem:[%s11302_s4 + $0x198] sm:$0xff]   ;;  %2521 = vst [vmem:[#allocation3 + $0x108] sm:$0xff] %v2488_v37  ;;  %v2489_v29 = vmax.f32 %v10158_v62, 0.0  ;;  %7617 = vmatprep.subr.bf16.mxu0 %v8558_v39  ;;  %v2345_v11 = vadd.f32 %v8254_v32, %v10042_v10  ;;  %v2336_v56 = vpop.f32.mrb[131].mxu0  ;;  %v10188_v55 = vpack.c.bf16 %v2640_v34, %v2639_v38 }
 0x23a   : > { %v2421_v57 = vmul.f32 %v9986_v15, %v2342_v42  ;;  %2520 = vst [vmem:[#allocation3 + $0xf0] sm:$0xff] %v2487_v0  ;;  %v2419_v27 = vmul.f32 %v9986_v15, %v2334_v43  ;;  %v2337_v47 = vadd.f32 %v2336_v56, %v10012_v46 }
 0x23b   : > { %v7227_v17 = vpop.f32.mrb[128].mxu1  ;;  %2522 = vst [vmem:[#allocation3 + $0x110] sm:$0xff] %v2489_v29  ;;  %v2422_v39 = vmul.f32 %v9986_v15, %v2345_v11 }
 0x23c   : > { %v7228_v12 = vpop.f32.mrb[129].mxu1  ;;  %7618 = vmatpush3.bf16.msra.mxu0 %v8559_v20  ;;  %v10194_v10 = vadd.f32 %v9995_v50, %v2421_v57  ;;  %v10208_v20 = vadd.f32 %v9995_v50, %v2419_v27  ;;  %v2420_v42 = vmul.f32 %v9986_v15, %v2337_v47  ;;  %v2642_v27 = vld [vmem:[#allocation3 + $0x71] sm:$0xff] }
 0x23d   : > { %v7229_v63 = vadd.f32 %v7228_v12, %v7227_v17  ;;  %v7230_v45 = vpop.f32.mrb[130].mxu1  ;;  %v2689_v17 = vld [vmem:[#allocation3 + $0x87] sm:$0xff]  ;;  %7619 = vmatprep.subr.bf16.mxu0 %v8560_v16  ;;  %v10219_v49 = vadd.f32 %v9995_v50, %v2422_v39  ;;  %v8257_v38 = vpop.f32.mrb[132].mxu0  ;;  %v2692_v39 = vld [vmem:[#allocation3 + $0xaf] sm:$0xff] }
 0x23e   : > { %v7231_v24 = vpop.f32.mrb[131].mxu1  ;;  %3605 = vmatmul.mubr.bf16.gmra.mrb[156].mxu1 %v10151_v3  ;;  %v10212_v40 = vpack.c.bf16 %v2690_v28, %v2689_v17  ;;  %v2490_v8 = vmax.f32 %v10208_v20, 0.0  ;;  %v10224_v12 = vadd.f32 %v9995_v50, %v2420_v42  ;;  %v2358_v16 = vadd.f32 %v8257_v38, %v10142_v44  ;;  %v2349_v43 = vpop.f32.mrb[133].mxu0  ;;  %v2641_v28 = vld [vmem:[#allocation3 + $0x69] sm:$0xff] }
 0x23f   : > { %v7232_v13 = vadd.f32 %v7231_v24, %v7230_v45  ;;  %v10202_v46 = vadd.f32 %v7229_v63, %v9924_v7  ;;  %v2492_v7 = vmax.f32 %v10194_v10, 0.0  ;;  %3758 = vmatmul.mubr.bf16.gmra.mrb[152].mxu0 %v10188_v55  ;;  %3612 = vmatprep.mubr.bf16.mxu1 %v2623_v30  ;;  %v2493_v34 = vmax.f32 %v10219_v49, 0.0  ;;  %v8564_v45 = vld [vmem:[%s11302_s4 + $0x1f0] sm:$0xff]   ;;  %v8258_v56 = vpop.f32.mrb[134].mxu0 }
 0x240   : > { %3765 = vmatprep.mubr.bf16.mxu0 %v10212_v40  ;;  %7620 = vmatpush3.bf16.msra.mxu0 %v8561_v25  ;;  %2523 = vst [vmem:[#allocation3 + $0x128] sm:$0xff] %v2490_v8  ;;  %v2491_v32 = vmax.f32 %v10224_v12, 0.0  ;;  %v2350_v11 = vadd.f32 %v2349_v43, %v10097_v5  ;;  %v2425_v44 = vmul.f32 %v9986_v15, %v2358_v16  ;;  %v2352_v25 = vpop.f32.mrb[135].mxu0  ;;  %v8566_v42 = vld [vmem:[%s11302_s4 + $0x1b0] sm:$0xff]  }
 0x241   : > { %v10215_v19 = vadd.f32 %v7232_v13, %v9930_v14  ;;  %v8563_v14 = vld [vmem:[%s11302_s4 + $0x1a8] sm:$0xff]   ;;  %2525 = vst [vmem:[#allocation3 + $0x148] sm:$0xff] %v2492_v7  ;;  %7621 = vmatprep.subr.bf16.mxu0 %v8562_v36  ;;  %2526 = vst [vmem:[#allocation3 + $0x150] sm:$0xff] %v2493_v34  ;;  %v2361_v13 = vadd.f32 %v8258_v56, %v10154_v53  ;;  %v2353_v17 = vadd.f32 %v2352_v25, %v10100_v4 }
 0x242   : > { %2524 = vst [vmem:[#allocation3 + $0x130] sm:$0xff] %v2491_v32  ;;  %v2423_v30 = vmul.f32 %v9986_v15, %v2350_v11  ;;  %v10254_v53 = vadd.f32 %v9995_v50, %v2425_v44  ;;  %v10257_v38 = vpack.c.bf16 %v2642_v27, %v2641_v28  ;;  %v2624_v16 = vpack.c.bf16 %v2483_v60, %v2482_v52  ;;  %v2691_v4 = vld [vmem:[#allocation3 + $0xa7] sm:$0xff] }
 0x243   : > { %v7233_v33 = vpop.f32.mrb[132].mxu1  ;;  %v10271_v43 = vpack.c.bf16 %v2692_v39, %v2691_v4  ;;  %v2629_v20 = vpack.c.bf16 %v2493_v34, %v2492_v7 }
 0x244   : > { %v7234_v63 = vpop.f32.mrb[133].mxu1  ;;  %7622 = vmatpush3.bf16.msra.mxu0 %v8563_v14  ;;  %v10267_v14 = vadd.f32 %v9995_v50, %v2423_v30  ;;  %v2496_v54 = vmax.f32 %v10254_v53, 0.0  ;;  %v2643_v30 = vld [vmem:[#allocation3 + $0x89] sm:$0xff] }
 0x245   : > { %v7235_v57 = vadd.f32 %v7234_v63, %v7233_v33  ;;  %v7236_v24 = vpop.f32.mrb[134].mxu1  ;;  %v2426_v33 = vmul.f32 %v9986_v15, %v2361_v13  ;;  %7623 = vmatprep.subr.bf16.mxu0 %v8564_v45  ;;  %v2424_v63 = vmul.f32 %v9986_v15, %v2353_v17  ;;  %v8261_v11 = vpop.f32.mrb[136].mxu0 }
 0x246   : > { %v7237_v47 = vpop.f32.mrb[135].mxu1  ;;  %3613 = vmatmul.mubr.bf16.gmra.mrb[160].mxu1 %v10212_v40  ;;  %v2494_v60 = vmax.f32 %v10267_v14, 0.0  ;;  %2529 = vst [vmem:[#allocation3 + $0x188] sm:$0xff] %v2496_v54  ;;  %v2365_v27 = vpop.f32.mrb[137].mxu0 }
 0x247   : > { %v7238_v5 = vadd.f32 %v7237_v47, %v7236_v24  ;;  %v2213_v36 = vadd.f32 %v7235_v57, %v9936_v59  ;;  %v8567_v59 = vld [vmem:[%s11302_s4 + $0x1f8] sm:$0xff]   ;;  %v10276_v52 = vadd.f32 %v9995_v50, %v2426_v33  ;;  %3766 = vmatmul.mubr.bf16.gmra.mrb[156].mxu0 %v10257_v38  ;;  %3620 = vmatprep.mubr.bf16.mxu1 %v2624_v16  ;;  %v8262_v39 = vpop.f32.mrb[138].mxu0  ;;  %v2694_v16 = vld [vmem:[#allocation3 + $0xcf] sm:$0xff]  ;;  %v2699_v62 = vld [vmem:[#allocation3 + $0x127] sm:$0xff] }
 0x248   : > { %v10281_v45 = vadd.f32 %v9995_v50, %v2424_v63  ;;  %3773 = vmatprep.mubr.bf16.mxu0 %v10271_v43  ;;  %7624 = vmatpush3.bf16.msra.mxu0 %v8566_v42  ;;  %2527 = vst [vmem:[#allocation3 + $0x168] sm:$0xff] %v2494_v60  ;;  %v2366_v47 = vadd.f32 %v2365_v27, %v10202_v46  ;;  %v2368_v33 = vpop.f32.mrb[139].mxu0  ;;  %v2656_v14 = vld [vmem:[#allocation3 + $0x151] sm:$0xff] }
 0x249   : > { %v2216_v41 = vadd.f32 %v7238_v5, %v9942_v1  ;;  %v8568_v1 = vld [vmem:[%s11302_s4 + $0x1b8] sm:$0xff]   ;;  %v2497_v24 = vmax.f32 %v10276_v52, 0.0  ;;  %v2374_v56 = vadd.f32 %v8261_v11, %v2213_v36  ;;  %7625 = vmatprep.subr.bf16.mxu0 %v8567_v59  ;;  %v2369_v46 = vadd.f32 %v2368_v33, %v10215_v19  ;;  %v2645_v33 = vld [vmem:[#allocation3 + $0xa9] sm:$0xff] }
 0x24a   : > { %v2495_v44 = vmax.f32 %v10281_v45, 0.0  ;;  %v2644_v5 = vld [vmem:[#allocation3 + $0x91] sm:$0xff]  ;;  %v2427_v4 = vmul.f32 %v9986_v15, %v2366_v47 }
 0x24b   : > { %v7239_v57 = vpop.f32.mrb[136].mxu1  ;;  %2530 = vst [vmem:[#allocation3 + $0x190] sm:$0xff] %v2497_v24  ;;  %v2429_v17 = vmul.f32 %v9986_v15, %v2374_v56  ;;  %v2377_v36 = vadd.f32 %v8262_v39, %v2216_v41  ;;  %v10306_v41 = vpack.c.bf16 %v2644_v5, %v2643_v30  ;;  %v2625_v56 = vpack.c.bf16 %v2485_v18, %v2484_v22 }
 0x24c   : > { %v7240_v28 = vpop.f32.mrb[137].mxu1  ;;  %2528 = vst [vmem:[#allocation3 + $0x170] sm:$0xff] %v2495_v44  ;;  %7626 = vmatpush3.bf16.msra.mxu0 %v8568_v1  ;;  %v10313_v27 = vadd.f32 %v9995_v50, %v2427_v4  ;;  %v2428_v19 = vmul.f32 %v9986_v15, %v2369_v46  ;;  %v2696_v4 = vld [vmem:[#allocation3 + $0xef] sm:$0xff]  ;;  %v2630_v10 = vpack.c.bf16 %v2495_v44, %v2494_v60 }
 0x24d   : > { %v7241_v13 = vadd.f32 %v7240_v28, %v7239_v57  ;;  %v7242_v25 = vpop.f32.mrb[138].mxu1  ;;  %v10303_v57 = vadd.f32 %v9995_v50, %v2429_v17  ;;  %v2430_v11 = vmul.f32 %v9986_v15, %v2377_v36  ;;  %v2693_v28 = vld [vmem:[#allocation3 + $0xc7] sm:$0xff]  ;;  %v8265_v18 = vpop.f32.mrb[140].mxu0 }
 0x24e   : > { %v7243_v42 = vpop.f32.mrb[139].mxu1  ;;  %3621 = vmatmul.mubr.bf16.gmra.mrb[164].mxu1 %v10271_v43  ;;  %v2498_v35 = vmax.f32 %v10313_v27, 0.0  ;;  %v10327_v22 = vadd.f32 %v9995_v50, %v2428_v19  ;;  %v2381_v39 = vpop.f32.mrb[141].mxu0 }
 0x24f   : > { %v7244_v59 = vadd.f32 %v7243_v42, %v7242_v25  ;;  %v2221_v63 = vadd.f32 %v7241_v13, %v9954_v21  ;;  %v10317_v21 = vpack.c.bf16 %v2694_v16, %v2693_v28  ;;  %v11313_v13 = vmax.f32 %v10303_v57, 0.0  ;;  %3774 = vmatmul.mubr.bf16.gmra.mrb[160].mxu0 %v10306_v41  ;;  %3628 = vmatprep.mubr.bf16.mxu1 %v2625_v56  ;;  %v8266_v42 = vpop.f32.mrb[142].mxu0  ;;  %v2646_v16 = vld [vmem:[#allocation3 + $0xb1] sm:$0xff]  ;;  %v2703_v7 = vld [vmem:[#allocation3 + $0x167] sm:$0xff] }
 0x250   : > { %v10322_v47 = vadd.f32 %v9995_v50, %v2430_v11  ;;  %2531 = vst [vmem:[#allocation3 + $0x1a8] sm:$0xff] %v2498_v35  ;;  %v2499_v30 = vmax.f32 %v10327_v22, 0.0  ;;  %v2384_v46 = vpop.f32.mrb[143].mxu0  ;;  %v11321_v27 = vmax.f32 %v10303_v57, 0.0 }
 0x251   : > { %v2224_v1 = vadd.f32 %v7244_v59, %v9960_v51  ;;  %3781 = vmatprep.mubr.bf16.mxu0 %v10317_v21  ;;  %2533 = vst [vmem:[#allocation3 + $0x1c8] sm:$0xff] %v11313_v13  ;;  %v2382_v17 = vadd.f32 %v2381_v39, %v2221_v63  ;;  %v2695_v63 = vld [vmem:[#allocation3 + $0xe7] sm:$0xff] }
 0x252   : > { %v11312_v51 = vmax.f32 %v10322_v47, 0.0  ;;  %2532 = vst [vmem:[#allocation3 + $0x1b0] sm:$0xff] %v2499_v30  ;;  %v10348_v39 = vpack.c.bf16 %v2696_v4, %v2695_v63  ;;  %v2627_v4 = vpack.c.bf16 %v2489_v29, %v2488_v37  ;;  %v2628_v37 = vpack.c.bf16 %v2491_v32, %v2490_v8  ;;  %v2702_v63 = vld [vmem:[#allocation3 + $0x14f] sm:$0xff]  ;;  %v2701_v8 = vld [vmem:[#allocation3 + $0x147] sm:$0xff] }
 0x253   : > { %v7245_v26 = vpop.f32.mrb[140].mxu1  ;;  %v2431_v56 = vmul.f32 %v9986_v15, %v2382_v17  ;;  %v2385_v19 = vadd.f32 %v2384_v46, %v2224_v1  ;;  %v2647_v17 = vld [vmem:[#allocation3 + $0xc9] sm:$0xff]  ;;  %v10400_v12 = vpack.c.bf16 %v2702_v63, %v2701_v8  ;;  %v2632_v53 = vpack.c.bf16 %v2499_v30, %v2498_v35 }
 0x254   : > { %v7246_v25 = vpop.f32.mrb[141].mxu1  ;;  %2534 = vst [vmem:[#allocation3 + $0x1d0] sm:$0xff] %v11312_v51  ;;  %v2653_v32 = vld [vmem:[#allocation3 + $0x129] sm:$0xff]  ;;  %v11322_v22 = vmax.f32 %v10322_v47, 0.0 }
 0x255   : > { %v7247_v5 = vadd.f32 %v7246_v25, %v7245_v26  ;;  %v7248_v36 = vpop.f32.mrb[142].mxu1  ;;  %v10342_v26 = vpack.c.bf16 %v2646_v16, %v2645_v33  ;;  %v2626_v25 = vpack.c.bf16 %v2487_v0, %v2486_v6  ;;  %v10351_v13 = vadd.f32 %v9995_v50, %v2431_v56  ;;  %v2700_v56 = vld [vmem:[#allocation3 + $0x12f] sm:$0xff] }
 0x256   : > { %v7249_v59 = vpop.f32.mrb[143].mxu1  ;;  %3629 = vmatmul.mubr.bf16.gmra.mrb[168].mxu1 %v10317_v21  ;;  %v10389_v29 = vpack.c.bf16 %v2700_v56, %v2699_v62  ;;  %v2706_v45 = vld [vmem:[#allocation3 + $0x18f] sm:$0xff]  ;;  %v2633_v35 = vpack.c.bf16 %v11322_v22, %v11321_v27 }
 0x257   : > { %v2229_v11 = vadd.f32 %v7247_v5, %v9969_v9  ;;  %v7250_v28 = vadd.f32 %v7249_v59, %v7248_v36  ;;  %v2432_v5 = vmul.f32 %v9986_v15, %v2385_v19  ;;  %3782 = vmatmul.mubr.bf16.gmra.mrb[164].mxu0 %v10342_v26  ;;  %3636 = vmatprep.mubr.bf16.mxu1 %v2626_v25  ;;  %v2502_v2 = vmax.f32 %v10351_v13, 0.0  ;;  %v2648_v36 = vld [vmem:[#allocation3 + $0xd1] sm:$0xff]  ;;  %v2697_v59 = vld [vmem:[#allocation3 + $0x107] sm:$0xff] }
 0x258   : > { %3789 = vmatprep.mubr.bf16.mxu0 %v10348_v39  ;;  %v10371_v16 = vpack.c.bf16 %v2648_v36, %v2647_v17  ;;  %v2652_v19 = vld [vmem:[#allocation3 + $0x111] sm:$0xff]  ;;  %v2655_v17 = vld [vmem:[#allocation3 + $0x149] sm:$0xff] }
 0x259   : > { %v2390_v51 = vadd.f32 %v8265_v18, %v2229_v11  ;;  %v2232_v9 = vadd.f32 %v7250_v28, %v9975_v23  ;;  %v10360_v0 = vadd.f32 %v9995_v50, %v2432_v5  ;;  %2535 = vst [vmem:[#allocation3 + $0x1e8] sm:$0xff] %v2502_v2  ;;  %v2650_v11 = vld [vmem:[#allocation3 + $0xf1] sm:$0xff]  ;;  %v2651_v28 = vld [vmem:[#allocation3 + $0x109] sm:$0xff]  ;;  %v10419_v44 = vpack.c.bf16 %v2656_v14, %v2655_v17 }
 0x25a   : > { %v10393_v25 = vpack.c.bf16 %v2652_v19, %v2651_v28  ;;  %v2704_v5 = vld [vmem:[#allocation3 + $0x16f] sm:$0xff]  ;;  %v2709_v30 = vld [vmem:[#allocation3 + $0x1c7] sm:$0xff] }
 0x25b   : > { %v2433_v61 = vmul.f32 %v9986_v15, %v2390_v51  ;;  %v2393_v6 = vadd.f32 %v8266_v42, %v2232_v9  ;;  %v2503_v18 = vmax.f32 %v10360_v0, 0.0  ;;  %v2698_v51 = vld [vmem:[#allocation3 + $0x10f] sm:$0xff]  ;;  %v10411_v49 = vpack.c.bf16 %v2704_v5, %v2703_v7 }
 0x25c   : > { %v10378_v46 = vpack.c.bf16 %v2698_v51, %v2697_v59  ;;  %v2654_v9 = vld [vmem:[#allocation3 + $0x131] sm:$0xff]  ;;  %v2631_v51 = vpack.c.bf16 %v2497_v24, %v2496_v54  ;;  %v2707_v54 = vld [vmem:[#allocation3 + $0x1a7] sm:$0xff] }
 0x25d   : > { %v2472_v1 = vadd.f32 %v9995_v50, %v2433_v61  ;;  %v2434_v23 = vmul.f32 %v9986_v15, %v2393_v6  ;;  %2536 = vst [vmem:[#allocation3 + $0x1f0] sm:$0xff] %v2503_v18  ;;  %v10404_v61 = vpack.c.bf16 %v2654_v9, %v2653_v32  ;;  %v2658_v59 = vld [vmem:[#allocation3 + $0x171] sm:$0xff]  ;;  %v2659_v24 = vld [vmem:[#allocation3 + $0x189] sm:$0xff]  ;;  %v2634_v57 = vpack.c.bf16 %v2503_v18, %v2502_v2 }
 0x25e   : > { %3637 = vmatmul.mubr.bf16.gmra.mrb[172].mxu1 %v10348_v39  ;;  %v2710_v56 = vld [vmem:[#allocation3 + $0x1cf] sm:$0xff] }
 0x25f   : > { %v2504_v33 = vmax.f32 %v2472_v1, 0.0  ;;  %v2473_v42 = vadd.f32 %v9995_v50, %v2434_v23  ;;  %3790 = vmatmul.mubr.bf16.gmra.mrb[168].mxu0 %v10371_v16  ;;  %3644 = vmatprep.mubr.bf16.mxu1 %v2627_v4  ;;  %v2649_v50 = vld [vmem:[#allocation3 + $0xe9] sm:$0xff]  ;;  %v10448_v62 = vpack.c.bf16 %v2710_v56, %v2709_v30  ;;  %v2662_v19 = vld [vmem:[#allocation3 + $0x1b1] sm:$0xff] }
 0x260   : > { %3797 = vmatprep.mubr.bf16.mxu0 %v10378_v46  ;;  %v10382_v31 = vpack.c.bf16 %v2650_v11, %v2649_v50  ;;  %v2657_v4 = vld [vmem:[#allocation3 + $0x169] sm:$0xff]  ;;  %v2660_v11 = vld [vmem:[#allocation3 + $0x191] sm:$0xff] }
 0x261   : > { %2537 = vst [vmem:[#allocation3 + $0x208] sm:$0xff] %v2504_v33  ;;  %v2505_v15 = vmax.f32 %v2473_v42, 0.0  ;;  %v2705_v33 = vld [vmem:[#allocation3 + $0x187] sm:$0xff]  ;;  %v10430_v50 = vpack.c.bf16 %v2658_v59, %v2657_v4  ;;  %v2664_v9 = vld [vmem:[#allocation3 + $0x1d1] sm:$0xff] }
 0x262   : > { %v10426_v42 = vpack.c.bf16 %v2706_v45, %v2705_v33  ;;  %v2661_v28 = vld [vmem:[#allocation3 + $0x1a9] sm:$0xff] }
 0x263   : > { %2538 = vst [vmem:[#allocation3 + $0x210] sm:$0xff] %v2505_v15  ;;  %v2708_v15 = vld [vmem:[#allocation3 + $0x1af] sm:$0xff]  ;;  %v2711_v47 = vld [vmem:[#allocation3 + $0x1e7] sm:$0xff] }
 0x264   : > { %v10437_v52 = vpack.c.bf16 %v2708_v15, %v2707_v54  ;;  %v2712_v63 = vld [vmem:[#allocation3 + $0x1ef] sm:$0xff]  ;;  %v2828_v4 = vld [vmem:[#allocation3 + $0x47] sm:$0xff] }
 0x265   : > { %v10459_v8 = vpack.c.bf16 %v2712_v63, %v2711_v47  ;;  %v2663_v32 = vld [vmem:[#allocation3 + $0x1c9] sm:$0xff]  ;;  %v2666_v18 = vld [vmem:[#allocation3 + $0x1f1] sm:$0xff] }
 0x266   : > { %3645 = vmatmul.mubr.bf16.gmra.mrb[176].mxu1 %v10378_v46  ;;  %v2732_v2 = vld [vmem:[#allocation3 + $0x30] sm:$0xff]  ;;  %v2876_v14 = vld [vmem:[#allocation3 + $0x48] sm:$0xff] }
 0x267   : > { %3798 = vmatmul.mubr.bf16.gmra.mrb[172].mxu0 %v10382_v31  ;;  %3652 = vmatprep.mubr.bf16.mxu1 %v2628_v37  ;;  %v10441_v37 = vpack.c.bf16 %v2660_v11, %v2659_v24  ;;  %v2665_v0 = vld [vmem:[#allocation3 + $0x1e9] sm:$0xff] }
 0x268   : > { %3805 = vmatprep.mubr.bf16.mxu0 %v10389_v29  ;;  %v2713_v7 = vld [vmem:[#allocation3 + $0x207] sm:$0xff]  ;;  %v10471_v17 = vpack.c.bf16 %v2666_v18, %v2665_v0  ;;  %v2879_v33 = vld [vmem:[#allocation3 + $0x70] sm:$0xff] }
 0x269   : > { %v2878_v15 = vld [vmem:[#allocation3 + $0x68] sm:$0xff]  ;;  %v2881_v54 = vld [vmem:[#allocation3 + $0x90] sm:$0xff] }
 0x26a   : > { %v2714_v5 = vld [vmem:[#allocation3 + $0x20f] sm:$0xff] }
 0x26b   : > { %v10466_v13 = vpack.c.bf16 %v2714_v5, %v2713_v7  ;;  %v2880_v24 = vld [vmem:[#allocation3 + $0x88] sm:$0xff]  ;;  %v2883_v27 = vld [vmem:[#allocation3 + $0xb0] sm:$0xff] }
 0x26c   : > { %v8573_v11 = vld [vmem:[%s11302_s4 + $0x228] sm:$0xff]   ;;  %v2910_v56 = vpack.c.bf16 %v2881_v54, %v2880_v24 }
 0x26d   : > { %v2882_v22 = vld [vmem:[#allocation3 + $0xa8] sm:$0xff] }
 0x26e   : > { %3653 = vmatmul.mubr.bf16.gmra.mrb[180].mxu1 %v10389_v29  ;;  %v2911_v30 = vpack.c.bf16 %v2883_v27, %v2882_v22  ;;  %v2886_v63 = vld [vmem:[#allocation3 + $0xe8] sm:$0xff] }
 0x26f   : > { %3806 = vmatmul.mubr.bf16.gmra.mrb[176].mxu0 %v10393_v25  ;;  %3660 = vmatprep.mubr.bf16.mxu1 %v2629_v20  ;;  %v10452_v20 = vpack.c.bf16 %v2662_v19, %v2661_v28  ;;  %v2887_v19 = vld [vmem:[#allocation3 + $0xf0] sm:$0xff]  ;;  %v2902_v27 = vld [vmem:[#allocation3 + $0x1e8] sm:$0xff] }
 0x270   : > { %3813 = vmatprep.mubr.bf16.mxu0 %v10400_v12 }
 0x276   : > { %3661 = vmatmul.mubr.bf16.gmra.mrb[184].mxu1 %v10400_v12  ;;  %v7291_v34 = vpop.f32.mrb[144].mxu1 }
 0x277   : > { %3814 = vmatmul.mubr.bf16.gmra.mrb[180].mxu0 %v10404_v61  ;;  %3668 = vmatprep.mubr.bf16.mxu1 %v2630_v10  ;;  %v7292_v6 = vpop.f32.mrb[145].mxu1  ;;  %v10463_v10 = vpack.c.bf16 %v2664_v9, %v2663_v32 }
 0x278   : > { %3821 = vmatprep.mubr.bf16.mxu0 %v10411_v49  ;;  %v10415_v1 = vadd.f32 %v7292_v6, %v7291_v34  ;;  %v7294_v23 = vpop.f32.mrb[146].mxu1  ;;  %v2731_v34 = vld [vmem:[#allocation3 + $0x28] sm:$0xff]  ;;  %v2877_v6 = vld [vmem:[#allocation3 + $0x50] sm:$0xff] }
 0x279   : > { %v7295_v36 = vpop.f32.mrb[147].mxu1  ;;  %v2908_v45 = vpack.c.bf16 %v2877_v6, %v2876_v14 }
 0x27a   : > { %v10417_v60 = vadd.f32 %v7295_v36, %v7294_v23  ;;  %v2763_v23 = vpack.c.bf16 %v2732_v2, %v2731_v34  ;;  %v8569_v36 = vld [vmem:[%s11302_s4 + $0x208] sm:$0xff]  }
 0x27e   : > { %3669 = vmatmul.mubr.bf16.gmra.mrb[188].mxu1 %v10411_v49 }
 0x27f   : > { %3822 = vmatmul.mubr.bf16.gmra.mrb[184].mxu0 %v10419_v44  ;;  %3676 = vmatprep.mubr.bf16.mxu1 %v2631_v51  ;;  %v2829_v51 = vld [vmem:[#allocation3 + $0x4f] sm:$0xff] }
 0x280   : > { %3829 = vmatprep.mubr.bf16.mxu0 %v10426_v42  ;;  %v2860_v59 = vpack.c.bf16 %v2829_v51, %v2828_v4 }
 0x286   : > { %3677 = vmatmul.mubr.bf16.gmra.mrb[192].mxu1 %v10426_v42 }
 0x287   : > { %3830 = vmatmul.mubr.bf16.gmra.mrb[188].mxu0 %v10430_v50  ;;  %3684 = vmatprep.mubr.bf16.mxu1 %v2632_v53  ;;  %v8571_v53 = vld [vmem:[%s11302_s4 + $0x218] sm:$0xff]  }
 0x288   : > { %3837 = vmatprep.mubr.bf16.mxu0 %v10437_v52 }
 0x28e   : > { %3685 = vmatmul.mubr.bf16.gmra.mrb[196].mxu1 %v10437_v52 }
 0x28f   : > { %3838 = vmatmul.mubr.bf16.gmra.mrb[192].mxu0 %v10441_v37  ;;  %3692 = vmatprep.mubr.bf16.mxu1 %v2633_v35  ;;  %v8575_v35 = vld [vmem:[%s11302_s4 + $0x238] sm:$0xff]  }
 0x290   : > { %3845 = vmatprep.mubr.bf16.mxu0 %v10448_v62 }
 0x296   : > { %3693 = vmatmul.mubr.bf16.gmra.mrb[200].mxu1 %v10448_v62 }
 0x297   : > { %3846 = vmatmul.mubr.bf16.gmra.mrb[196].mxu0 %v10452_v20  ;;  %3700 = vmatprep.mubr.bf16.mxu1 %v2634_v57  ;;  %v2913_v57 = vpack.c.bf16 %v2887_v19, %v2886_v63  ;;  %v2809_v19 = vld [vmem:[#allocation3 + $0x209] sm:$0xff]  ;;  %v2810_v63 = vld [vmem:[#allocation3 + $0x211] sm:$0xff] }
 0x298   : > { %3853 = vmatprep.mubr.bf16.mxu0 %v10459_v8 }
 0x29e   : > { %3701 = vmatmul.mubr.bf16.gmra.mrb[204].mxu1 %v10459_v8 }
 0x29f   : > { %3854 = vmatmul.mubr.bf16.gmra.mrb[200].mxu0 %v10463_v10  ;;  %3902 = vmatprep.mubr.bf16.mxu1 %v10128_v58  ;;  %v8570_v58 = vld [vmem:[%s11302_s4 + $0x210] sm:$0xff]  }
 0x2a0   : > { %3861 = vmatprep.mubr.bf16.mxu0 %v10466_v13 }
 0x2a6   : > { %3903 = vmatmul.mubr.bf16.vlgmr.msra.gmra.mrb[208].mxu1 %v2763_v23  ;;  %v2901_v23 = vld [vmem:[#allocation3 + $0x1d0] sm:$0xff] }
 0x2a7   : > { %3862 = vmatmul.mubr.bf16.gmra.mrb[204].mxu0 %v10471_v17  ;;  %3910 = vmatprep.mubr.bf16.mxu1 %v10188_v55  ;;  %v2909_v55 = vpack.c.bf16 %v2879_v33, %v2878_v15 }
 0x2a8   : > { %4063 = vmatprep.mubr.bf16.mxu0 %v2908_v45  ;;  %8268 = vmatpush3.bf16.msra.mxu1 %v10051_v48  ;;  %v8572_v48 = vld [vmem:[%s11302_s4 + $0x220] sm:$0xff]  }
 0x2a9   : > { %8269 = vmatprep.subr.bf16.mxu1 %v8569_v36 }
 0x2ac   : > { %8270 = vmatpush3.bf16.msra.mxu1 %v8569_v36 }
 0x2ad   : > { %8271 = vmatprep.subr.bf16.mxu1 %v8570_v58 }
 0x2ae   : > { %3911 = vmatmul.mubr.bf16.gmra.mrb[212].mxu1 %v2908_v45 }
 0x2af   : > { %4064 = vmatmul.mubr.bf16.vlgmr.msra.gmra.mrb[208].mxu0 %v2860_v59  ;;  %3918 = vmatprep.mubr.bf16.mxu1 %v10257_v38  ;;  %v8574_v38 = vld [vmem:[%s11302_s4 + $0x230] sm:$0xff]  }
 0x2b0   : > { %4071 = vmatprep.mubr.bf16.mxu0 %v2909_v55  ;;  %8272 = vmatpush3.bf16.msra.mxu1 %v8570_v58  ;;  %v2900_v58 = vld [vmem:[#allocation3 + $0x1c8] sm:$0xff] }
 0x2b1   : > { %8273 = vmatprep.subr.bf16.mxu1 %v8571_v53  ;;  %v2920_v33 = vpack.c.bf16 %v2901_v23, %v2900_v58 }
 0x2b4   : > { %8274 = vmatpush3.bf16.msra.mxu1 %v8571_v53 }
 0x2b5   : > { %8275 = vmatprep.subr.bf16.mxu1 %v8572_v48 }
 0x2b6   : > { %3919 = vmatmul.mubr.bf16.gmra.mrb[216].mxu1 %v2909_v55  ;;  %v8577_v55 = vld [vmem:[#allocation4] sm:$0xff]  }
 0x2b7   : > { %4072 = vmatmul.mubr.bf16.gmra.mrb[212].mxu0 %v10151_v3  ;;  %3926 = vmatprep.mubr.bf16.mxu1 %v10306_v41  ;;  %v2885_v3 = vld [vmem:[#allocation3 + $0xd0] sm:$0xff]  ;;  %v2884_v41 = vld [vmem:[#allocation3 + $0xc8] sm:$0xff] }
 0x2b8   : > { %4079 = vmatprep.mubr.bf16.mxu0 %v2910_v56  ;;  %8276 = vmatpush3.bf16.msra.mxu1 %v8572_v48  ;;  %v2912_v28 = vpack.c.bf16 %v2885_v3, %v2884_v41 }
 0x2b9   : > { %8277 = vmatprep.subr.bf16.mxu1 %v8573_v11 }
 0x2bc   : > { %8278 = vmatpush3.bf16.msra.mxu1 %v8573_v11  ;;  %v2903_v11 = vld [vmem:[#allocation3 + $0x1f0] sm:$0xff] }
 0x2bd   : > { %8279 = vmatprep.subr.bf16.mxu1 %v8574_v38 }
 0x2be   : > { %3927 = vmatmul.mubr.bf16.gmra.mrb[220].mxu1 %v2910_v56 }
 0x2bf   : > { %4080 = vmatmul.mubr.bf16.gmra.mrb[216].mxu0 %v10212_v40  ;;  %3934 = vmatprep.mubr.bf16.mxu1 %v10342_v26  ;;  %v2889_v40 = vld [vmem:[#allocation3 + $0x110] sm:$0xff]  ;;  %v2888_v26 = vld [vmem:[#allocation3 + $0x108] sm:$0xff] }
 0x2c0   : > { %4087 = vmatprep.mubr.bf16.mxu0 %v2911_v30  ;;  %8280 = vmatpush3.bf16.msra.mxu1 %v8574_v38  ;;  %v2914_v47 = vpack.c.bf16 %v2889_v40, %v2888_v26 }
 0x2c1   : > { %8281 = vmatprep.subr.bf16.mxu1 %v8575_v35 }
 0x2c4   : > { %8282 = vmatpush3.bf16.msra.mxu1 %v8575_v35 }
 0x2c6   : > { %3935 = vmatmul.mubr.bf16.gmra.mrb[224].mxu1 %v2911_v30 }
 0x2c7   : > { %4088 = vmatmul.mubr.bf16.gmra.mrb[220].mxu0 %v10271_v43  ;;  %3942 = vmatprep.mubr.bf16.mxu1 %v10371_v16  ;;  %v2891_v43 = vld [vmem:[#allocation3 + $0x130] sm:$0xff]  ;;  %v2890_v16 = vld [vmem:[#allocation3 + $0x128] sm:$0xff] }
 0x2c8   : > { %4095 = vmatprep.mubr.bf16.mxu0 %v2912_v28  ;;  %v2915_v32 = vpack.c.bf16 %v2891_v43, %v2890_v16 }
 0x2ce   : > { %3943 = vmatmul.mubr.bf16.gmra.mrb[228].mxu1 %v2912_v28 }
 0x2cf   : > { %4096 = vmatmul.mubr.bf16.gmra.mrb[224].mxu0 %v10317_v21  ;;  %3950 = vmatprep.mubr.bf16.mxu1 %v10382_v31  ;;  %v2893_v21 = vld [vmem:[#allocation3 + $0x150] sm:$0xff]  ;;  %v2892_v31 = vld [vmem:[#allocation3 + $0x148] sm:$0xff] }
 0x2d0   : > { %4103 = vmatprep.mubr.bf16.mxu0 %v2913_v57  ;;  %v2916_v9 = vpack.c.bf16 %v2893_v21, %v2892_v31 }
 0x2d6   : > { %3951 = vmatmul.mubr.bf16.gmra.mrb[232].mxu1 %v2913_v57 }
 0x2d7   : > { %4104 = vmatmul.mubr.bf16.gmra.mrb[228].mxu0 %v10348_v39  ;;  %3958 = vmatprep.mubr.bf16.mxu1 %v10393_v25  ;;  %v2895_v39 = vld [vmem:[#allocation3 + $0x170] sm:$0xff]  ;;  %v2894_v25 = vld [vmem:[#allocation3 + $0x168] sm:$0xff] }
 0x2d8   : > { %4111 = vmatprep.mubr.bf16.mxu0 %v2914_v47  ;;  %v2917_v5 = vpack.c.bf16 %v2895_v39, %v2894_v25 }
 0x2de   : > { %3959 = vmatmul.mubr.bf16.gmra.mrb[236].mxu1 %v2914_v47  ;;  %v2905_v47 = vld [vmem:[#allocation3 + $0x210] sm:$0xff] }
 0x2df   : > { %4112 = vmatmul.mubr.bf16.gmra.mrb[232].mxu0 %v10378_v46  ;;  %3966 = vmatprep.mubr.bf16.mxu1 %v10404_v61  ;;  %v2897_v46 = vld [vmem:[#allocation3 + $0x190] sm:$0xff]  ;;  %v2896_v61 = vld [vmem:[#allocation3 + $0x188] sm:$0xff] }
 0x2e0   : > { %4119 = vmatprep.mubr.bf16.mxu0 %v2915_v32  ;;  %v2918_v7 = vpack.c.bf16 %v2897_v46, %v2896_v61  ;;  %v8578_v46 = vld [vmem:[#allocation4 + $0x48] sm:$0xff]  }
 0x2e6   : > { %3967 = vmatmul.mubr.bf16.gmra.mrb[240].mxu1 %v2915_v32 }
 0x2e7   : > { %4120 = vmatmul.mubr.bf16.gmra.mrb[236].mxu0 %v10389_v29  ;;  %3974 = vmatprep.mubr.bf16.mxu1 %v10419_v44  ;;  %v2899_v29 = vld [vmem:[#allocation3 + $0x1b0] sm:$0xff]  ;;  %v2898_v44 = vld [vmem:[#allocation3 + $0x1a8] sm:$0xff] }
 0x2e8   : > { %4127 = vmatprep.mubr.bf16.mxu0 %v2916_v9  ;;  %v2919_v2 = vpack.c.bf16 %v2899_v29, %v2898_v44 }
 0x2ee   : > { %3975 = vmatmul.mubr.bf16.gmra.mrb[244].mxu1 %v2916_v9  ;;  %v2904_v9 = vld [vmem:[#allocation3 + $0x208] sm:$0xff] }
 0x2ef   : > { %4128 = vmatmul.mubr.bf16.gmra.mrb[240].mxu0 %v10400_v12  ;;  %3982 = vmatprep.mubr.bf16.mxu1 %v10430_v50  ;;  %v2922_v25 = vpack.c.bf16 %v2905_v47, %v2904_v9  ;;  %v2931_v47 = vld [vmem:[#allocation3 + $0xb1] sm:$0xff] }
 0x2f0   : > { %4135 = vmatprep.mubr.bf16.mxu0 %v2917_v5 }
 0x2f6   : > { %3983 = vmatmul.mubr.bf16.gmra.mrb[248].mxu1 %v2917_v5 }
 0x2f7   : > { %4136 = vmatmul.mubr.bf16.gmra.mrb[244].mxu0 %v10411_v49  ;;  %3990 = vmatprep.mubr.bf16.mxu1 %v10441_v37 }
 0x2f8   : > { %4143 = vmatprep.mubr.bf16.mxu0 %v2918_v7 }
 0x2fe   : > { %3991 = vmatmul.mubr.bf16.gmra.mrb[252].mxu1 %v2918_v7 }
 0x2ff   : > { %4144 = vmatmul.mubr.bf16.gmra.mrb[248].mxu0 %v10426_v42  ;;  %3998 = vmatprep.mubr.bf16.mxu1 %v10452_v20  ;;  %v8576_v20 = vld [vmem:[#allocation4 + $0x40] sm:$0xff]  }
 0x300   : > { %4151 = vmatprep.mubr.bf16.mxu0 %v2919_v2  ;;  %7747 = vmatprep.subr.bf16.mxu0 %v8576_v20  ;;  %v2859_v20 = vld [vmem:[#allocation3 + $0x22f] sm:$0xff] }
 0x301   : > { %v7297_v12 = vpop.f32.mrb[148].mxu1  ;;  %7748 = vmatpush3.bf16.msra.mxu0 %v8577_v55  ;;  %v2927_v55 = vld [vmem:[#allocation3 + $0x71] sm:$0xff] }
 0x302   : > { %v7403_v50 = vpop.f32.mrb[144].mxu0  ;;  %v7298_v0 = vpop.f32.mrb[149].mxu1  ;;  %7749 = vmatprep.subr.bf16.mxu0 %v8578_v46 }
 0x303   : > { %v7299_v18 = vadd.f32 %v7298_v0, %v7297_v12  ;;  %v7404_v34 = vpop.f32.mrb[145].mxu0  ;;  %v7300_v6 = vpop.f32.mrb[150].mxu1  ;;  %v2925_v12 = vld [vmem:[#allocation3 + $0x51] sm:$0xff] }
 0x304   : > { %v7405_v49 = vadd.f32 %v7404_v34, %v7403_v50  ;;  %v7406_v14 = vpop.f32.mrb[146].mxu0  ;;  %v7301_v37 = vpop.f32.mrb[151].mxu1  ;;  %v8579_v50 = vld [vmem:[#allocation4 + $0x8] sm:$0xff]  }
 0x305   : > { %v7302_v36 = vadd.f32 %v7301_v37, %v7300_v6  ;;  %v7407_v45 = vpop.f32.mrb[147].mxu0  ;;  %7750 = vmatpush3.bf16.msra.mxu0 %v8579_v50 }
 0x306   : > { %v7408_v51 = vadd.f32 %v7407_v45, %v7406_v14  ;;  %3999 = vmatmul.mubr.bf16.gmra.mrb[0].mxu1 %v2919_v2  ;;  %v10519_v42 = vadd.f32 %v7405_v49, %v10415_v1  ;;  %v2924_v2 = vld [vmem:[#allocation3 + $0x49] sm:$0xff] }
 0x307   : > { %4152 = vmatmul.mubr.bf16.gmra.mrb[252].mxu0 %v10437_v52  ;;  %4006 = vmatprep.mubr.bf16.mxu1 %v10463_v10  ;;  %v2956_v45 = vpack.c.bf16 %v2925_v12, %v2924_v2 }
 0x308   : > { %4159 = vmatprep.mubr.bf16.mxu0 %v2920_v33  ;;  %v10524_v4 = vadd.f32 %v7408_v51, %v10417_v60  ;;  %v2921_v60 = vpack.c.bf16 %v2903_v11, %v2902_v27  ;;  %v2929_v11 = vld [vmem:[#allocation3 + $0x91] sm:$0xff] }
 0x309   : > { %v7303_v59 = vpop.f32.mrb[152].mxu1 }
 0x30a   : > { %v7409_v15 = vpop.f32.mrb[148].mxu0  ;;  %v7304_v53 = vpop.f32.mrb[153].mxu1 }
 0x30b   : > { %v7305_v48 = vadd.f32 %v7304_v53, %v7303_v59  ;;  %v7410_v54 = vpop.f32.mrb[149].mxu0  ;;  %v7306_v24 = vpop.f32.mrb[154].mxu1  ;;  %v2926_v53 = vld [vmem:[#allocation3 + $0x69] sm:$0xff] }
 0x30c   : > { %v7411_v1 = vadd.f32 %v7410_v54, %v7409_v15  ;;  %v7412_v56 = vpop.f32.mrb[150].mxu0  ;;  %v7307_v38 = vpop.f32.mrb[155].mxu1 }
 0x30d   : > { %v7308_v52 = vadd.f32 %v7307_v38, %v7306_v24  ;;  %v7413_v10 = vpop.f32.mrb[151].mxu0  ;;  %v2928_v24 = vld [vmem:[#allocation3 + $0x89] sm:$0xff] }
 0x30e   : > { %v7414_v22 = vadd.f32 %v7413_v10, %v7412_v56  ;;  %4007 = vmatmul.mubr.bf16.gmra.mrb[4].mxu1 %v2920_v33  ;;  %v10526_v35 = vadd.f32 %v7411_v1, %v7299_v18  ;;  %v2858_v33 = vld [vmem:[#allocation3 + $0x227] sm:$0xff] }
 0x30f   : > { %4160 = vmatmul.mubr.bf16.gmra.mrb[0].mxu0 %v10448_v62  ;;  %4014 = vmatprep.mubr.bf16.mxu1 %v10471_v17  ;;  %v10532_v62 = vpack.c.bf16 %v2810_v63, %v2809_v19  ;;  %v8580_v63 = vld [vmem:[#allocation4 + $0x50] sm:$0xff]  }
 0x310   : > { %4167 = vmatprep.mubr.bf16.mxu0 %v2921_v60  ;;  %v10530_v30 = vadd.f32 %v7414_v22, %v7302_v36  ;;  %v2957_v22 = vpack.c.bf16 %v2927_v55, %v2926_v53  ;;  %7751 = vmatprep.subr.bf16.mxu0 %v8580_v63 }
 0x311   : > { %v7309_v3 = vpop.f32.mrb[156].mxu1 }
 0x312   : > { %v7415_v41 = vpop.f32.mrb[152].mxu0  ;;  %v7310_v28 = vpop.f32.mrb[157].mxu1 }
 0x313   : > { %v7311_v57 = vadd.f32 %v7310_v28, %v7309_v3  ;;  %v7416_v40 = vpop.f32.mrb[153].mxu0  ;;  %v7312_v26 = vpop.f32.mrb[158].mxu1 }
 0x314   : > { %v7417_v43 = vadd.f32 %v7416_v40, %v7415_v41  ;;  %v7418_v16 = vpop.f32.mrb[154].mxu0  ;;  %v7313_v32 = vpop.f32.mrb[159].mxu1  ;;  %v2958_v41 = vpack.c.bf16 %v2929_v11, %v2928_v24 }
 0x315   : > { %v7314_v21 = vadd.f32 %v7313_v32, %v7312_v26  ;;  %v7419_v31 = vpop.f32.mrb[155].mxu0  ;;  %v2930_v26 = vld [vmem:[#allocation3 + $0xa9] sm:$0xff] }
 0x316   : > { %v7420_v39 = vadd.f32 %v7419_v31, %v7418_v16  ;;  %4015 = vmatmul.mubr.bf16.gmra.mrb[8].mxu1 %v2921_v60  ;;  %v10534_v5 = vadd.f32 %v7417_v43, %v7305_v48  ;;  %v2932_v32 = vld [vmem:[#allocation3 + $0xc9] sm:$0xff] }
 0x317   : > { %4168 = vmatmul.mubr.bf16.gmra.mrb[4].mxu0 %v10459_v8  ;;  %4022 = vmatprep.mubr.bf16.mxu1 %v10532_v62  ;;  %v8649_v8 = vld [vmem:[#allocation2 + $0x8] sm:$0xff]  ;;  %v8581_v31 = vld [vmem:[#allocation4 + $0x10] sm:$0xff]  }
 0x318   : > { %4175 = vmatprep.mubr.bf16.mxu0 %v2922_v25  ;;  %v10538_v61 = vadd.f32 %v7420_v39, %v7308_v52  ;;  %v10540_v14 = vpack.c.bf16 %v8649_v8, %v8649_v8  ;;  %v2875_v52 = vpack.c.bf16 %v2859_v20, %v2858_v33  ;;  %7752 = vmatpush3.bf16.msra.mxu0 %v8581_v31 }
 0x319   : > { %v7315_v7 = vpop.f32.mrb[160].mxu1 }
 0x31a   : > { %v7421_v29 = vpop.f32.mrb[156].mxu0  ;;  %v7316_v44 = vpop.f32.mrb[161].mxu1 }
 0x31b   : > { %v7317_v0 = vadd.f32 %v7316_v44, %v7315_v7  ;;  %v7422_v18 = vpop.f32.mrb[157].mxu0  ;;  %v7318_v34 = vpop.f32.mrb[162].mxu1  ;;  %v2959_v44 = vpack.c.bf16 %v2931_v47, %v2930_v26 }
 0x31c   : > { %v7423_v6 = vadd.f32 %v7422_v18, %v7421_v29  ;;  %v7424_v23 = vpop.f32.mrb[158].mxu0  ;;  %v7319_v49 = vpop.f32.mrb[163].mxu1 }
 0x31d   : > { %v7320_v37 = vadd.f32 %v7319_v49, %v7318_v34  ;;  %v7425_v36 = vpop.f32.mrb[159].mxu0  ;;  %v2935_v49 = vld [vmem:[#allocation3 + $0xf1] sm:$0xff] }
 0x31e   : > { %v7426_v58 = vadd.f32 %v7425_v36, %v7424_v23  ;;  %4023 = vmatmul.mubr.bf16.gmra.mrb[12].mxu1 %v2922_v25  ;;  %v10542_v51 = vadd.f32 %v7423_v6, %v7311_v57  ;;  %v2934_v23 = vld [vmem:[#allocation3 + $0xe9] sm:$0xff] }
 0x31f   : > { %4176 = vmatmul.mubr.bf16.gmra.mrb[8].mxu0 %v10466_v13  ;;  %8283 = vmatprep.mubr.bf16.mxu1 %v2956_v45  ;;  %v2936_v36 = vld [vmem:[#allocation3 + $0x109] sm:$0xff]  ;;  %v2937_v45 = vld [vmem:[#allocation3 + $0x111] sm:$0xff] }
 0x320   : > { %4183 = vmatprep.mubr.bf16.mxu0 %v10540_v14  ;;  %v10546_v59 = vadd.f32 %v7426_v58, %v7314_v21  ;;  %v2933_v21 = vld [vmem:[#allocation3 + $0xd1] sm:$0xff]  ;;  %v2962_v11 = vpack.c.bf16 %v2937_v45, %v2936_v36 }
 0x321   : > { %v7321_v15 = vpop.f32.mrb[164].mxu1  ;;  %v2960_v50 = vpack.c.bf16 %v2933_v21, %v2932_v32 }
 0x322   : > { %v7427_v48 = vpop.f32.mrb[160].mxu0  ;;  %v7322_v54 = vpop.f32.mrb[165].mxu1 }
 0x323   : > { %v7323_v1 = vadd.f32 %v7322_v54, %v7321_v15  ;;  %v7428_v56 = vpop.f32.mrb[161].mxu0  ;;  %v7324_v38 = vpop.f32.mrb[166].mxu1 }
 0x324   : > { %v7429_v10 = vadd.f32 %v7428_v56, %v7427_v48  ;;  %v7430_v13 = vpop.f32.mrb[162].mxu0  ;;  %v7325_v27 = vpop.f32.mrb[167].mxu1  ;;  %v2961_v48 = vpack.c.bf16 %v2935_v49, %v2934_v23 }
 0x325   : > { %v7326_v60 = vadd.f32 %v7325_v27, %v7324_v38  ;;  %v7431_v3 = vpop.f32.mrb[163].mxu0  ;;  %v8582_v38 = vld [vmem:[#allocation4 + $0x58] sm:$0xff]  }
 0x326   : > { %v7432_v28 = vadd.f32 %v7431_v3, %v7430_v13  ;;  %8284 = vmatmul.mubr.bf16.vlgmr.msra.gmra.mrb[16].mxu1 %v2957_v22  ;;  %v10548_v19 = vadd.f32 %v7429_v10, %v7317_v0  ;;  %v2938_v13 = vld [vmem:[#allocation3 + $0x129] sm:$0xff]  ;;  %v2939_v27 = vld [vmem:[#allocation3 + $0x131] sm:$0xff]  ;;  %7753 = vmatprep.subr.bf16.mxu0 %v8582_v38 }
 0x327   : > { %4184 = vmatmul.mubr.bf16.gmra.mrb[12].mxu0 %v2875_v52  ;;  %8287 = vmatprep.mubr.bf16.mxu1 %v2958_v41  ;;  %v2940_v3 = vld [vmem:[#allocation3 + $0x149] sm:$0xff]  ;;  %v2941_v41 = vld [vmem:[#allocation3 + $0x151] sm:$0xff]  ;;  %v2963_v32 = vpack.c.bf16 %v2939_v27, %v2938_v13  ;;  %v8585_v27 = vld [vmem:[#allocation4 + $0x20] sm:$0xff]  }
 0x328   : > { %v10550_v57 = vadd.f32 %v7432_v28, %v7320_v37  ;;  %v8583_v28 = vld [vmem:[#allocation4 + $0x18] sm:$0xff]   ;;  %5535 = vmatprep.mubr.bf16.mxu0 %v10540_v14 }
 0x329   : > { %v7327_v40 = vpop.f32.mrb[168].mxu1  ;;  %7754 = vmatpush3.bf16.msra.mxu0 %v8583_v28  ;;  %v2949_v13 = vld [vmem:[#allocation3 + $0x1d1] sm:$0xff] }
 0x32a   : > { %v7433_v43 = vpop.f32.mrb[164].mxu0  ;;  %v7328_v16 = vpop.f32.mrb[169].mxu1 }
 0x32b   : > { %v7329_v9 = vadd.f32 %v7328_v16, %v7327_v40  ;;  %v7434_v39 = vpop.f32.mrb[165].mxu0  ;;  %v7330_v25 = vpop.f32.mrb[170].mxu1 }
 0x32c   : > { %v7435_v46 = vadd.f32 %v7434_v39, %v7433_v43  ;;  %v7436_v7 = vpop.f32.mrb[166].mxu0  ;;  %v7331_v29 = vpop.f32.mrb[171].mxu1 }
 0x32d   : > { %v7332_v2 = vadd.f32 %v7331_v29, %v7330_v25  ;;  %v7437_v12 = vpop.f32.mrb[167].mxu0  ;;  %v2942_v29 = vld [vmem:[#allocation3 + $0x169] sm:$0xff] }
 0x32e   : > { %v7438_v0 = vadd.f32 %v7437_v12, %v7436_v7  ;;  %8288 = vmatmul.mubr.bf16.gmra.mrb[20].mxu1 %v2959_v44  ;;  %v10552_v18 = vadd.f32 %v7435_v46, %v7323_v1  ;;  %v2943_v44 = vld [vmem:[#allocation3 + $0x171] sm:$0xff] }
 0x32f   : > { %8291 = vmatprep.mubr.bf16.mxu1 %v2960_v50  ;;  %v2944_v50 = vld [vmem:[#allocation3 + $0x189] sm:$0xff]  ;;  %v2965_v45 = vpack.c.bf16 %v2943_v44, %v2942_v29 }
 0x330   : > { %v10554_v34 = vadd.f32 %v7438_v0, %v7326_v60  ;;  %v2945_v0 = vld [vmem:[#allocation3 + $0x191] sm:$0xff] }
 0x331   : > { %v7333_v6 = vpop.f32.mrb[172].mxu1 }
 0x332   : > { %v7439_v8 = vpop.f32.mrb[168].mxu0  ;;  %v7334_v37 = vpop.f32.mrb[173].mxu1 }
 0x333   : > { %v7335_v58 = vadd.f32 %v7334_v37, %v7333_v6  ;;  %v7440_v33 = vpop.f32.mrb[169].mxu0  ;;  %v7336_v20 = vpop.f32.mrb[174].mxu1 }
 0x334   : > { %v7441_v15 = vadd.f32 %v7440_v33, %v7439_v8  ;;  %v7442_v53 = vpop.f32.mrb[170].mxu0  ;;  %v7337_v55 = vpop.f32.mrb[175].mxu1 }
 0x335   : > { %v7338_v54 = vadd.f32 %v7337_v55, %v7336_v20  ;;  %v7443_v24 = vpop.f32.mrb[171].mxu0  ;;  %v2966_v20 = vpack.c.bf16 %v2945_v0, %v2944_v50  ;;  %v8584_v55 = vld [vmem:[#allocation4 + $0x60] sm:$0xff]  }
 0x336   : > { %v7444_v1 = vadd.f32 %v7443_v24, %v7442_v53  ;;  %8292 = vmatmul.mubr.bf16.gmra.mrb[24].mxu1 %v2961_v48  ;;  %v10556_v56 = vadd.f32 %v7441_v15, %v7329_v9  ;;  %v2964_v9 = vpack.c.bf16 %v2941_v41, %v2940_v3  ;;  %v2946_v24 = vld [vmem:[#allocation3 + $0x1a9] sm:$0xff]  ;;  %7755 = vmatprep.subr.bf16.mxu0 %v8584_v55 }
 0x337   : > { %8295 = vmatprep.mubr.bf16.mxu1 %v2962_v11  ;;  %v2947_v11 = vld [vmem:[#allocation3 + $0x1b1] sm:$0xff]  ;;  %7756 = vmatpush3.bf16.msra.mxu0 %v8585_v27  ;;  %v8587_v55 = vld [vmem:[#allocation4 + $0x28] sm:$0xff]  }
 0x338   : > { %v10558_v52 = vadd.f32 %v7444_v1, %v7332_v2 }
 0x339   : > { %v7339_v10 = vpop.f32.mrb[176].mxu1 }
 0x33a   : > { %v7445_v22 = vpop.f32.mrb[172].mxu0  ;;  %v7340_v60 = vpop.f32.mrb[177].mxu1 }
 0x33b   : > { %v7341_v63 = vadd.f32 %v7340_v60, %v7339_v10  ;;  %v7446_v40 = vpop.f32.mrb[173].mxu0  ;;  %v7342_v26 = vpop.f32.mrb[178].mxu1  ;;  %v2948_v10 = vld [vmem:[#allocation3 + $0x1c9] sm:$0xff] }
 0x33c   : > { %v7447_v47 = vadd.f32 %v7446_v40, %v7445_v22  ;;  %v7448_v43 = vpop.f32.mrb[174].mxu0  ;;  %v7343_v16 = vpop.f32.mrb[179].mxu1  ;;  %v2967_v40 = vpack.c.bf16 %v2947_v11, %v2946_v24 }
 0x33d   : > { %v7344_v21 = vadd.f32 %v7343_v16, %v7342_v26  ;;  %v7449_v31 = vpop.f32.mrb[175].mxu0 }
 0x33e   : > { %v7450_v39 = vadd.f32 %v7449_v31, %v7448_v43  ;;  %8296 = vmatmul.mubr.bf16.gmra.mrb[28].mxu1 %v2963_v32  ;;  %v10560_v25 = vadd.f32 %v7447_v47, %v7335_v58  ;;  %v2968_v43 = vpack.c.bf16 %v2949_v13, %v2948_v10 }
 0x33f   : > { %8299 = vmatprep.mubr.bf16.mxu1 %v2964_v9 }
 0x340   : > { %v10562_v46 = vadd.f32 %v7450_v39, %v7338_v54 }
 0x341   : > { %v7345_v7 = vpop.f32.mrb[180].mxu1 }
 0x342   : > { %v7451_v2 = vpop.f32.mrb[176].mxu0  ;;  %v7346_v12 = vpop.f32.mrb[181].mxu1 }
 0x343   : > { %v7347_v6 = vadd.f32 %v7346_v12, %v7345_v7  ;;  %v7452_v23 = vpop.f32.mrb[177].mxu0  ;;  %v7348_v49 = vpop.f32.mrb[182].mxu1 }
 0x344   : > { %v7453_v8 = vadd.f32 %v7452_v23, %v7451_v2  ;;  %v7454_v37 = vpop.f32.mrb[178].mxu0  ;;  %v7349_v36 = vpop.f32.mrb[183].mxu1 }
 0x345   : > { %v7350_v33 = vadd.f32 %v7349_v36, %v7348_v49  ;;  %v7455_v58 = vpop.f32.mrb[179].mxu0  ;;  %v8586_v36 = vld [vmem:[#allocation4 + $0x68] sm:$0xff]  }
 0x346   : > { %v10564_v15 = vadd.f32 %v7453_v8, %v7341_v63  ;;  %v7456_v53 = vadd.f32 %v7455_v58, %v7454_v37  ;;  %8300 = vmatmul.mubr.bf16.gmra.mrb[32].mxu1 %v2965_v45  ;;  %v2954_v8 = vld [vmem:[#allocation3 + $0x229] sm:$0xff]  ;;  %v2955_v37 = vld [vmem:[#allocation3 + $0x231] sm:$0xff]  ;;  %7757 = vmatprep.subr.bf16.mxu0 %v8586_v36 }
 0x347   : > { %8303 = vmatprep.mubr.bf16.mxu1 %v2966_v20  ;;  %7758 = vmatpush3.bf16.msra.mxu0 %v8587_v55  ;;  %v8590_v55 = vld [vmem:[#allocation4 + $0xc0] sm:$0xff]  }
 0x348   : > { %v10566_v48 = vadd.f32 %v7456_v53, %v7344_v21  ;;  %v2971_v53 = vpack.c.bf16 %v2955_v37, %v2954_v8  ;;  %7859 = vmatprep.subr.bf16.mxu1 %v8590_v55 }
 0x349   : > { %v7351_v54 = vpop.f32.mrb[184].mxu1 }
 0x34a   : > { %v7457_v1 = vpop.f32.mrb[180].mxu0  ;;  %v7352_v38 = vpop.f32.mrb[185].mxu1 }
 0x34b   : > { %v7353_v22 = vadd.f32 %v7352_v38, %v7351_v54  ;;  %v7458_v60 = vpop.f32.mrb[181].mxu0  ;;  %v7354_v3 = vpop.f32.mrb[186].mxu1 }
 0x34c   : > { %v7459_v41 = vadd.f32 %v7458_v60, %v7457_v1  ;;  %v7460_v28 = vpop.f32.mrb[182].mxu0  ;;  %v7355_v63 = vpop.f32.mrb[187].mxu1 }
 0x34d   : > { %v7356_v26 = vadd.f32 %v7355_v63, %v7354_v3  ;;  %v7461_v47 = vpop.f32.mrb[183].mxu0 }
 0x34e   : > { %v10568_v16 = vadd.f32 %v7459_v41, %v7347_v6  ;;  %v7462_v32 = vadd.f32 %v7461_v47, %v7460_v28  ;;  %8304 = vmatmul.mubr.bf16.gmra.mrb[36].mxu1 %v2967_v40 }
 0x34f   : > { %8307 = vmatprep.mubr.bf16.mxu1 %v2968_v43 }
 0x350   : > { %v10570_v21 = vadd.f32 %v7462_v32, %v7350_v33 }
 0x351   : > { %v7357_v31 = vpop.f32.mrb[188].mxu1 }
 0x352   : > { %v7463_v9 = vpop.f32.mrb[184].mxu0  ;;  %v7358_v39 = vpop.f32.mrb[189].mxu1 }
 0x353   : > { %v7359_v7 = vadd.f32 %v7358_v39, %v7357_v31  ;;  %v7464_v29 = vpop.f32.mrb[185].mxu0  ;;  %v7360_v44 = vpop.f32.mrb[190].mxu1 }
 0x354   : > { %v7465_v2 = vadd.f32 %v7464_v29, %v7463_v9  ;;  %v7466_v12 = vpop.f32.mrb[186].mxu0  ;;  %v7361_v50 = vpop.f32.mrb[191].mxu1 }
 0x355   : > { %v7362_v0 = vadd.f32 %v7361_v50, %v7360_v44  ;;  %v7467_v23 = vpop.f32.mrb[187].mxu0  ;;  %v8589_v50 = vld [vmem:[#allocation4 + $0x30] sm:$0xff]  }
 0x356   : > { %v10572_v49 = vadd.f32 %v7465_v2, %v7353_v22  ;;  %v7468_v6 = vadd.f32 %v7467_v23, %v7466_v12  ;;  %8308 = vmatmul.mubr.bf16.gmra.mrb[40].mxu1 %v10471_v17 }
 0x357   : > { %8311 = vmatprep.mubr.bf16.mxu1 %v10532_v62 }
 0x358   : > { %v10576_v45 = vadd.f32 %v7468_v6, %v7356_v26 }
 0x359   : > { %v7363_v33 = vpop.f32.mrb[192].mxu1 }
 0x35a   : > { %v7469_v58 = vpop.f32.mrb[188].mxu0  ;;  %v7364_v20 = vpop.f32.mrb[193].mxu1 }
 0x35b   : > { %v7365_v54 = vadd.f32 %v7364_v20, %v7363_v33  ;;  %v7470_v24 = vpop.f32.mrb[189].mxu0  ;;  %v7366_v11 = vpop.f32.mrb[194].mxu1 }
 0x35c   : > { %v7471_v1 = vadd.f32 %v7470_v24, %v7469_v58  ;;  %v7472_v38 = vpop.f32.mrb[190].mxu0  ;;  %v7367_v10 = vpop.f32.mrb[195].mxu1 }
 0x35d   : > { %v7368_v17 = vadd.f32 %v7367_v10, %v7366_v11  ;;  %v7473_v62 = vpop.f32.mrb[191].mxu0 }
 0x35e   : > { %v10578_v13 = vadd.f32 %v7471_v1, %v7359_v7  ;;  %v7474_v27 = vadd.f32 %v7473_v62, %v7472_v38  ;;  %8312 = vmatmul.mubr.bf16.gmra.mrb[44].mxu1 %v2971_v53  ;;  %v8588_v7 = vld [vmem:[#allocation4 + $0x70] sm:$0xff]   ;;  %v8591_v38 = vld [vmem:[#allocation4 + $0x80] sm:$0xff]  }
 0x35f   : > { %7759 = vmatprep.subr.bf16.mxu0 %v8588_v7  ;;  %7860 = vmatpush3.bf16.msra.mxu1 %v8591_v38  ;;  %v8599_v38 = vld [vmem:[#allocation4 + $0x98] sm:$0xff]  }
 0x360   : > { %v10580_v22 = vadd.f32 %v7474_v27, %v7362_v0  ;;  %7760 = vmatpush3.bf16.msra.mxu0 %v8589_v50 }
 0x361   : > { %v7369_v60 = vpop.f32.mrb[196].mxu1 }
 0x362   : > { %v7475_v3 = vpop.f32.mrb[192].mxu0  ;;  %v7370_v41 = vpop.f32.mrb[197].mxu1 }
 0x363   : > { %v7371_v28 = vadd.f32 %v7370_v41, %v7369_v60  ;;  %v7476_v63 = vpop.f32.mrb[193].mxu0  ;;  %v7372_v40 = vpop.f32.mrb[198].mxu1 }
 0x364   : > { %v7477_v26 = vadd.f32 %v7476_v63, %v7475_v3  ;;  %v7478_v47 = vpop.f32.mrb[194].mxu0  ;;  %v7373_v43 = vpop.f32.mrb[199].mxu1 }
 0x365   : > { %v7374_v32 = vadd.f32 %v7373_v43, %v7372_v40  ;;  %v7479_v31 = vpop.f32.mrb[195].mxu0  ;;  %v8594_v43 = vld [vmem:[#allocation4 + $0x78] sm:$0xff]  }
 0x366   : > { %v10582_v9 = vadd.f32 %v7477_v26, %v7365_v54  ;;  %v7480_v39 = vadd.f32 %v7479_v31, %v7478_v47  ;;  %v8592_v26 = vld [vmem:[#allocation4 + $0xc8] sm:$0xff]   ;;  %v8595_v31 = vld [vmem:[#allocation4 + $0xd0] sm:$0xff]   ;;  %7761 = vmatprep.subr.bf16.mxu0 %v8594_v43  ;;  %v8601_v43 = vld [vmem:[#allocation4 + $0xa0] sm:$0xff]  }
 0x367   : > { %v8593_v47 = vld [vmem:[#allocation4 + $0x88] sm:$0xff]   ;;  %7861 = vmatprep.subr.bf16.mxu1 %v8592_v26  ;;  %v8600_v26 = vld [vmem:[#allocation4 + $0xe0] sm:$0xff]  }
 0x368   : > { %v10584_v29 = vadd.f32 %v7480_v39, %v7368_v17  ;;  %7862 = vmatpush3.bf16.msra.mxu1 %v8593_v47 }
 0x369   : > { %v7375_v44 = vpop.f32.mrb[200].mxu1  ;;  %7863 = vmatprep.subr.bf16.mxu1 %v8595_v31 }
 0x36a   : > { %v7481_v2 = vpop.f32.mrb[196].mxu0  ;;  %v7376_v12 = vpop.f32.mrb[201].mxu1 }
 0x36b   : > { %v7377_v0 = vadd.f32 %v7376_v12, %v7375_v44  ;;  %v7482_v23 = vpop.f32.mrb[197].mxu0  ;;  %v7378_v6 = vpop.f32.mrb[202].mxu1 }
 0x36c   : > { %v7483_v8 = vadd.f32 %v7482_v23, %v7481_v2  ;;  %v7484_v37 = vpop.f32.mrb[198].mxu0  ;;  %v7379_v36 = vpop.f32.mrb[203].mxu1 }
 0x36d   : > { %v7380_v33 = vadd.f32 %v7379_v36, %v7378_v6  ;;  %v7485_v58 = vpop.f32.mrb[199].mxu0 }
 0x36e   : > { %v10586_v20 = vadd.f32 %v7483_v8, %v7371_v28  ;;  %v7486_v53 = vadd.f32 %v7485_v58, %v7484_v37 }
 0x370   : > { %v10588_v54 = vadd.f32 %v7486_v53, %v7374_v32 }
 0x371   : > { %v7381_v24 = vpop.f32.mrb[204].mxu1 }
 0x372   : > { %v7487_v11 = vpop.f32.mrb[200].mxu0  ;;  %v7382_v1 = vpop.f32.mrb[205].mxu1 }
 0x373   : > { %v7383_v10 = vadd.f32 %v7382_v1, %v7381_v24  ;;  %v7488_v17 = vpop.f32.mrb[201].mxu0  ;;  %v7384_v62 = vpop.f32.mrb[206].mxu1 }
 0x374   : > { %v7489_v27 = vadd.f32 %v7488_v17, %v7487_v11  ;;  %v7490_v60 = vpop.f32.mrb[202].mxu0  ;;  %v7385_v3 = vpop.f32.mrb[207].mxu1  ;;  %v8598_v11 = vld [vmem:[#allocation4 + $0xd8] sm:$0xff]  }
 0x375   : > { %v7386_v41 = vadd.f32 %v7385_v3, %v7384_v62  ;;  %v7491_v63 = vpop.f32.mrb[203].mxu0 }
 0x376   : > { %v10590_v28 = vadd.f32 %v7489_v27, %v7377_v0  ;;  %v7492_v40 = vadd.f32 %v7491_v63, %v7490_v60  ;;  %v8596_v27 = vld [vmem:[#allocation4 + $0x38] sm:$0xff]  }
 0x377   : > { %7762 = vmatpush3.bf16.msra.mxu0 %v8596_v27  ;;  %v8606_v27 = vld [vmem:[#allocation4 + $0xb0] sm:$0xff]  }
 0x378   : > { %v10592_v32 = vadd.f32 %v7492_v40, %v7380_v33  ;;  %v8597_v33 = vld [vmem:[#allocation4 + $0x90] sm:$0xff]  }
 0x379   : > { %v7515_v39 = vpop.f32.mrb[208].mxu1  ;;  %7864 = vmatpush3.bf16.msra.mxu1 %v8597_v33 }
 0x37a   : > { %v7493_v7 = vpop.f32.mrb[204].mxu0  ;;  %v7516_v44 = vpop.f32.mrb[209].mxu1  ;;  %7865 = vmatprep.subr.bf16.mxu1 %v8598_v11 }
 0x37b   : > { %v7494_v2 = vpop.f32.mrb[205].mxu0  ;;  %v7517_v12 = vadd.f32 %v7516_v44, %v7515_v39  ;;  %v7518_v50 = vpop.f32.mrb[210].mxu1  ;;  %v4495_v44 = vld [vmem:[#allocation2 + $0x7] sm:$0xff] }
 0x37c   : > { %v7495_v23 = vadd.f32 %v7494_v2, %v7493_v7  ;;  %v7496_v0 = vpop.f32.mrb[206].mxu0  ;;  %v7519_v6 = vpop.f32.mrb[211].mxu1  ;;  %v4496_v2 = vld [vmem:[#allocation2 + $0xf] sm:$0xff] }
 0x37d   : > { %v3905_v8 = vadd.f32 %v7517_v12, %v10519_v42  ;;  %v7497_v37 = vpop.f32.mrb[207].mxu0  ;;  %v7520_v36 = vadd.f32 %v7519_v6, %v7518_v50  ;;  %7866 = vmatpush3.bf16.msra.mxu1 %v8599_v38  ;;  %v8602_v50 = vld [vmem:[#allocation4 + $0xe8] sm:$0xff]  }
 0x37e   : > { %v10595_v58 = vadd.f32 %v7495_v23, %v7383_v10  ;;  %v7498_v53 = vadd.f32 %v7497_v37, %v7496_v0  ;;  %7867 = vmatprep.subr.bf16.mxu1 %v8600_v26  ;;  %v4527_v23 = vpack.c.bf16 %v4496_v2, %v4495_v44 }
 0x37f   : > { %v3908_v55 = vadd.f32 %v7520_v36, %v10524_v4 }
 0x380   : > { %v10598_v24 = vadd.f32 %v7498_v53, %v7386_v41  ;;  %5536 = vmatmul.mubr.bf16.vlgmr.msra.gmra.mrb[16].mxu0 %v4527_v23 }
 0x381   : > { %v7521_v1 = vpop.f32.mrb[212].mxu1  ;;  %7868 = vmatpush3.bf16.msra.mxu1 %v8601_v43 }
 0x382   : > { %v7627_v17 = vpop.f32.mrb[208].mxu0  ;;  %v7522_v62 = vpop.f32.mrb[213].mxu1  ;;  %7869 = vmatprep.subr.bf16.mxu1 %v8602_v50 }
 0x383   : > { %v7523_v60 = vadd.f32 %v7522_v62, %v7521_v1  ;;  %v7628_v42 = vpop.f32.mrb[209].mxu0  ;;  %v7524_v3 = vpop.f32.mrb[214].mxu1  ;;  %v8604_v1 = vld [vmem:[#allocation4 + $0xf0] sm:$0xff]   ;;  %v8605_v62 = vld [vmem:[#allocation4 + $0x140] sm:$0xff]  }
 0x384   : > { %v7629_v63 = vadd.f32 %v7628_v42, %v7627_v17  ;;  %v7630_v10 = vpop.f32.mrb[210].mxu0  ;;  %v7525_v40 = vpop.f32.mrb[215].mxu1  ;;  %7971 = vmatprep.subr.bf16.mxu0 %v8605_v62 }
 0x385   : > { %v3913_v4 = vadd.f32 %v7523_v60, %v10526_v35  ;;  %v7526_v41 = vadd.f32 %v7525_v40, %v7524_v3  ;;  %v7631_v47 = vpop.f32.mrb[211].mxu0  ;;  %v8603_v35 = vld [vmem:[#allocation4 + $0xa8] sm:$0xff]   ;;  %v8609_v40 = vld [vmem:[#allocation4 + $0xb8] sm:$0xff]  }
 0x386   : > { %v7632_v31 = vadd.f32 %v7631_v47, %v7630_v10  ;;  %v10601_v39 = vadd.f32 %v7629_v63, %v3905_v8  ;;  %7870 = vmatpush3.bf16.msra.mxu1 %v8603_v35  ;;  %v8608_v63 = vld [vmem:[#allocation4 + $0xf8] sm:$0xff]  }
 0x387   : > { %v3916_v7 = vadd.f32 %v7526_v41, %v10530_v30  ;;  %7871 = vmatprep.subr.bf16.mxu1 %v8604_v1 }
 0x388   : > { %v10604_v12 = vadd.f32 %v7632_v31, %v3908_v55 }
 0x389   : > { %v7527_v0 = vpop.f32.mrb[216].mxu1 }
 0x38a   : > { %v7633_v6 = vpop.f32.mrb[212].mxu0  ;;  %v7528_v37 = vpop.f32.mrb[217].mxu1  ;;  %7872 = vmatpush3.bf16.msra.mxu1 %v8606_v27  ;;  %v8610_v27 = vld [vmem:[#allocation4 + $0x148] sm:$0xff]  }
 0x38b   : > { %v7529_v8 = vadd.f32 %v7528_v37, %v7527_v0  ;;  %v7634_v36 = vpop.f32.mrb[213].mxu0  ;;  %v7530_v33 = vpop.f32.mrb[218].mxu1  ;;  %7873 = vmatprep.subr.bf16.mxu1 %v8608_v63 }
 0x38c   : > { %v7635_v30 = vadd.f32 %v7634_v36, %v7633_v6  ;;  %v7636_v53 = vpop.f32.mrb[214].mxu0  ;;  %v7531_v11 = vpop.f32.mrb[219].mxu1 }
 0x38d   : > { %v3921_v55 = vadd.f32 %v7529_v8, %v10534_v5  ;;  %v7532_v38 = vadd.f32 %v7531_v11, %v7530_v33  ;;  %v7637_v17 = vpop.f32.mrb[215].mxu0  ;;  %v8607_v5 = vld [vmem:[#allocation4 + $0x100] sm:$0xff]  }
 0x38e   : > { %v7638_v14 = vadd.f32 %v7637_v17, %v7636_v53  ;;  %v10608_v60 = vadd.f32 %v7635_v30, %v3913_v4  ;;  %7874 = vmatpush3.bf16.msra.mxu1 %v8609_v40  ;;  %7972 = vmatpush3.bf16.msra.mxu0 %v8607_v5 }
 0x38f   : > { %v3924_v42 = vadd.f32 %v7532_v38, %v10538_v61  ;;  %7973 = vmatprep.subr.bf16.mxu0 %v8610_v27 }
 0x390   : > { %v10611_v3 = vadd.f32 %v7638_v14, %v3916_v7 }
 0x391   : > { %v7533_v10 = vpop.f32.mrb[220].mxu1 }
 0x392   : > { %v7639_v26 = vpop.f32.mrb[216].mxu0  ;;  %v7534_v41 = vpop.f32.mrb[221].mxu1 }
 0x393   : > { %v7535_v47 = vadd.f32 %v7534_v41, %v7533_v10  ;;  %v7640_v43 = vpop.f32.mrb[217].mxu0  ;;  %v7536_v31 = vpop.f32.mrb[222].mxu1 }
 0x394   : > { %v7641_v4 = vadd.f32 %v7640_v43, %v7639_v26  ;;  %v7642_v44 = vpop.f32.mrb[218].mxu0  ;;  %v7537_v2 = vpop.f32.mrb[223].mxu1  ;;  %v8611_v26 = vld [vmem:[#allocation4 + $0x108] sm:$0xff]  }
 0x395   : > { %v3929_v61 = vadd.f32 %v7535_v47, %v10542_v51  ;;  %v7538_v50 = vadd.f32 %v7537_v2, %v7536_v31  ;;  %v7643_v7 = vpop.f32.mrb[219].mxu0  ;;  %7974 = vmatpush3.bf16.msra.mxu0 %v8611_v26 }
 0x396   : > { %v7644_v23 = vadd.f32 %v7643_v7, %v7642_v44  ;;  %v10614_v0 = vadd.f32 %v7641_v4, %v3921_v55 }
 0x397   : > { %v3932_v35 = vadd.f32 %v7538_v50, %v10546_v59 }
 0x398   : > { %v10617_v6 = vadd.f32 %v7644_v23, %v3924_v42 }
 0x399   : > { %v7539_v37 = vpop.f32.mrb[224].mxu1 }
 0x39a   : > { %v7645_v8 = vpop.f32.mrb[220].mxu0  ;;  %v7540_v36 = vpop.f32.mrb[225].mxu1 }
 0x39b   : > { %v7541_v33 = vadd.f32 %v7540_v36, %v7539_v37  ;;  %v7646_v30 = vpop.f32.mrb[221].mxu0  ;;  %v7542_v53 = vpop.f32.mrb[226].mxu1 }
 0x39c   : > { %v7647_v11 = vadd.f32 %v7646_v30, %v7645_v8  ;;  %v7648_v1 = vpop.f32.mrb[222].mxu0  ;;  %v7543_v38 = vpop.f32.mrb[227].mxu1 }
 0x39d   : > { %v3937_v51 = vadd.f32 %v7541_v33, %v10548_v19  ;;  %v7544_v17 = vadd.f32 %v7543_v38, %v7542_v53  ;;  %v7649_v62 = vpop.f32.mrb[223].mxu0 }
 0x39e   : > { %v7650_v55 = vadd.f32 %v7649_v62, %v7648_v1  ;;  %v10620_v14 = vadd.f32 %v7647_v11, %v3929_v61 }
 0x39f   : > { %v3940_v59 = vadd.f32 %v7544_v17, %v10550_v57  ;;  %v8612_v17 = vld [vmem:[#allocation4 + $0x150] sm:$0xff]  }
 0x3a0   : > { %v10623_v42 = vadd.f32 %v7650_v55, %v3932_v35  ;;  %7975 = vmatprep.subr.bf16.mxu0 %v8612_v17 }
 0x3a1   : > { %v7545_v63 = vpop.f32.mrb[228].mxu1 }
 0x3a2   : > { %v7651_v10 = vpop.f32.mrb[224].mxu0  ;;  %v7546_v40 = vpop.f32.mrb[229].mxu1 }
 0x3a3   : > { %v7547_v41 = vadd.f32 %v7546_v40, %v7545_v63  ;;  %v7652_v5 = vpop.f32.mrb[225].mxu0  ;;  %v7548_v47 = vpop.f32.mrb[230].mxu1 }
 0x3a4   : > { %v7653_v43 = vadd.f32 %v7652_v5, %v7651_v10  ;;  %v7654_v19 = vpop.f32.mrb[226].mxu0  ;;  %v7549_v31 = vpop.f32.mrb[231].mxu1  ;;  %v8613_v10 = vld [vmem:[#allocation4 + $0x110] sm:$0xff]  }
 0x3a5   : > { %v3945_v4 = vadd.f32 %v7547_v41, %v10552_v18  ;;  %v7550_v44 = vadd.f32 %v7549_v31, %v7548_v47  ;;  %v7655_v2 = vpop.f32.mrb[227].mxu0  ;;  %7976 = vmatpush3.bf16.msra.mxu0 %v8613_v10 }
 0x3a6   : > { %v7656_v61 = vadd.f32 %v7655_v2, %v7654_v19  ;;  %v10626_v57 = vadd.f32 %v7653_v43, %v3937_v51 }
 0x3a7   : > { %v3948_v50 = vadd.f32 %v7550_v44, %v10554_v34 }
 0x3a8   : > { %v10629_v7 = vadd.f32 %v7656_v61, %v3940_v59 }
 0x3a9   : > { %v7551_v23 = vpop.f32.mrb[232].mxu1 }
 0x3aa   : > { %v7657_v35 = vpop.f32.mrb[228].mxu0  ;;  %v7552_v37 = vpop.f32.mrb[233].mxu1 }
 0x3ab   : > { %v7553_v8 = vadd.f32 %v7552_v37, %v7551_v23  ;;  %v7658_v36 = vpop.f32.mrb[229].mxu0  ;;  %v7554_v33 = vpop.f32.mrb[234].mxu1 }
 0x3ac   : > { %v7659_v30 = vadd.f32 %v7658_v36, %v7657_v35  ;;  %v7660_v53 = vpop.f32.mrb[230].mxu0  ;;  %v7555_v11 = vpop.f32.mrb[235].mxu1 }
 0x3ad   : > { %v3953_v18 = vadd.f32 %v7553_v8, %v10556_v56  ;;  %v7556_v1 = vadd.f32 %v7555_v11, %v7554_v33  ;;  %v7661_v38 = vpop.f32.mrb[231].mxu0 }
 0x3ae   : > { %v7662_v51 = vadd.f32 %v7661_v38, %v7660_v53  ;;  %v10632_v62 = vadd.f32 %v7659_v30, %v3945_v4 }
 0x3af   : > { %v3956_v34 = vadd.f32 %v7556_v1, %v10558_v52  ;;  %v8614_v1 = vld [vmem:[#allocation4 + $0x158] sm:$0xff]  }
 0x3b0   : > { %v10635_v27 = vadd.f32 %v7662_v51, %v3948_v50  ;;  %7977 = vmatprep.subr.bf16.mxu0 %v8614_v1 }
 0x3b1   : > { %v7557_v55 = vpop.f32.mrb[236].mxu1 }
 0x3b2   : > { %v7663_v59 = vpop.f32.mrb[232].mxu0  ;;  %v7558_v63 = vpop.f32.mrb[237].mxu1 }
 0x3b3   : > { %v7559_v40 = vadd.f32 %v7558_v63, %v7557_v55  ;;  %v7664_v26 = vpop.f32.mrb[233].mxu0  ;;  %v7560_v41 = vpop.f32.mrb[238].mxu1 }
 0x3b4   : > { %v7665_v5 = vadd.f32 %v7664_v26, %v7663_v59  ;;  %v7666_v56 = vpop.f32.mrb[234].mxu0  ;;  %v7561_v47 = vpop.f32.mrb[239].mxu1 }
 0x3b5   : > { %v3961_v43 = vadd.f32 %v7559_v40, %v10560_v25  ;;  %v7562_v19 = vadd.f32 %v7561_v47, %v7560_v41  ;;  %v7667_v31 = vpop.f32.mrb[235].mxu0 }
 0x3b6   : > { %v7668_v4 = vadd.f32 %v7667_v31, %v7666_v56  ;;  %v10638_v52 = vadd.f32 %v7665_v5, %v3953_v18  ;;  %v8615_v18 = vld [vmem:[#allocation4 + $0x118] sm:$0xff]  }
 0x3b7   : > { %v3964_v44 = vadd.f32 %v7562_v19, %v10562_v46  ;;  %7978 = vmatpush3.bf16.msra.mxu0 %v8615_v18 }
 0x3b8   : > { %v10641_v2 = vadd.f32 %v7668_v4, %v3956_v34  ;;  %v8616_v4 = vld [vmem:[#allocation4 + $0x160] sm:$0xff]  }
 0x3b9   : > { %v7563_v61 = vpop.f32.mrb[240].mxu1  ;;  %7979 = vmatprep.subr.bf16.mxu0 %v8616_v4 }
 0x3ba   : > { %v7669_v50 = vpop.f32.mrb[236].mxu0  ;;  %v7564_v23 = vpop.f32.mrb[241].mxu1 }
 0x3bb   : > { %v7565_v35 = vadd.f32 %v7564_v23, %v7563_v61  ;;  %v7670_v37 = vpop.f32.mrb[237].mxu0  ;;  %v7566_v8 = vpop.f32.mrb[242].mxu1 }
 0x3bc   : > { %v7671_v36 = vadd.f32 %v7670_v37, %v7669_v50  ;;  %v7672_v33 = vpop.f32.mrb[238].mxu0  ;;  %v7567_v30 = vpop.f32.mrb[243].mxu1  ;;  %v8618_v50 = vld [vmem:[#allocation4 + $0x120] sm:$0xff]  }
 0x3bd   : > { %v3969_v25 = vadd.f32 %v7565_v35, %v10564_v15  ;;  %v7568_v53 = vadd.f32 %v7567_v30, %v7566_v8  ;;  %v7673_v11 = vpop.f32.mrb[239].mxu0  ;;  %7980 = vmatpush3.bf16.msra.mxu0 %v8618_v50 }
 0x3be   : > { %v7674_v38 = vadd.f32 %v7673_v11, %v7672_v33  ;;  %v10644_v17 = vadd.f32 %v7671_v36, %v3961_v43 }
 0x3bf   : > { %v3972_v46 = vadd.f32 %v7568_v53, %v10566_v48 }
 0x3c0   : > { %v10647_v51 = vadd.f32 %v7674_v38, %v3964_v44  ;;  %v8617_v44 = vld [vmem:[#allocation4 + $0x1c0] sm:$0xff]  }
 0x3c1   : > { %v7569_v34 = vpop.f32.mrb[244].mxu1  ;;  %8083 = vmatprep.subr.bf16.mxu1 %v8617_v44  ;;  %v8622_v44 = vld [vmem:[#allocation4 + $0x128] sm:$0xff]  }
 0x3c2   : > { %v7675_v55 = vpop.f32.mrb[240].mxu0  ;;  %v7570_v59 = vpop.f32.mrb[245].mxu1 }
 0x3c3   : > { %v7571_v63 = vadd.f32 %v7570_v59, %v7569_v34  ;;  %v7676_v10 = vpop.f32.mrb[241].mxu0  ;;  %v7572_v40 = vpop.f32.mrb[246].mxu1 }
 0x3c4   : > { %v7677_v15 = vadd.f32 %v7676_v10, %v7675_v55  ;;  %v7678_v26 = vpop.f32.mrb[242].mxu0  ;;  %v7573_v41 = vpop.f32.mrb[247].mxu1 }
 0x3c5   : > { %v3977_v5 = vadd.f32 %v7571_v63, %v10568_v16  ;;  %v7574_v56 = vadd.f32 %v7573_v41, %v7572_v40  ;;  %v7679_v47 = vpop.f32.mrb[243].mxu0 }
 0x3c6   : > { %v7680_v43 = vadd.f32 %v7679_v47, %v7678_v26  ;;  %v10650_v19 = vadd.f32 %v7677_v15, %v3969_v25 }
 0x3c7   : > { %v3980_v48 = vadd.f32 %v7574_v56, %v10570_v21 }
 0x3c8   : > { %v10653_v31 = vadd.f32 %v7680_v43, %v3972_v46 }
 0x3c9   : > { %v7575_v61 = vpop.f32.mrb[248].mxu1 }
 0x3ca   : > { %v7681_v23 = vpop.f32.mrb[244].mxu0  ;;  %v7576_v35 = vpop.f32.mrb[249].mxu1 }
 0x3cb   : > { %v7577_v37 = vadd.f32 %v7576_v35, %v7575_v61  ;;  %v7682_v8 = vpop.f32.mrb[245].mxu0  ;;  %v7578_v16 = vpop.f32.mrb[250].mxu1 }
 0x3cc   : > { %v7683_v36 = vadd.f32 %v7682_v8, %v7681_v23  ;;  %v7684_v33 = vpop.f32.mrb[246].mxu0  ;;  %v7579_v30 = vpop.f32.mrb[251].mxu1 }
 0x3cd   : > { %v3985_v25 = vadd.f32 %v7577_v37, %v10572_v49  ;;  %v7580_v21 = vadd.f32 %v7579_v30, %v7578_v16  ;;  %v7685_v53 = vpop.f32.mrb[247].mxu0 }
 0x3ce   : > { %v7686_v11 = vadd.f32 %v7685_v53, %v7684_v33  ;;  %v10656_v1 = vadd.f32 %v7683_v36, %v3977_v5 }
 0x3cf   : > { %v3988_v18 = vadd.f32 %v7580_v21, %v10576_v45 }
 0x3d0   : > { %v10659_v38 = vadd.f32 %v7686_v11, %v3980_v48  ;;  %v8620_v48 = vld [vmem:[#allocation4 + $0x168] sm:$0xff]  }
 0x3d1   : > { %v7581_v46 = vpop.f32.mrb[252].mxu1  ;;  %7981 = vmatprep.subr.bf16.mxu0 %v8620_v48  ;;  %v8626_v48 = vld [vmem:[#allocation4 + $0x130] sm:$0xff]  }
 0x3d2   : > { %v7687_v34 = vpop.f32.mrb[248].mxu0  ;;  %v7582_v55 = vpop.f32.mrb[253].mxu1  ;;  %7982 = vmatpush3.bf16.msra.mxu0 %v8622_v44 }
 0x3d3   : > { %v7583_v59 = vadd.f32 %v7582_v55, %v7581_v46  ;;  %v7688_v63 = vpop.f32.mrb[249].mxu0  ;;  %v7584_v10 = vpop.f32.mrb[254].mxu1 }
 0x3d4   : > { %v7689_v40 = vadd.f32 %v7688_v63, %v7687_v34  ;;  %v7690_v15 = vpop.f32.mrb[250].mxu0  ;;  %v7585_v26 = vpop.f32.mrb[255].mxu1 }
 0x3d5   : > { %v3993_v49 = vadd.f32 %v7583_v59, %v10578_v13  ;;  %v7586_v41 = vadd.f32 %v7585_v26, %v7584_v10  ;;  %v7691_v56 = vpop.f32.mrb[251].mxu0 }
 0x3d6   : > { %v7692_v47 = vadd.f32 %v7691_v56, %v7690_v15  ;;  %v10662_v5 = vadd.f32 %v7689_v40, %v3985_v25 }
 0x3d7   : > { %v3996_v45 = vadd.f32 %v7586_v41, %v10580_v22 }
 0x3d8   : > { %v10665_v43 = vadd.f32 %v7692_v47, %v3988_v18  ;;  %v8624_v47 = vld [vmem:[#allocation4 + $0x170] sm:$0xff]  }
 0x3d9   : > { %v7587_v4 = vpop.f32.mrb[0].mxu1  ;;  %7983 = vmatprep.subr.bf16.mxu0 %v8624_v47  ;;  %v10694_v47 = vld [vmem:[%s11303_s5] ss:$0 sm:$0xff] }
 0x3da   : > { %v7693_v61 = vpop.f32.mrb[252].mxu0  ;;  %v7588_v50 = vpop.f32.mrb[1].mxu1  ;;  %7984 = vmatpush3.bf16.msra.mxu0 %v8626_v48 }
 0x3db   : > { %v7589_v23 = vadd.f32 %v7588_v50, %v7587_v4  ;;  %v7694_v35 = vpop.f32.mrb[253].mxu0  ;;  %v7590_v37 = vpop.f32.mrb[2].mxu1 }
 0x3dc   : > { %v7695_v13 = vadd.f32 %v7694_v35, %v7693_v61  ;;  %v7696_v8 = vpop.f32.mrb[254].mxu0  ;;  %v7591_v16 = vpop.f32.mrb[3].mxu1 }
 0x3dd   : > { %v4001_v36 = vadd.f32 %v7589_v23, %v10582_v9  ;;  %v7592_v33 = vadd.f32 %v7591_v16, %v7590_v37  ;;  %v7697_v30 = vpop.f32.mrb[255].mxu0 }
 0x3de   : > { %v7698_v22 = vadd.f32 %v7697_v30, %v7696_v8  ;;  %v10668_v25 = vadd.f32 %v7695_v13, %v3993_v49 }
 0x3df   : > { %v4004_v21 = vadd.f32 %v7592_v33, %v10584_v29 }
 0x3e0   : > { %v10671_v53 = vadd.f32 %v7698_v22, %v3996_v45 }
 0x3e1   : > { %v7593_v11 = vpop.f32.mrb[4].mxu1 }
 0x3e2   : > { %v7699_v18 = vpop.f32.mrb[0].mxu0  ;;  %v7594_v46 = vpop.f32.mrb[5].mxu1 }
 0x3e3   : > { %v7595_v34 = vadd.f32 %v7594_v46, %v7593_v11  ;;  %v7700_v55 = vpop.f32.mrb[1].mxu0  ;;  %v7596_v59 = vpop.f32.mrb[6].mxu1 }
 0x3e4   : > { %v7701_v63 = vadd.f32 %v7700_v55, %v7699_v18  ;;  %v7702_v10 = vpop.f32.mrb[2].mxu0  ;;  %v7597_v40 = vpop.f32.mrb[7].mxu1 }
 0x3e5   : > { %v4009_v9 = vadd.f32 %v7595_v34, %v10586_v20  ;;  %v7598_v15 = vadd.f32 %v7597_v40, %v7596_v59  ;;  %v7703_v26 = vpop.f32.mrb[3].mxu0 }
 0x3e6   : > { %v7704_v41 = vadd.f32 %v7703_v26, %v7702_v10  ;;  %v10674_v49 = vadd.f32 %v7701_v63, %v4001_v36 }
 0x3e7   : > { %v4012_v29 = vadd.f32 %v7598_v15, %v10588_v54 }
 0x3e8   : > { %v10677_v56 = vadd.f32 %v7704_v41, %v4004_v21  ;;  %v8628_v41 = vld [vmem:[#allocation4 + $0x178] sm:$0xff]  }
 0x3e9   : > { %v7599_v45 = vpop.f32.mrb[8].mxu1  ;;  %7985 = vmatprep.subr.bf16.mxu0 %v8628_v41 }
 0x3ea   : > { %v7705_v4 = vpop.f32.mrb[4].mxu0  ;;  %v7600_v44 = vpop.f32.mrb[9].mxu1 }
 0x3eb   : > { %v7601_v61 = vadd.f32 %v7600_v44, %v7599_v45  ;;  %v7706_v50 = vpop.f32.mrb[5].mxu0  ;;  %v7602_v23 = vpop.f32.mrb[10].mxu1  ;;  %v8630_v45 = vld [vmem:[#allocation4 + $0x138] sm:$0xff]   ;;  %v10700_v44 = vld [vmem:[%s11304_s6] ss:$0 sm:$0xff] }
 0x3ec   : > { %v7707_v20 = vadd.f32 %v7706_v50, %v7705_v4  ;;  %v7708_v35 = vpop.f32.mrb[6].mxu0  ;;  %v7603_v37 = vpop.f32.mrb[11].mxu1  ;;  %7986 = vmatpush3.bf16.msra.mxu0 %v8630_v45 }
 0x3ed   : > { %v4017_v13 = vadd.f32 %v7601_v61, %v10590_v28  ;;  %v7604_v8 = vadd.f32 %v7603_v37, %v7602_v23  ;;  %v7709_v16 = vpop.f32.mrb[7].mxu0 }
 0x3ee   : > { %v7710_v54 = vadd.f32 %v7709_v16, %v7708_v35  ;;  %v10680_v36 = vadd.f32 %v7707_v20, %v4009_v9 }
 0x3ef   : > { %v4020_v33 = vadd.f32 %v7604_v8, %v10592_v32 }
 0x3f0   : > { %v10683_v30 = vadd.f32 %v7710_v54, %v4012_v29 }
 0x3f1   : > { %v7605_v22 = vpop.f32.mrb[12].mxu1 }
 0x3f2   : > { %v7711_v21 = vpop.f32.mrb[8].mxu0  ;;  %v7606_v11 = vpop.f32.mrb[13].mxu1 }
 0x3f3   : > { %v7607_v18 = vadd.f32 %v7606_v11, %v7605_v22  ;;  %v7712_v46 = vpop.f32.mrb[9].mxu0  ;;  %v7608_v34 = vpop.f32.mrb[14].mxu1 }
 0x3f4   : > { %v7713_v55 = vadd.f32 %v7712_v46, %v7711_v21  ;;  %v7714_v59 = vpop.f32.mrb[10].mxu0  ;;  %v7609_v63 = vpop.f32.mrb[15].mxu1 }
 0x3f5   : > { %v4025_v28 = vadd.f32 %v7607_v18, %v10595_v58  ;;  %v7610_v10 = vadd.f32 %v7609_v63, %v7608_v34  ;;  %v7715_v40 = vpop.f32.mrb[11].mxu0 }
 0x3f6   : > { %v7716_v15 = vadd.f32 %v7715_v40, %v7714_v59  ;;  %v10686_v9 = vadd.f32 %v7713_v55, %v4017_v13 }
 0x3f7   : > { %v4028_v32 = vadd.f32 %v7610_v10, %v10598_v24 }
 0x3f8   : > { %v10689_v26 = vadd.f32 %v7716_v15, %v4020_v33 }
 0x3f9   : > { %v8285_v29 = vpop.f32.mrb[16].mxu1 }
 0x3fa   : > { %v7717_v48 = vpop.f32.mrb[12].mxu0  ;;  %v4235_v58 = vadd.f32 %v8285_v29, %v10608_v60  ;;  %v4226_v4 = vpop.f32.mrb[17].mxu1 }
 0x3fb   : > { %v7718_v24 = vpop.f32.mrb[13].mxu0  ;;  %v4227_v61 = vadd.f32 %v4226_v4, %v10601_v39  ;;  %v8286_v50 = vpop.f32.mrb[18].mxu1 }
 0x3fc   : > { %v4362_v23 = vmul.f32 %v10694_v47, %v4235_v58  ;;  %v7719_v20 = vadd.f32 %v7718_v24, %v7717_v48  ;;  %v7720_v35 = vpop.f32.mrb[14].mxu0  ;;  %v4238_v37 = vadd.f32 %v8286_v50, %v10611_v3  ;;  %v4229_v13 = vpop.f32.mrb[19].mxu1 }
 0x3fd   : > { %v4360_v60 = vmul.f32 %v10694_v47, %v4227_v61  ;;  %v7721_v8 = vpop.f32.mrb[15].mxu0  ;;  %v4230_v16 = vadd.f32 %v4229_v13, %v10604_v12  ;;  %v4592_v13 = vld [vmem:[#allocation2 + $0x11] sm:$0xff] }
 0x3fe   : > { %v4401_v54 = vadd.f32 %v10700_v44, %v4362_v23  ;;  %v4363_v33 = vmul.f32 %v10694_v47, %v4238_v37  ;;  %v7722_v22 = vadd.f32 %v7721_v8, %v7720_v35  ;;  %v10709_v39 = vadd.f32 %v7719_v20, %v4025_v28  ;;  %v10728_v23 = vld [vmem:[#allocation4 + $0x200] sm:$0xff]  }
 0x3ff   : > { %v4399_v21 = vadd.f32 %v10700_v44, %v4360_v60  ;;  %v4361_v11 = vmul.f32 %v10694_v47, %v4230_v16  ;;  %8315 = vmatprep.subr.bf16.mxu0 %v10728_v23 }
 0x400   : > { %v4433_v18 = vmax.f32 %v4401_v54, 0.0  ;;  %v4402_v3 = vadd.f32 %v10700_v44, %v4363_v33  ;;  %v10714_v46 = vadd.f32 %v7722_v22, %v4028_v32 }
 0x401   : > { %v4431_v34 = vmax.f32 %v4399_v21, 0.0  ;;  %v4400_v55 = vadd.f32 %v10700_v44, %v4361_v11  ;;  %v8289_v12 = vpop.f32.mrb[20].mxu1 }
 0x402   : > { %4465 = vst [vmem:[#allocation2 + $0x48] sm:$0xff] %v4433_v18  ;;  %v4434_v59 = vmax.f32 %v4402_v3, 0.0  ;;  %v4251_v63 = vadd.f32 %v8289_v12, %v10620_v14  ;;  %v4242_v10 = vpop.f32.mrb[21].mxu1 }
 0x403   : > { %4463 = vst [vmem:[#allocation2 + $0x28] sm:$0xff] %v4431_v34  ;;  %v4432_v28 = vmax.f32 %v4400_v55, 0.0  ;;  %v4243_v40 = vadd.f32 %v4242_v10, %v10614_v0  ;;  %v8290_v15 = vpop.f32.mrb[22].mxu1  ;;  %v8619_v10 = vld [vmem:[#allocation4 + $0x180] sm:$0xff]  }
 0x404   : > { %4466 = vst [vmem:[#allocation2 + $0x50] sm:$0xff] %v4434_v59  ;;  %v4366_v41 = vmul.f32 %v10694_v47, %v4251_v63  ;;  %v4254_v32 = vadd.f32 %v8290_v15, %v10623_v42  ;;  %v4245_v29 = vpop.f32.mrb[23].mxu1  ;;  %v4577_v45 = vpack.c.bf16 %v4434_v59, %v4433_v18 }
 0x405   : > { %4464 = vst [vmem:[#allocation2 + $0x30] sm:$0xff] %v4432_v28  ;;  %v4364_v48 = vmul.f32 %v10694_v47, %v4243_v40  ;;  %v4246_v58 = vadd.f32 %v4245_v29, %v10617_v6  ;;  %v4576_v4 = vpack.c.bf16 %v4432_v28, %v4431_v34  ;;  %v4591_v6 = vld [vmem:[#allocation2 + $0x9] sm:$0xff] }
 0x406   : > { %v4405_v14 = vadd.f32 %v10700_v44, %v4366_v41  ;;  %v4367_v24 = vmul.f32 %v10694_v47, %v4254_v32  ;;  %v4623_v55 = vpack.c.bf16 %v4592_v13, %v4591_v6 }
 0x407   : > { %v4403_v0 = vadd.f32 %v10700_v44, %v4364_v48  ;;  %v4365_v61 = vmul.f32 %v10694_v47, %v4246_v58  ;;  %5543 = vmatprep.mubr.bf16.mxu0 %v4576_v4 }
 0x408   : > { %v4437_v50 = vmax.f32 %v4405_v14, 0.0  ;;  %v4406_v42 = vadd.f32 %v10700_v44, %v4367_v24 }
 0x409   : > { %v4435_v20 = vmax.f32 %v4403_v0, 0.0  ;;  %v4404_v35 = vadd.f32 %v10700_v44, %v4365_v61  ;;  %v8293_v37 = vpop.f32.mrb[24].mxu1  ;;  %v4641_v40 = vld [vmem:[#allocation2 + $0x47] sm:$0xff] }
 0x40a   : > { %4469 = vst [vmem:[#allocation2 + $0x88] sm:$0xff] %v4437_v50  ;;  %v4438_v60 = vmax.f32 %v4406_v42, 0.0  ;;  %v4267_v8 = vadd.f32 %v8293_v37, %v10632_v62  ;;  %v4258_v16 = vpop.f32.mrb[25].mxu1  ;;  %v4639_v3 = vld [vmem:[#allocation2 + $0x27] sm:$0xff]  ;;  %v8625_v37 = vld [vmem:[#allocation4 + $0x1d0] sm:$0xff]  }
 0x40b   : > { %4467 = vst [vmem:[#allocation2 + $0x68] sm:$0xff] %v4435_v20  ;;  %v4436_v54 = vmax.f32 %v4404_v35, 0.0  ;;  %v4259_v33 = vadd.f32 %v4258_v16, %v10626_v57  ;;  %v8294_v22 = vpop.f32.mrb[26].mxu1  ;;  %v4642_v12 = vld [vmem:[#allocation2 + $0x4f] sm:$0xff] }
 0x40c   : > { %4470 = vst [vmem:[#allocation2 + $0x90] sm:$0xff] %v4438_v60  ;;  %v4370_v21 = vmul.f32 %v10694_v47, %v4267_v8  ;;  %v4270_v11 = vadd.f32 %v8294_v22, %v10635_v27  ;;  %v4261_v18 = vpop.f32.mrb[27].mxu1  ;;  %v4640_v34 = vld [vmem:[#allocation2 + $0x2f] sm:$0xff]  ;;  %v10740_v41 = vpack.c.bf16 %v4438_v60, %v4437_v50  ;;  %v10744_v48 = vpack.c.bf16 %v4642_v12, %v4641_v40 }
 0x40d   : > { %4468 = vst [vmem:[#allocation2 + $0x70] sm:$0xff] %v4436_v54  ;;  %v4368_v62 = vmul.f32 %v10694_v47, %v4259_v33  ;;  %v4262_v59 = vadd.f32 %v4261_v18, %v10629_v7  ;;  %v4671_v63 = vpack.c.bf16 %v4640_v34, %v4639_v3  ;;  %v4578_v15 = vpack.c.bf16 %v4436_v54, %v4435_v20  ;;  %v8621_v27 = vld [vmem:[#allocation4 + $0x1c8] sm:$0xff]   ;;  %v4594_v35 = vld [vmem:[#allocation2 + $0x31] sm:$0xff] }
 0x40e   : > { %v4409_v57 = vadd.f32 %v10700_v44, %v4370_v21  ;;  %v4371_v28 = vmul.f32 %v10694_v47, %v4270_v11  ;;  %v8623_v0 = vld [vmem:[#allocation4 + $0x188] sm:$0xff]   ;;  %v8627_v21 = vld [vmem:[#allocation4 + $0x190] sm:$0xff]  }
 0x40f   : > { %v4407_v32 = vadd.f32 %v10700_v44, %v4368_v62  ;;  %v4369_v29 = vmul.f32 %v10694_v47, %v4262_v59  ;;  %5696 = vmatprep.mubr.bf16.mxu1 %v4671_v63  ;;  %5544 = vmatmul.mubr.bf16.gmra.mrb[20].mxu0 %v4671_v63  ;;  %v4593_v20 = vld [vmem:[#allocation2 + $0x29] sm:$0xff] }
 0x410   : > { %v4441_v7 = vmax.f32 %v4409_v57, 0.0  ;;  %v4410_v58 = vadd.f32 %v10700_v44, %v4371_v28  ;;  %5697 = vmatmul.mubr.bf16.vlgmr.msra.gmra.mrb[48].mxu1 %v4623_v55  ;;  %5551 = vmatprep.mubr.bf16.mxu0 %v4577_v45  ;;  %v10755_v22 = vpack.c.bf16 %v4594_v35, %v4593_v20  ;;  %v8631_v28 = vld [vmem:[#allocation4 + $0x198] sm:$0xff]   ;;  %v8633_v35 = vld [vmem:[#allocation4 + $0x1a0] sm:$0xff]  }
 0x411   : > { %v4439_v4 = vmax.f32 %v4407_v32, 0.0  ;;  %v4408_v14 = vadd.f32 %v10700_v44, %v4369_v29  ;;  %v8297_v24 = vpop.f32.mrb[28].mxu1  ;;  %5704 = vmatprep.mubr.bf16.mxu1 %v10744_v48  ;;  %8084 = vmatpush3.bf16.msra.mxu1 %v8619_v10  ;;  %v4595_v29 = vld [vmem:[#allocation2 + $0x49] sm:$0xff] }
 0x412   : > { %4473 = vst [vmem:[#allocation2 + $0xc8] sm:$0xff] %v4441_v7  ;;  %v4442_v61 = vmax.f32 %v4410_v58, 0.0  ;;  %v4283_v50 = vadd.f32 %v8297_v24, %v10644_v17  ;;  %v4274_v42 = vpop.f32.mrb[29].mxu1  ;;  %8085 = vmatprep.subr.bf16.mxu1 %v8621_v27  ;;  %v4643_v18 = vld [vmem:[#allocation2 + $0x67] sm:$0xff] }
 0x413   : > { %4471 = vst [vmem:[#allocation2 + $0xa8] sm:$0xff] %v4439_v4  ;;  %v4440_v6 = vmax.f32 %v4408_v14, 0.0  ;;  %v4275_v45 = vadd.f32 %v4274_v42, %v10638_v52  ;;  %v8298_v13 = vpop.f32.mrb[30].mxu1  ;;  %v8632_v58 = vld [vmem:[#allocation4 + $0x1e0] sm:$0xff]  }
 0x414   : > { %4474 = vst [vmem:[#allocation2 + $0xd0] sm:$0xff] %v4442_v61  ;;  %v4374_v60 = vmul.f32 %v10694_v47, %v4283_v50  ;;  %v4286_v8 = vadd.f32 %v8298_v13, %v10647_v51  ;;  %v4277_v16 = vpop.f32.mrb[31].mxu1  ;;  %v4644_v54 = vld [vmem:[#allocation2 + $0x6f] sm:$0xff]  ;;  %v10761_v34 = vpack.c.bf16 %v4442_v61, %v4441_v7  ;;  %v8629_v51 = vld [vmem:[#allocation4 + $0x1d8] sm:$0xff]  }
 0x415   : > { %4472 = vst [vmem:[#allocation2 + $0xb0] sm:$0xff] %v4440_v6  ;;  %v4372_v17 = vmul.f32 %v10694_v47, %v4275_v45  ;;  %v4278_v33 = vadd.f32 %v4277_v16, %v10641_v2  ;;  %8086 = vmatpush3.bf16.msra.mxu1 %v8623_v0  ;;  %v10759_v3 = vpack.c.bf16 %v4440_v6, %v4439_v4  ;;  %v4596_v7 = vld [vmem:[#allocation2 + $0x51] sm:$0xff]  ;;  %v4645_v6 = vld [vmem:[#allocation2 + $0x87] sm:$0xff] }
 0x416   : > { %v4413_v11 = vadd.f32 %v10700_v44, %v4374_v60  ;;  %v4375_v52 = vmul.f32 %v10694_v47, %v4286_v8  ;;  %8087 = vmatprep.subr.bf16.mxu1 %v8625_v37  ;;  %v10766_v2 = vpack.c.bf16 %v4644_v54, %v4643_v18  ;;  %v4646_v50 = vld [vmem:[#allocation2 + $0x8f] sm:$0xff]  ;;  %v10778_v20 = vpack.c.bf16 %v4596_v7, %v4595_v29 }
 0x417   : > { %v4411_v55 = vadd.f32 %v10700_v44, %v4372_v17  ;;  %v4373_v12 = vmul.f32 %v10694_v47, %v4278_v33  ;;  %5552 = vmatmul.mubr.bf16.gmra.mrb[24].mxu0 %v10744_v48  ;;  %v8638_v29 = vld [vmem:[#allocation4 + $0x1b0] sm:$0xff]  }
 0x418   : > { %v4445_v62 = vmax.f32 %v4413_v11, 0.0  ;;  %v4414_v59 = vadd.f32 %v10700_v44, %v4375_v52  ;;  %5705 = vmatmul.mubr.bf16.gmra.mrb[52].mxu1 %v10755_v22  ;;  %5559 = vmatprep.mubr.bf16.mxu0 %v4578_v15  ;;  %v8635_v11 = vld [vmem:[#allocation4 + $0x1a8] sm:$0xff]  }
 0x419   : > { %v4443_v63 = vmax.f32 %v4411_v55, 0.0  ;;  %v4412_v10 = vadd.f32 %v10700_v44, %v4373_v12  ;;  %v8301_v57 = vpop.f32.mrb[32].mxu1  ;;  %5712 = vmatprep.mubr.bf16.mxu1 %v10766_v2  ;;  %8088 = vmatpush3.bf16.msra.mxu1 %v8627_v21  ;;  %v4597_v55 = vld [vmem:[#allocation2 + $0x69] sm:$0xff]  ;;  %v4598_v12 = vld [vmem:[#allocation2 + $0x71] sm:$0xff] }
 0x41a   : > { %4477 = vst [vmem:[#allocation2 + $0x108] sm:$0xff] %v4445_v62  ;;  %v4446_v40 = vmax.f32 %v4414_v59, 0.0  ;;  %v4299_v27 = vadd.f32 %v8301_v57, %v10656_v1  ;;  %v4290_v32 = vpop.f32.mrb[33].mxu1  ;;  %8089 = vmatprep.subr.bf16.mxu1 %v8629_v51 }
 0x41b   : > { %4475 = vst [vmem:[#allocation2 + $0xe8] sm:$0xff] %v4443_v63  ;;  %v4444_v4 = vmax.f32 %v4412_v10, 0.0  ;;  %v4291_v15 = vadd.f32 %v4290_v32, %v10650_v19  ;;  %v8302_v14 = vpop.f32.mrb[34].mxu1  ;;  %v10802_v32 = vpack.c.bf16 %v4598_v12, %v4597_v55 }
 0x41c   : > { %4478 = vst [vmem:[#allocation2 + $0x110] sm:$0xff] %v4446_v40  ;;  %v4378_v24 = vmul.f32 %v10694_v47, %v4299_v27  ;;  %v4302_v0 = vadd.f32 %v8302_v14, %v10659_v38  ;;  %v4293_v61 = vpop.f32.mrb[35].mxu1  ;;  %v10784_v13 = vpack.c.bf16 %v4446_v40, %v4445_v62  ;;  %v8634_v38 = vld [vmem:[#allocation4 + $0x1e8] sm:$0xff]   ;;  %v8636_v62 = vld [vmem:[#allocation4 + $0x1f0] sm:$0xff]  }
 0x41d   : > { %4476 = vst [vmem:[#allocation2 + $0xf0] sm:$0xff] %v4444_v4  ;;  %v4376_v1 = vmul.f32 %v10694_v47, %v4291_v15  ;;  %v4294_v42 = vadd.f32 %v4293_v61, %v10653_v31  ;;  %8090 = vmatpush3.bf16.msra.mxu1 %v8631_v28  ;;  %v10782_v45 = vpack.c.bf16 %v4444_v4, %v4443_v63  ;;  %v4648_v40 = vld [vmem:[#allocation2 + $0xaf] sm:$0xff] }
 0x41e   : > { %v4417_v37 = vadd.f32 %v10700_v44, %v4378_v24  ;;  %v4379_v19 = vmul.f32 %v10694_v47, %v4302_v0  ;;  %8091 = vmatprep.subr.bf16.mxu1 %v8632_v58  ;;  %v10789_v31 = vpack.c.bf16 %v4646_v50, %v4645_v6  ;;  %v4647_v58 = vld [vmem:[#allocation2 + $0xa7] sm:$0xff] }
 0x41f   : > { %v4415_v60 = vadd.f32 %v10700_v44, %v4376_v1  ;;  %v4377_v8 = vmul.f32 %v10694_v47, %v4294_v42  ;;  %5560 = vmatmul.mubr.bf16.gmra.mrb[28].mxu0 %v10766_v2 }
 0x420   : > { %v4449_v16 = vmax.f32 %v4417_v37, 0.0  ;;  %v4418_v54 = vadd.f32 %v10700_v44, %v4379_v19  ;;  %5713 = vmatmul.mubr.bf16.gmra.mrb[56].mxu1 %v10778_v20  ;;  %5567 = vmatprep.mubr.bf16.mxu0 %v10740_v41 }
 0x421   : > { %v4447_v17 = vmax.f32 %v4415_v60, 0.0  ;;  %v4416_v33 = vadd.f32 %v10700_v44, %v4377_v8  ;;  %v8305_v21 = vpop.f32.mrb[36].mxu1  ;;  %5720 = vmatprep.mubr.bf16.mxu1 %v10789_v31  ;;  %8092 = vmatpush3.bf16.msra.mxu1 %v8633_v35  ;;  %v8640_v35 = vld [vmem:[#allocation4 + $0x1b8] sm:$0xff]  }
 0x422   : > { %4481 = vst [vmem:[#allocation2 + $0x148] sm:$0xff] %v4449_v16  ;;  %v4450_v52 = vmax.f32 %v4418_v54, 0.0  ;;  %v4315_v18 = vadd.f32 %v8305_v21, %v10668_v25  ;;  %v4306_v51 = vpop.f32.mrb[37].mxu1  ;;  %8093 = vmatprep.subr.bf16.mxu1 %v8634_v38  ;;  %v4599_v38 = vld [vmem:[#allocation2 + $0x89] sm:$0xff]  ;;  %v4600_v60 = vld [vmem:[#allocation2 + $0x91] sm:$0xff] }
 0x423   : > { %4479 = vst [vmem:[#allocation2 + $0x128] sm:$0xff] %v4447_v17  ;;  %v4448_v59 = vmax.f32 %v4416_v33, 0.0  ;;  %v4307_v41 = vadd.f32 %v4306_v51, %v10662_v5  ;;  %v8306_v63 = vpop.f32.mrb[38].mxu1  ;;  %v4650_v21 = vld [vmem:[#allocation2 + $0xcf] sm:$0xff]  ;;  %v4649_v51 = vld [vmem:[#allocation2 + $0xc7] sm:$0xff] }
 0x424   : > { %4482 = vst [vmem:[#allocation2 + $0x150] sm:$0xff] %v4450_v52  ;;  %v4382_v10 = vmul.f32 %v10694_v47, %v4315_v18  ;;  %v4318_v57 = vadd.f32 %v8306_v63, %v10671_v53  ;;  %v4309_v28 = vpop.f32.mrb[39].mxu1  ;;  %v10808_v15 = vpack.c.bf16 %v4450_v52, %v4449_v16  ;;  %v8639_v53 = vld [vmem:[#allocation4 + $0x1f8] sm:$0xff]   ;;  %v10826_v52 = vpack.c.bf16 %v4600_v60, %v4599_v38 }
 0x425   : > { %4480 = vst [vmem:[#allocation2 + $0x130] sm:$0xff] %v4448_v59  ;;  %v4380_v25 = vmul.f32 %v10694_v47, %v4307_v41  ;;  %v4310_v27 = vadd.f32 %v4309_v28, %v10665_v43  ;;  %8094 = vmatpush3.bf16.msra.mxu1 %v8635_v11  ;;  %v10806_v4 = vpack.c.bf16 %v4448_v59, %v4447_v17 }
 0x426   : > { %v4421_v7 = vadd.f32 %v10700_v44, %v4382_v10  ;;  %v4383_v5 = vmul.f32 %v10694_v47, %v4318_v57  ;;  %8095 = vmatprep.subr.bf16.mxu1 %v8636_v62  ;;  %v10813_v43 = vpack.c.bf16 %v4648_v40, %v4647_v58  ;;  %v10837_v59 = vpack.c.bf16 %v4650_v21, %v4649_v51  ;;  %v4653_v21 = vld [vmem:[#allocation2 + $0x107] sm:$0xff] }
 0x427   : > { %v4419_v14 = vadd.f32 %v10700_v44, %v4380_v25  ;;  %v4381_v24 = vmul.f32 %v10694_v47, %v4310_v27  ;;  %5568 = vmatmul.mubr.bf16.gmra.mrb[32].mxu0 %v10789_v31  ;;  %v4601_v27 = vld [vmem:[#allocation2 + $0xa9] sm:$0xff] }
 0x428   : > { %v4453_v0 = vmax.f32 %v4421_v7, 0.0  ;;  %v4422_v61 = vadd.f32 %v10700_v44, %v4383_v5  ;;  %5721 = vmatmul.mubr.bf16.gmra.mrb[60].mxu1 %v10802_v32  ;;  %5575 = vmatprep.mubr.bf16.mxu0 %v10759_v3 }
 0x429   : > { %v4451_v50 = vmax.f32 %v4419_v14, 0.0  ;;  %v4420_v1 = vadd.f32 %v10700_v44, %v4381_v24  ;;  %v8309_v42 = vpop.f32.mrb[40].mxu1  ;;  %5728 = vmatprep.mubr.bf16.mxu1 %v10813_v43  ;;  %8096 = vmatpush3.bf16.msra.mxu1 %v8638_v29  ;;  %v4602_v29 = vld [vmem:[#allocation2 + $0xb1] sm:$0xff] }
 0x42a   : > { %4485 = vst [vmem:[#allocation2 + $0x188] sm:$0xff] %v4453_v0  ;;  %v4454_v37 = vmax.f32 %v4422_v61, 0.0  ;;  %v4331_v19 = vadd.f32 %v8309_v42, %v10680_v36  ;;  %v4322_v6 = vpop.f32.mrb[41].mxu1  ;;  %8097 = vmatprep.subr.bf16.mxu1 %v8639_v53  ;;  %v4652_v24 = vld [vmem:[#allocation2 + $0xef] sm:$0xff]  ;;  %v10850_v61 = vpack.c.bf16 %v4602_v29, %v4601_v27 }
 0x42b   : > { %4483 = vst [vmem:[#allocation2 + $0x168] sm:$0xff] %v4451_v50  ;;  %v4452_v8 = vmax.f32 %v4420_v1, 0.0  ;;  %v4323_v3 = vadd.f32 %v4322_v6, %v10674_v49  ;;  %v8310_v16 = vpop.f32.mrb[42].mxu1  ;;  %v4611_v27 = vld [vmem:[#allocation2 + $0x149] sm:$0xff] }
 0x42c   : > { %4486 = vst [vmem:[#allocation2 + $0x190] sm:$0xff] %v4454_v37  ;;  %v4386_v54 = vmul.f32 %v10694_v47, %v4331_v19  ;;  %v4334_v17 = vadd.f32 %v8310_v16, %v10683_v30  ;;  %v4325_v33 = vpop.f32.mrb[43].mxu1  ;;  %v10832_v12 = vpack.c.bf16 %v4454_v37, %v4453_v0  ;;  %v4604_v16 = vld [vmem:[#allocation2 + $0xd1] sm:$0xff] }
 0x42d   : > { %4484 = vst [vmem:[#allocation2 + $0x170] sm:$0xff] %v4452_v8  ;;  %v4384_v11 = vmul.f32 %v10694_v47, %v4323_v3  ;;  %v4326_v36 = vadd.f32 %v4325_v33, %v10677_v56  ;;  %8098 = vmatpush3.bf16.msra.mxu1 %v8640_v35  ;;  %v10830_v55 = vpack.c.bf16 %v4452_v8, %v4451_v50  ;;  %v4603_v3 = vld [vmem:[#allocation2 + $0xc9] sm:$0xff] }
 0x42e   : > { %v4425_v18 = vadd.f32 %v10700_v44, %v4386_v54  ;;  %v4387_v49 = vmul.f32 %v10694_v47, %v4334_v17  ;;  %v4654_v54 = vld [vmem:[#allocation2 + $0x10f] sm:$0xff]  ;;  %v10870_v33 = vpack.c.bf16 %v4604_v16, %v4603_v3 }
 0x42f   : > { %v4423_v30 = vadd.f32 %v10700_v44, %v4384_v11  ;;  %v4385_v62 = vmul.f32 %v10694_v47, %v4326_v36  ;;  %5576 = vmatmul.mubr.bf16.gmra.mrb[36].mxu0 %v10813_v43  ;;  %v4606_v11 = vld [vmem:[#allocation2 + $0xf1] sm:$0xff] }
 0x430   : > { %v4457_v56 = vmax.f32 %v4425_v18, 0.0  ;;  %v4426_v41 = vadd.f32 %v10700_v44, %v4387_v49  ;;  %5729 = vmatmul.mubr.bf16.gmra.mrb[64].mxu1 %v10826_v52  ;;  %5583 = vmatprep.mubr.bf16.mxu0 %v10761_v34  ;;  %v4656_v36 = vld [vmem:[#allocation2 + $0x12f] sm:$0xff]  ;;  %v4655_v49 = vld [vmem:[#allocation2 + $0x127] sm:$0xff] }
 0x431   : > { %v4455_v63 = vmax.f32 %v4423_v30, 0.0  ;;  %v4424_v10 = vadd.f32 %v10700_v44, %v4385_v62  ;;  %v8313_v57 = vpop.f32.mrb[44].mxu1  ;;  %5736 = vmatprep.mubr.bf16.mxu1 %v10837_v59  ;;  %v10881_v51 = vpack.c.bf16 %v4656_v36, %v4655_v49  ;;  %v4607_v30 = vld [vmem:[#allocation2 + $0x109] sm:$0xff] }
 0x432   : > { %4489 = vst [vmem:[#allocation2 + $0x1c8] sm:$0xff] %v4457_v56  ;;  %v4458_v28 = vmax.f32 %v4426_v41, 0.0  ;;  %v4347_v40 = vadd.f32 %v8313_v57, %v10709_v39  ;;  %v4338_v25 = vpop.f32.mrb[45].mxu1  ;;  %v4658_v62 = vld [vmem:[#allocation2 + $0x14f] sm:$0xff]  ;;  %v4657_v41 = vld [vmem:[#allocation2 + $0x147] sm:$0xff] }
 0x433   : > { %4487 = vst [vmem:[#allocation2 + $0x1a8] sm:$0xff] %v4455_v63  ;;  %v4456_v7 = vmax.f32 %v4424_v10, 0.0  ;;  %v4339_v5 = vadd.f32 %v4338_v25, %v10686_v9  ;;  %v8314_v58 = vpop.f32.mrb[46].mxu1  ;;  %v4651_v9 = vld [vmem:[#allocation2 + $0xe7] sm:$0xff]  ;;  %v4662_v29 = vld [vmem:[#allocation2 + $0x18f] sm:$0xff] }
 0x434   : > { %4490 = vst [vmem:[#allocation2 + $0x1d0] sm:$0xff] %v4458_v28  ;;  %v4390_v34 = vmul.f32 %v10694_v47, %v4347_v40  ;;  %v4350_v53 = vadd.f32 %v8314_v58, %v10714_v46  ;;  %v4341_v14 = vpop.f32.mrb[47].mxu1  ;;  %v10856_v35 = vpack.c.bf16 %v4458_v28, %v4457_v56  ;;  %v10861_v19 = vpack.c.bf16 %v4652_v24, %v4651_v9  ;;  %v4609_v10 = vld [vmem:[#allocation2 + $0x129] sm:$0xff] }
 0x435   : > { %4488 = vst [vmem:[#allocation2 + $0x1b0] sm:$0xff] %v4456_v7  ;;  %v4388_v0 = vmul.f32 %v10694_v47, %v4339_v5  ;;  %v4342_v39 = vadd.f32 %v4341_v14, %v10689_v26  ;;  %v10854_v42 = vpack.c.bf16 %v4456_v7, %v4455_v63  ;;  %v10889_v63 = vpack.c.bf16 %v4658_v62, %v4657_v41  ;;  %v4660_v57 = vld [vmem:[#allocation2 + $0x16f] sm:$0xff]  ;;  %v4659_v40 = vld [vmem:[#allocation2 + $0x167] sm:$0xff] }
 0x436   : > { %v4429_v50 = vadd.f32 %v10700_v44, %v4390_v34  ;;  %v4391_v1 = vmul.f32 %v10694_v47, %v4350_v53  ;;  %v10897_v25 = vpack.c.bf16 %v4660_v57, %v4659_v40  ;;  %v4661_v58 = vld [vmem:[#allocation2 + $0x187] sm:$0xff] }
 0x437   : > { %v4427_v46 = vadd.f32 %v10700_v44, %v4388_v0  ;;  %v4389_v37 = vmul.f32 %v10694_v47, %v4342_v39  ;;  %5584 = vmatmul.mubr.bf16.gmra.mrb[40].mxu0 %v10837_v59  ;;  %v10905_v53 = vpack.c.bf16 %v4662_v29, %v4661_v58  ;;  %v4613_v39 = vld [vmem:[#allocation2 + $0x169] sm:$0xff]  ;;  %v8643_v58 = vld [vmem:[#allocation4 + $0x218] sm:$0xff]  }
 0x438   : > { %v4461_v26 = vmax.f32 %v4429_v50, 0.0  ;;  %v4430_v6 = vadd.f32 %v10700_v44, %v4391_v1  ;;  %5737 = vmatmul.mubr.bf16.gmra.mrb[68].mxu1 %v10850_v61  ;;  %5591 = vmatprep.mubr.bf16.mxu0 %v10782_v45  ;;  %v10873_v45 = vpack.c.bf16 %v4654_v54, %v4653_v21  ;;  %v4614_v50 = vld [vmem:[#allocation2 + $0x171] sm:$0xff]  ;;  %v4687_v41 = vld [vmem:[#allocation2 + $0x28] sm:$0xff] }
 0x439   : > { %v4459_v38 = vmax.f32 %v4427_v46, 0.0  ;;  %v4428_v60 = vadd.f32 %v10700_v44, %v4389_v37  ;;  %5744 = vmatprep.mubr.bf16.mxu1 %v10861_v19  ;;  %v4605_v44 = vld [vmem:[#allocation2 + $0xe9] sm:$0xff]  ;;  %v10914_v9 = vpack.c.bf16 %v4614_v50, %v4613_v39 }
 0x43a   : > { %4493 = vst [vmem:[#allocation2 + $0x208] sm:$0xff] %v4461_v26  ;;  %v4462_v8 = vmax.f32 %v4430_v6, 0.0  ;;  %v10878_v18 = vpack.c.bf16 %v4606_v11, %v4605_v44  ;;  %v4663_v46 = vld [vmem:[#allocation2 + $0x1a7] sm:$0xff]  ;;  %v4616_v26 = vld [vmem:[#allocation2 + $0x191] sm:$0xff] }
 0x43b   : > { %4491 = vst [vmem:[#allocation2 + $0x1e8] sm:$0xff] %v4459_v38  ;;  %v4460_v47 = vmax.f32 %v4428_v60, 0.0  ;;  %v4666_v6 = vld [vmem:[#allocation2 + $0x1cf] sm:$0xff]  ;;  %v4665_v60 = vld [vmem:[#allocation2 + $0x1c7] sm:$0xff] }
 0x43c   : > { %4494 = vst [vmem:[#allocation2 + $0x210] sm:$0xff] %v4462_v8  ;;  %v4664_v1 = vld [vmem:[#allocation2 + $0x1af] sm:$0xff]  ;;  %v10925_v8 = vpack.c.bf16 %v4666_v6, %v4665_v60 }
 0x43d   : > { %4492 = vst [vmem:[#allocation2 + $0x1f0] sm:$0xff] %v4460_v47  ;;  %v10868_v17 = vpack.c.bf16 %v4460_v47, %v4459_v38  ;;  %v10917_v37 = vpack.c.bf16 %v4664_v1, %v4663_v46  ;;  %v4617_v47 = vld [vmem:[#allocation2 + $0x1a9] sm:$0xff]  ;;  %v8647_v1 = vld [vmem:[#allocation4 + $0x238] sm:$0xff]  }
 0x43e   : > { %v4619_v44 = vld [vmem:[#allocation2 + $0x1c9] sm:$0xff] }
 0x43f   : > { %5592 = vmatmul.mubr.bf16.gmra.mrb[44].mxu0 %v10861_v19  ;;  %v4831_v40 = vld [vmem:[#allocation2 + $0x48] sm:$0xff]  ;;  %v4834_v29 = vld [vmem:[#allocation2 + $0x70] sm:$0xff] }
 0x440   : > { %5745 = vmatmul.mubr.bf16.gmra.mrb[72].mxu1 %v10870_v33  ;;  %5599 = vmatprep.mubr.bf16.mxu0 %v10784_v13  ;;  %v4608_v13 = vld [vmem:[#allocation2 + $0x111] sm:$0xff]  ;;  %v4837_v50 = vld [vmem:[#allocation2 + $0xa8] sm:$0xff] }
 0x441   : > { %5752 = vmatprep.mubr.bf16.mxu1 %v10873_v45  ;;  %v10886_v56 = vpack.c.bf16 %v4608_v13, %v4607_v30  ;;  %v4669_v49 = vld [vmem:[#allocation2 + $0x207] sm:$0xff]  ;;  %v4688_v13 = vld [vmem:[#allocation2 + $0x30] sm:$0xff] }
 0x442   : > { %v4667_v54 = vld [vmem:[#allocation2 + $0x1e7] sm:$0xff] }
 0x443   : > { %v4670_v11 = vld [vmem:[#allocation2 + $0x20f] sm:$0xff] }
 0x444   : > { %v4668_v3 = vld [vmem:[#allocation2 + $0x1ef] sm:$0xff]  ;;  %v10941_v30 = vpack.c.bf16 %v4670_v11, %v4669_v49 }
 0x445   : > { %v10933_v21 = vpack.c.bf16 %v4668_v3, %v4667_v54  ;;  %v4622_v62 = vld [vmem:[#allocation2 + $0x1f1] sm:$0xff]  ;;  %v4841_v6 = vld [vmem:[#allocation2 + $0xe8] sm:$0xff] }
 0x447   : > { %5600 = vmatmul.mubr.bf16.gmra.mrb[48].mxu0 %v10873_v45 }
 0x448   : > { %5753 = vmatmul.mubr.bf16.gmra.mrb[76].mxu1 %v10878_v18  ;;  %5607 = vmatprep.mubr.bf16.mxu0 %v10806_v4  ;;  %v4610_v4 = vld [vmem:[#allocation2 + $0x131] sm:$0xff] }
 0x449   : > { %5760 = vmatprep.mubr.bf16.mxu1 %v10881_v51  ;;  %v10894_v28 = vpack.c.bf16 %v4610_v4, %v4609_v10  ;;  %v4832_v10 = vld [vmem:[#allocation2 + $0x50] sm:$0xff]  ;;  %v4719_v4 = vpack.c.bf16 %v4688_v13, %v4687_v41 }
 0x44f   : > { %5608 = vmatmul.mubr.bf16.gmra.mrb[52].mxu0 %v10881_v51 }
 0x450   : > { %5761 = vmatmul.mubr.bf16.gmra.mrb[80].mxu1 %v10886_v56  ;;  %5615 = vmatprep.mubr.bf16.mxu0 %v10808_v15  ;;  %v4612_v15 = vld [vmem:[#allocation2 + $0x151] sm:$0xff] }
 0x451   : > { %5768 = vmatprep.mubr.bf16.mxu1 %v10889_v63  ;;  %v10902_v5 = vpack.c.bf16 %v4612_v15, %v4611_v27  ;;  %v8641_v27 = vld [vmem:[#allocation4 + $0x208] sm:$0xff]   ;;  %v4863_v15 = vpack.c.bf16 %v4832_v10, %v4831_v40 }
 0x452   : > { %v4855_v40 = vld [vmem:[#allocation2 + $0x1c8] sm:$0xff] }
 0x453   : > { %v7763_v7 = vpop.f32.mrb[16].mxu0 }
 0x454   : > { %v7764_v34 = vpop.f32.mrb[17].mxu0 }
 0x455   : > { %v10907_v14 = vadd.f32 %v7764_v34, %v7763_v7  ;;  %v7766_v24 = vpop.f32.mrb[18].mxu0  ;;  %v4833_v7 = vld [vmem:[#allocation2 + $0x68] sm:$0xff] }
 0x456   : > { %v4864_v34 = vpack.c.bf16 %v4834_v29, %v4833_v7 }
 0x457   : > { %5616 = vmatmul.mubr.bf16.gmra.mrb[56].mxu0 %v10889_v63 }
 0x458   : > { %5769 = vmatmul.mubr.bf16.gmra.mrb[84].mxu1 %v10894_v28  ;;  %5623 = vmatprep.mubr.bf16.mxu0 %v10830_v55  ;;  %v7767_v55 = vpop.f32.mrb[19].mxu0 }
 0x459   : > { %5776 = vmatprep.mubr.bf16.mxu1 %v10897_v25  ;;  %v10912_v0 = vadd.f32 %v7767_v55, %v7766_v24  ;;  %v4836_v24 = vld [vmem:[#allocation2 + $0x90] sm:$0xff]  ;;  %v8645_v55 = vld [vmem:[#allocation4 + $0x228] sm:$0xff]  }
 0x45f   : > { %5624 = vmatmul.mubr.bf16.gmra.mrb[60].mxu0 %v10897_v25 }
 0x460   : > { %5777 = vmatmul.mubr.bf16.gmra.mrb[88].mxu1 %v10902_v5  ;;  %5631 = vmatprep.mubr.bf16.mxu0 %v10832_v12  ;;  %v4615_v12 = vld [vmem:[#allocation2 + $0x189] sm:$0xff] }
 0x461   : > { %5784 = vmatprep.mubr.bf16.mxu1 %v10905_v53  ;;  %v10922_v38 = vpack.c.bf16 %v4616_v26, %v4615_v12  ;;  %v4842_v26 = vld [vmem:[#allocation2 + $0xf0] sm:$0xff] }
 0x462   : > { %v4868_v60 = vpack.c.bf16 %v4842_v26, %v4841_v6 }
 0x467   : > { %5632 = vmatmul.mubr.bf16.gmra.mrb[64].mxu0 %v10905_v53 }
 0x468   : > { %5785 = vmatmul.mubr.bf16.gmra.mrb[92].mxu1 %v10914_v9  ;;  %5639 = vmatprep.mubr.bf16.mxu0 %v10854_v42  ;;  %v4618_v42 = vld [vmem:[#allocation2 + $0x1b1] sm:$0xff] }
 0x469   : > { %5792 = vmatprep.mubr.bf16.mxu1 %v10917_v37  ;;  %v10930_v16 = vpack.c.bf16 %v4618_v42, %v4617_v47 }
 0x46f   : > { %5640 = vmatmul.mubr.bf16.gmra.mrb[68].mxu0 %v10917_v37 }
 0x470   : > { %5793 = vmatmul.mubr.bf16.gmra.mrb[96].mxu1 %v10922_v38  ;;  %5647 = vmatprep.mubr.bf16.mxu0 %v10856_v35  ;;  %v4620_v35 = vld [vmem:[#allocation2 + $0x1d1] sm:$0xff] }
 0x471   : > { %5800 = vmatprep.mubr.bf16.mxu1 %v10925_v8  ;;  %v10938_v36 = vpack.c.bf16 %v4620_v35, %v4619_v44 }
 0x477   : > { %5648 = vmatmul.mubr.bf16.gmra.mrb[72].mxu0 %v10925_v8 }
 0x478   : > { %5801 = vmatmul.mubr.bf16.gmra.mrb[100].mxu1 %v10930_v16  ;;  %5655 = vmatprep.mubr.bf16.mxu0 %v10868_v17  ;;  %v4621_v17 = vld [vmem:[#allocation2 + $0x1e9] sm:$0xff] }
 0x479   : > { %5808 = vmatprep.mubr.bf16.mxu1 %v10933_v21  ;;  %v10946_v57 = vpack.c.bf16 %v4622_v62, %v4621_v17  ;;  %v4856_v62 = vld [vmem:[#allocation2 + $0x1d0] sm:$0xff] }
 0x47f   : > { %5656 = vmatmul.mubr.bf16.gmra.mrb[76].mxu0 %v10933_v21 }
 0x480   : > { %5809 = vmatmul.mubr.bf16.gmra.mrb[104].mxu1 %v10938_v36  ;;  %5857 = vmatprep.mubr.bf16.mxu0 %v10755_v22  ;;  %v8642_v22 = vld [vmem:[#allocation4 + $0x210] sm:$0xff]  }
 0x481   : > { %5816 = vmatprep.mubr.bf16.mxu1 %v10941_v30 }
 0x487   : > { %5858 = vmatmul.mubr.bf16.vlgmr.msra.gmra.mrb[80].mxu0 %v4719_v4 }
 0x488   : > { %5817 = vmatmul.mubr.bf16.gmra.mrb[108].mxu1 %v10946_v57  ;;  %5865 = vmatprep.mubr.bf16.mxu0 %v10778_v20  ;;  %v8644_v20 = vld [vmem:[#allocation4 + $0x220] sm:$0xff]  }
 0x489   : > { %6018 = vmatprep.mubr.bf16.mxu1 %v4863_v15  ;;  %8316 = vmatpush3.bf16.msra.mxu0 %v10728_v23  ;;  %v4835_v23 = vld [vmem:[#allocation2 + $0x88] sm:$0xff] }
 0x48a   : > { %8317 = vmatprep.subr.bf16.mxu0 %v8641_v27  ;;  %v4865_v39 = vpack.c.bf16 %v4836_v24, %v4835_v23  ;;  %v4858_v24 = vld [vmem:[#allocation2 + $0x1f0] sm:$0xff] }
 0x48d   : > { %8318 = vmatpush3.bf16.msra.mxu0 %v8641_v27 }
 0x48e   : > { %8319 = vmatprep.subr.bf16.mxu0 %v8642_v22 }
 0x48f   : > { %5866 = vmatmul.mubr.bf16.gmra.mrb[84].mxu0 %v4863_v15 }
 0x490   : > { %6019 = vmatmul.mubr.bf16.vlgmr.msra.gmra.mrb[112].mxu1 %v10744_v48  ;;  %5873 = vmatprep.mubr.bf16.mxu0 %v10802_v32  ;;  %v8646_v48 = vld [vmem:[#allocation4 + $0x230] sm:$0xff]  }
 0x491   : > { %6026 = vmatprep.mubr.bf16.mxu1 %v4864_v34  ;;  %8320 = vmatpush3.bf16.msra.mxu0 %v8642_v22  ;;  %v4838_v32 = vld [vmem:[#allocation2 + $0xb0] sm:$0xff] }
 0x492   : > { %8321 = vmatprep.subr.bf16.mxu0 %v8643_v58  ;;  %v4866_v46 = vpack.c.bf16 %v4838_v32, %v4837_v50  ;;  %v4857_v32 = vld [vmem:[#allocation2 + $0x1e8] sm:$0xff] }
 0x495   : > { %8322 = vmatpush3.bf16.msra.mxu0 %v8643_v58 }
 0x496   : > { %8323 = vmatprep.subr.bf16.mxu0 %v8644_v20 }
 0x497   : > { %5874 = vmatmul.mubr.bf16.gmra.mrb[88].mxu0 %v4864_v34 }
 0x498   : > { %6027 = vmatmul.mubr.bf16.gmra.mrb[116].mxu1 %v10766_v2  ;;  %5881 = vmatprep.mubr.bf16.mxu0 %v10826_v52  ;;  %v4840_v2 = vld [vmem:[#allocation2 + $0xd0] sm:$0xff]  ;;  %v4839_v52 = vld [vmem:[#allocation2 + $0xc8] sm:$0xff] }
 0x499   : > { %6034 = vmatprep.mubr.bf16.mxu1 %v4865_v39  ;;  %8324 = vmatpush3.bf16.msra.mxu0 %v8644_v20  ;;  %v4867_v12 = vpack.c.bf16 %v4840_v2, %v4839_v52  ;;  %v4765_v52 = vld [vmem:[#allocation2 + $0x209] sm:$0xff] }
 0x49a   : > { %8325 = vmatprep.subr.bf16.mxu0 %v8645_v55 }
 0x49d   : > { %8326 = vmatpush3.bf16.msra.mxu0 %v8645_v55 }
 0x49e   : > { %8327 = vmatprep.subr.bf16.mxu0 %v8646_v48 }
 0x49f   : > { %5882 = vmatmul.mubr.bf16.gmra.mrb[92].mxu0 %v4865_v39 }
 0x4a0   : > { %6035 = vmatmul.mubr.bf16.gmra.mrb[120].mxu1 %v10789_v31  ;;  %5889 = vmatprep.mubr.bf16.mxu0 %v10850_v61  ;;  %v4844_v31 = vld [vmem:[#allocation2 + $0x110] sm:$0xff]  ;;  %v4843_v61 = vld [vmem:[#allocation2 + $0x108] sm:$0xff] }
 0x4a1   : > { %6042 = vmatprep.mubr.bf16.mxu1 %v4866_v46  ;;  %8328 = vmatpush3.bf16.msra.mxu0 %v8646_v48  ;;  %v4869_v47 = vpack.c.bf16 %v4844_v31, %v4843_v61  ;;  %v4860_v31 = vld [vmem:[#allocation2 + $0x210] sm:$0xff] }
 0x4a2   : > { %8329 = vmatprep.subr.bf16.mxu0 %v8647_v1 }
 0x4a5   : > { %8330 = vmatpush3.bf16.msra.mxu0 %v8647_v1 }
 0x4a7   : > { %5890 = vmatmul.mubr.bf16.gmra.mrb[96].mxu0 %v4866_v46 }
 0x4a8   : > { %6043 = vmatmul.mubr.bf16.gmra.mrb[124].mxu1 %v10813_v43  ;;  %5897 = vmatprep.mubr.bf16.mxu0 %v10870_v33  ;;  %v4846_v43 = vld [vmem:[#allocation2 + $0x130] sm:$0xff]  ;;  %v4845_v33 = vld [vmem:[#allocation2 + $0x128] sm:$0xff] }
 0x4a9   : > { %6050 = vmatprep.mubr.bf16.mxu1 %v4867_v12  ;;  %v4870_v42 = vpack.c.bf16 %v4846_v43, %v4845_v33 }
 0x4af   : > { %5898 = vmatmul.mubr.bf16.gmra.mrb[100].mxu0 %v4867_v12  ;;  %v4766_v12 = vld [vmem:[#allocation2 + $0x211] sm:$0xff] }
 0x4b0   : > { %6051 = vmatmul.mubr.bf16.gmra.mrb[128].mxu1 %v10837_v59  ;;  %5905 = vmatprep.mubr.bf16.mxu0 %v10878_v18  ;;  %v4848_v59 = vld [vmem:[#allocation2 + $0x150] sm:$0xff]  ;;  %v4847_v18 = vld [vmem:[#allocation2 + $0x148] sm:$0xff] }
 0x4b1   : > { %6058 = vmatprep.mubr.bf16.mxu1 %v4868_v60  ;;  %v4871_v3 = vpack.c.bf16 %v4848_v59, %v4847_v18 }
 0x4b7   : > { %5906 = vmatmul.mubr.bf16.gmra.mrb[104].mxu0 %v4868_v60 }
 0x4b8   : > { %6059 = vmatmul.mubr.bf16.gmra.mrb[132].mxu1 %v10861_v19  ;;  %5913 = vmatprep.mubr.bf16.mxu0 %v10886_v56  ;;  %v4850_v19 = vld [vmem:[#allocation2 + $0x170] sm:$0xff]  ;;  %v4849_v56 = vld [vmem:[#allocation2 + $0x168] sm:$0xff] }
 0x4b9   : > { %6066 = vmatprep.mubr.bf16.mxu1 %v4869_v47  ;;  %v4872_v54 = vpack.c.bf16 %v4850_v19, %v4849_v56 }
 0x4bf   : > { %5914 = vmatmul.mubr.bf16.gmra.mrb[108].mxu0 %v4869_v47 }
 0x4c0   : > { %6067 = vmatmul.mubr.bf16.gmra.mrb[136].mxu1 %v10873_v45  ;;  %5921 = vmatprep.mubr.bf16.mxu0 %v10894_v28  ;;  %v4852_v45 = vld [vmem:[#allocation2 + $0x190] sm:$0xff]  ;;  %v4851_v28 = vld [vmem:[#allocation2 + $0x188] sm:$0xff] }
 0x4c1   : > { %6074 = vmatprep.mubr.bf16.mxu1 %v4870_v42  ;;  %v4873_v44 = vpack.c.bf16 %v4852_v45, %v4851_v28  ;;  %v4879_v28 = vld [vmem:[#allocation2 + $0x49] sm:$0xff] }
 0x4c7   : > { %5922 = vmatmul.mubr.bf16.gmra.mrb[112].mxu0 %v4870_v42 }
 0x4c8   : > { %6075 = vmatmul.mubr.bf16.gmra.mrb[140].mxu1 %v10881_v51  ;;  %5929 = vmatprep.mubr.bf16.mxu0 %v10902_v5  ;;  %v4854_v51 = vld [vmem:[#allocation2 + $0x1b0] sm:$0xff]  ;;  %v4853_v5 = vld [vmem:[#allocation2 + $0x1a8] sm:$0xff] }
 0x4c9   : > { %6082 = vmatprep.mubr.bf16.mxu1 %v4871_v3  ;;  %v4874_v35 = vpack.c.bf16 %v4854_v51, %v4853_v5 }
 0x4cf   : > { %5930 = vmatmul.mubr.bf16.gmra.mrb[116].mxu0 %v4871_v3 }
 0x4d0   : > { %6083 = vmatmul.mubr.bf16.gmra.mrb[144].mxu1 %v10889_v63  ;;  %5937 = vmatprep.mubr.bf16.mxu0 %v10914_v9 }
 0x4d1   : > { %6090 = vmatprep.mubr.bf16.mxu1 %v4872_v54 }
 0x4d7   : > { %5938 = vmatmul.mubr.bf16.gmra.mrb[120].mxu0 %v4872_v54 }
 0x4d8   : > { %6091 = vmatmul.mubr.bf16.gmra.mrb[148].mxu1 %v10897_v25  ;;  %5945 = vmatprep.mubr.bf16.mxu0 %v10922_v38 }
 0x4d9   : > { %6098 = vmatprep.mubr.bf16.mxu1 %v4873_v44 }
 0x4df   : > { %5946 = vmatmul.mubr.bf16.gmra.mrb[124].mxu0 %v4873_v44  ;;  %v4880_v44 = vld [vmem:[#allocation2 + $0x51] sm:$0xff] }
 0x4e0   : > { %6099 = vmatmul.mubr.bf16.gmra.mrb[152].mxu1 %v10905_v53  ;;  %5953 = vmatprep.mubr.bf16.mxu0 %v10930_v16  ;;  %v4875_v16 = vpack.c.bf16 %v4856_v62, %v4855_v40  ;;  %v4911_v62 = vpack.c.bf16 %v4880_v44, %v4879_v28 }
 0x4e1   : > { %6106 = vmatprep.mubr.bf16.mxu1 %v4874_v35 }
 0x4e2   : > { %v7769_v63 = vpop.f32.mrb[20].mxu0 }
 0x4e3   : > { %v7875_v9 = vpop.f32.mrb[48].mxu1  ;;  %v7770_v11 = vpop.f32.mrb[21].mxu0 }
 0x4e4   : > { %v7771_v49 = vadd.f32 %v7770_v11, %v7769_v63  ;;  %v7876_v13 = vpop.f32.mrb[49].mxu1  ;;  %v7772_v17 = vpop.f32.mrb[22].mxu0 }
 0x4e5   : > { %v7877_v25 = vadd.f32 %v7876_v13, %v7875_v9  ;;  %v7878_v41 = vpop.f32.mrb[50].mxu1  ;;  %v7773_v38 = vpop.f32.mrb[23].mxu0 }
 0x4e6   : > { %v7774_v10 = vadd.f32 %v7773_v38, %v7772_v17  ;;  %v7879_v4 = vpop.f32.mrb[51].mxu1 }
 0x4e7   : > { %v10974_v27 = vadd.f32 %v7877_v25, %v10907_v14  ;;  %v7880_v53 = vadd.f32 %v7879_v4, %v7878_v41  ;;  %5954 = vmatmul.mubr.bf16.gmra.mrb[128].mxu0 %v4874_v35  ;;  %v4814_v4 = vld [vmem:[#allocation2 + $0x22f] sm:$0xff] }
 0x4e8   : > { %6107 = vmatmul.mubr.bf16.gmra.mrb[156].mxu1 %v10917_v37  ;;  %5961 = vmatprep.mubr.bf16.mxu0 %v10938_v36 }
 0x4e9   : > { %v10979_v15 = vadd.f32 %v7880_v53, %v10912_v0  ;;  %6114 = vmatprep.mubr.bf16.mxu1 %v4875_v16  ;;  %v4876_v0 = vpack.c.bf16 %v4858_v24, %v4857_v32  ;;  %v4881_v53 = vld [vmem:[#allocation2 + $0x69] sm:$0xff] }
 0x4ea   : > { %v7775_v22 = vpop.f32.mrb[24].mxu0 }
 0x4eb   : > { %v7881_v29 = vpop.f32.mrb[52].mxu1  ;;  %v7776_v7 = vpop.f32.mrb[25].mxu0 }
 0x4ec   : > { %v7777_v58 = vadd.f32 %v7776_v7, %v7775_v22  ;;  %v7882_v34 = vpop.f32.mrb[53].mxu1  ;;  %v7778_v20 = vpop.f32.mrb[26].mxu0  ;;  %v4883_v7 = vld [vmem:[#allocation2 + $0x89] sm:$0xff] }
 0x4ed   : > { %v7883_v14 = vadd.f32 %v7882_v34, %v7881_v29  ;;  %v7884_v23 = vpop.f32.mrb[54].mxu1  ;;  %v7779_v55 = vpop.f32.mrb[27].mxu0 }
 0x4ee   : > { %v7780_v39 = vadd.f32 %v7779_v55, %v7778_v20  ;;  %v7885_v48 = vpop.f32.mrb[55].mxu1 }
 0x4ef   : > { %v10981_v37 = vadd.f32 %v7883_v14, %v7771_v49  ;;  %v7886_v36 = vadd.f32 %v7885_v48, %v7884_v23  ;;  %5962 = vmatmul.mubr.bf16.gmra.mrb[132].mxu0 %v4875_v16  ;;  %v8650_v49 = vld [vmem:[#allocation2 + $0x8] sm:$0xff]  ;;  %v4882_v16 = vld [vmem:[#allocation2 + $0x71] sm:$0xff] }
 0x4f0   : > { %6115 = vmatmul.mubr.bf16.gmra.mrb[160].mxu1 %v10925_v8  ;;  %5969 = vmatprep.mubr.bf16.mxu0 %v10946_v57  ;;  %v10987_v8 = vpack.c.bf16 %v4766_v12, %v4765_v52  ;;  %v4859_v57 = vld [vmem:[#allocation2 + $0x208] sm:$0xff]  ;;  %v4878_v13 = vpack.c.bf16 %v8650_v49, %v8650_v49  ;;  %v4886_v12 = vld [vmem:[#allocation2 + $0xb1] sm:$0xff] }
 0x4f1   : > { %v10985_v50 = vadd.f32 %v7886_v36, %v7774_v10  ;;  %6122 = vmatprep.mubr.bf16.mxu1 %v4876_v0  ;;  %v4877_v3 = vpack.c.bf16 %v4860_v31, %v4859_v57  ;;  %v4813_v10 = vld [vmem:[#allocation2 + $0x227] sm:$0xff]  ;;  %v4888_v31 = vld [vmem:[#allocation2 + $0xd1] sm:$0xff] }
 0x4f2   : > { %v7781_v1 = vpop.f32.mrb[28].mxu0  ;;  %v4830_v14 = vpack.c.bf16 %v4814_v4, %v4813_v10  ;;  %v4885_v52 = vld [vmem:[#allocation2 + $0xa9] sm:$0xff]  ;;  %v4892_v49 = vld [vmem:[#allocation2 + $0x111] sm:$0xff] }
 0x4f3   : > { %v7887_v46 = vpop.f32.mrb[56].mxu1  ;;  %v7782_v2 = vpop.f32.mrb[29].mxu0 }
 0x4f4   : > { %v7783_v26 = vadd.f32 %v7782_v2, %v7781_v1  ;;  %v7888_v6 = vpop.f32.mrb[57].mxu1  ;;  %v7784_v60 = vpop.f32.mrb[30].mxu0 }
 0x4f5   : > { %v7889_v61 = vadd.f32 %v7888_v6, %v7887_v46  ;;  %v7890_v47 = vpop.f32.mrb[58].mxu1  ;;  %v7785_v43 = vpop.f32.mrb[31].mxu0 }
 0x4f6   : > { %v7786_v33 = vadd.f32 %v7785_v43, %v7784_v60  ;;  %v7891_v42 = vpop.f32.mrb[59].mxu1  ;;  %v4887_v60 = vld [vmem:[#allocation2 + $0xc9] sm:$0xff] }
 0x4f7   : > { %v10989_v59 = vadd.f32 %v7889_v61, %v7777_v58  ;;  %v7892_v18 = vadd.f32 %v7891_v42, %v7890_v47  ;;  %5970 = vmatmul.mubr.bf16.gmra.mrb[136].mxu0 %v4876_v0  ;;  %v4884_v58 = vld [vmem:[#allocation2 + $0x91] sm:$0xff] }
 0x4f8   : > { %6123 = vmatmul.mubr.bf16.gmra.mrb[164].mxu1 %v10933_v21  ;;  %5977 = vmatprep.mubr.bf16.mxu0 %v10987_v8  ;;  %v4913_v36 = vpack.c.bf16 %v4884_v58, %v4883_v7 }
 0x4f9   : > { %v10993_v19 = vadd.f32 %v7892_v18, %v7780_v39  ;;  %6130 = vmatprep.mubr.bf16.mxu1 %v4877_v3  ;;  %v4912_v39 = vpack.c.bf16 %v4882_v16, %v4881_v53  ;;  %v4914_v18 = vpack.c.bf16 %v4886_v12, %v4885_v52 }
 0x4fa   : > { %v7787_v56 = vpop.f32.mrb[32].mxu0 }
 0x4fb   : > { %v7893_v54 = vpop.f32.mrb[60].mxu1  ;;  %v7788_v45 = vpop.f32.mrb[33].mxu0 }
 0x4fc   : > { %v7789_v51 = vadd.f32 %v7788_v45, %v7787_v56  ;;  %v7894_v5 = vpop.f32.mrb[61].mxu1  ;;  %v7790_v35 = vpop.f32.mrb[34].mxu0 }
 0x4fd   : > { %v7895_v63 = vadd.f32 %v7894_v5, %v7893_v54  ;;  %v7896_v9 = vpop.f32.mrb[62].mxu1  ;;  %v7791_v11 = vpop.f32.mrb[35].mxu0  ;;  %v4915_v54 = vpack.c.bf16 %v4888_v31, %v4887_v60  ;;  %v4889_v5 = vld [vmem:[#allocation2 + $0xe9] sm:$0xff] }
 0x4fe   : > { %v7792_v17 = vadd.f32 %v7791_v11, %v7790_v35  ;;  %v7897_v21 = vpop.f32.mrb[63].mxu1  ;;  %v4890_v35 = vld [vmem:[#allocation2 + $0xf1] sm:$0xff]  ;;  %v4891_v11 = vld [vmem:[#allocation2 + $0x109] sm:$0xff] }
 0x4ff   : > { %v10995_v25 = vadd.f32 %v7895_v63, %v7783_v26  ;;  %v7898_v41 = vadd.f32 %v7897_v21, %v7896_v9  ;;  %5978 = vmatmul.mubr.bf16.gmra.mrb[140].mxu0 %v4877_v3  ;;  %v4916_v4 = vpack.c.bf16 %v4890_v35, %v4889_v5  ;;  %v4917_v16 = vpack.c.bf16 %v4892_v49, %v4891_v11 }
 0x500   : > { %6131 = vmatmul.mubr.bf16.gmra.mrb[168].mxu1 %v10941_v30  ;;  %8331 = vmatprep.mubr.bf16.mxu0 %v4911_v62 }
 0x501   : > { %v10998_v38 = vadd.f32 %v7898_v41, %v7786_v33  ;;  %6138 = vmatprep.mubr.bf16.mxu1 %v4878_v13 }
 0x502   : > { %v7793_v40 = vpop.f32.mrb[36].mxu0 }
 0x503   : > { %v7899_v22 = vpop.f32.mrb[64].mxu1  ;;  %v7794_v29 = vpop.f32.mrb[37].mxu0 }
 0x504   : > { %v7795_v34 = vadd.f32 %v7794_v29, %v7793_v40  ;;  %v7900_v20 = vpop.f32.mrb[65].mxu1  ;;  %v7796_v24 = vpop.f32.mrb[38].mxu0 }
 0x505   : > { %v7901_v23 = vadd.f32 %v7900_v20, %v7899_v22  ;;  %v7902_v55 = vpop.f32.mrb[66].mxu1  ;;  %v7797_v30 = vpop.f32.mrb[39].mxu0  ;;  %v4894_v20 = vld [vmem:[#allocation2 + $0x131] sm:$0xff] }
 0x506   : > { %v7798_v48 = vadd.f32 %v7797_v30, %v7796_v24  ;;  %v7903_v32 = vpop.f32.mrb[67].mxu1 }
 0x507   : > { %v11000_v0 = vadd.f32 %v7901_v23, %v7789_v51  ;;  %v7904_v1 = vadd.f32 %v7903_v32, %v7902_v55  ;;  %8332 = vmatmul.mubr.bf16.vlgmr.msra.gmra.mrb[144].mxu0 %v4912_v39  ;;  %v4895_v23 = vld [vmem:[#allocation2 + $0x149] sm:$0xff]  ;;  %v4896_v55 = vld [vmem:[#allocation2 + $0x151] sm:$0xff] }
 0x508   : > { %6139 = vmatmul.mubr.bf16.gmra.mrb[172].mxu1 %v4830_v14  ;;  %8335 = vmatprep.mubr.bf16.mxu0 %v4913_v36 }
 0x509   : > { %v11002_v46 = vadd.f32 %v7904_v1, %v7792_v17 }
 0x50a   : > { %v7799_v2 = vpop.f32.mrb[40].mxu0 }
 0x50b   : > { %v7905_v26 = vpop.f32.mrb[68].mxu1  ;;  %v7800_v6 = vpop.f32.mrb[41].mxu0 }
 0x50c   : > { %v7801_v61 = vadd.f32 %v7800_v6, %v7799_v2  ;;  %v7906_v47 = vpop.f32.mrb[69].mxu1  ;;  %v7802_v43 = vpop.f32.mrb[42].mxu0 }
 0x50d   : > { %v7907_v33 = vadd.f32 %v7906_v47, %v7905_v26  ;;  %v7908_v42 = vpop.f32.mrb[70].mxu1  ;;  %v7803_v57 = vpop.f32.mrb[43].mxu0  ;;  %v4919_v26 = vpack.c.bf16 %v4896_v55, %v4895_v23  ;;  %v4897_v47 = vld [vmem:[#allocation2 + $0x169] sm:$0xff] }
 0x50e   : > { %v7804_v3 = vadd.f32 %v7803_v57, %v7802_v43  ;;  %v7909_v56 = vpop.f32.mrb[71].mxu1  ;;  %v4898_v43 = vld [vmem:[#allocation2 + $0x171] sm:$0xff]  ;;  %v4899_v57 = vld [vmem:[#allocation2 + $0x189] sm:$0xff] }
 0x50f   : > { %v11004_v45 = vadd.f32 %v7907_v33, %v7795_v34  ;;  %v7910_v28 = vadd.f32 %v7909_v56, %v7908_v42  ;;  %8336 = vmatmul.mubr.bf16.gmra.mrb[148].mxu0 %v4914_v18  ;;  %v4893_v34 = vld [vmem:[#allocation2 + $0x129] sm:$0xff]  ;;  %v4900_v18 = vld [vmem:[#allocation2 + $0x191] sm:$0xff]  ;;  %v4920_v35 = vpack.c.bf16 %v4898_v43, %v4897_v47 }
 0x510   : > { %8339 = vmatprep.mubr.bf16.mxu0 %v4915_v54  ;;  %v4918_v2 = vpack.c.bf16 %v4894_v20, %v4893_v34  ;;  %v4921_v11 = vpack.c.bf16 %v4900_v18, %v4899_v57 }
 0x511   : > { %v11006_v44 = vadd.f32 %v7910_v28, %v7798_v48 }
 0x512   : > { %v7805_v51 = vpop.f32.mrb[44].mxu0 }
 0x513   : > { %v7911_v63 = vpop.f32.mrb[72].mxu1  ;;  %v7806_v9 = vpop.f32.mrb[45].mxu0 }
 0x514   : > { %v7807_v13 = vadd.f32 %v7806_v9, %v7805_v51  ;;  %v7912_v17 = vpop.f32.mrb[73].mxu1  ;;  %v7808_v21 = vpop.f32.mrb[46].mxu0 }
 0x515   : > { %v7913_v62 = vadd.f32 %v7912_v17, %v7911_v63  ;;  %v7914_v41 = vpop.f32.mrb[74].mxu1  ;;  %v7809_v10 = vpop.f32.mrb[47].mxu0 }
 0x516   : > { %v7810_v40 = vadd.f32 %v7809_v10, %v7808_v21  ;;  %v7915_v53 = vpop.f32.mrb[75].mxu1 }
 0x517   : > { %v11008_v22 = vadd.f32 %v7913_v62, %v7801_v61  ;;  %v7916_v29 = vadd.f32 %v7915_v53, %v7914_v41  ;;  %8340 = vmatmul.mubr.bf16.gmra.mrb[152].mxu0 %v4916_v4  ;;  %v4901_v62 = vld [vmem:[#allocation2 + $0x1a9] sm:$0xff]  ;;  %v4902_v41 = vld [vmem:[#allocation2 + $0x1b1] sm:$0xff] }
 0x518   : > { %8343 = vmatprep.mubr.bf16.mxu0 %v4917_v16  ;;  %v4904_v53 = vld [vmem:[#allocation2 + $0x1d1] sm:$0xff] }
 0x519   : > { %v11010_v7 = vadd.f32 %v7916_v29, %v7804_v3 }
 0x51a   : > { %v7811_v58 = vpop.f32.mrb[48].mxu0 }
 0x51b   : > { %v7917_v24 = vpop.f32.mrb[76].mxu1  ;;  %v7812_v14 = vpop.f32.mrb[49].mxu0 }
 0x51c   : > { %v7813_v30 = vadd.f32 %v7812_v14, %v7811_v58  ;;  %v7918_v39 = vpop.f32.mrb[77].mxu1  ;;  %v7814_v48 = vpop.f32.mrb[50].mxu0  ;;  %v4922_v14 = vpack.c.bf16 %v4902_v41, %v4901_v62 }
 0x51d   : > { %v7919_v32 = vadd.f32 %v7918_v39, %v7917_v24  ;;  %v7920_v36 = vpop.f32.mrb[78].mxu1  ;;  %v7815_v1 = vpop.f32.mrb[51].mxu0 }
 0x51e   : > { %v7816_v52 = vadd.f32 %v7815_v1, %v7814_v48  ;;  %v7921_v12 = vpop.f32.mrb[79].mxu1  ;;  %v4905_v1 = vld [vmem:[#allocation2 + $0x1e9] sm:$0xff] }
 0x51f   : > { %v11012_v6 = vadd.f32 %v7919_v32, %v7807_v13  ;;  %v7922_v60 = vadd.f32 %v7921_v12, %v7920_v36  ;;  %8344 = vmatmul.mubr.bf16.gmra.mrb[156].mxu0 %v4918_v2  ;;  %v4906_v2 = vld [vmem:[#allocation2 + $0x1f1] sm:$0xff] }
 0x520   : > { %8347 = vmatprep.mubr.bf16.mxu0 %v4919_v26 }
 0x521   : > { %v11014_v31 = vadd.f32 %v7922_v60, %v7810_v40  ;;  %v4903_v40 = vld [vmem:[#allocation2 + $0x1c9] sm:$0xff] }
 0x522   : > { %v7817_v61 = vpop.f32.mrb[52].mxu0 }
 0x523   : > { %v7923_v33 = vpop.f32.mrb[80].mxu1  ;;  %v7818_v42 = vpop.f32.mrb[53].mxu0 }
 0x524   : > { %v7819_v3 = vadd.f32 %v7818_v42, %v7817_v61  ;;  %v7924_v56 = vpop.f32.mrb[81].mxu1  ;;  %v7820_v54 = vpop.f32.mrb[54].mxu0  ;;  %v4924_v42 = vpack.c.bf16 %v4906_v2, %v4905_v1 }
 0x525   : > { %v7925_v28 = vadd.f32 %v7924_v56, %v7923_v33  ;;  %v7926_v51 = vpop.f32.mrb[82].mxu1  ;;  %v7821_v5 = vpop.f32.mrb[55].mxu0 }
 0x526   : > { %v7822_v63 = vadd.f32 %v7821_v5, %v7820_v54  ;;  %v7927_v9 = vpop.f32.mrb[83].mxu1  ;;  %v4909_v54 = vld [vmem:[#allocation2 + $0x229] sm:$0xff] }
 0x527   : > { %v11016_v49 = vadd.f32 %v7925_v28, %v7813_v30  ;;  %v7928_v13 = vadd.f32 %v7927_v9, %v7926_v51  ;;  %8348 = vmatmul.mubr.bf16.gmra.mrb[160].mxu0 %v4920_v35  ;;  %v4923_v30 = vpack.c.bf16 %v4904_v53, %v4903_v40  ;;  %v4910_v28 = vld [vmem:[#allocation2 + $0x231] sm:$0xff] }
 0x528   : > { %8351 = vmatprep.mubr.bf16.mxu0 %v4921_v11  ;;  %v4926_v9 = vpack.c.bf16 %v4910_v28, %v4909_v54 }
 0x529   : > { %v11018_v17 = vadd.f32 %v7928_v13, %v7816_v52 }
 0x52a   : > { %v7823_v21 = vpop.f32.mrb[56].mxu0 }
 0x52b   : > { %v7929_v10 = vpop.f32.mrb[84].mxu1  ;;  %v7824_v4 = vpop.f32.mrb[57].mxu0 }
 0x52c   : > { %v7825_v16 = vadd.f32 %v7824_v4, %v7823_v21  ;;  %v7930_v29 = vpop.f32.mrb[85].mxu1  ;;  %v7826_v58 = vpop.f32.mrb[58].mxu0 }
 0x52d   : > { %v7931_v34 = vadd.f32 %v7930_v29, %v7929_v10  ;;  %v7932_v20 = vpop.f32.mrb[86].mxu1  ;;  %v7827_v24 = vpop.f32.mrb[59].mxu0 }
 0x52e   : > { %v7828_v23 = vadd.f32 %v7827_v24, %v7826_v58  ;;  %v7933_v55 = vpop.f32.mrb[87].mxu1 }
 0x52f   : > { %v11020_v39 = vadd.f32 %v7931_v34, %v7819_v3  ;;  %v7934_v48 = vadd.f32 %v7933_v55, %v7932_v20  ;;  %8352 = vmatmul.mubr.bf16.gmra.mrb[164].mxu0 %v4922_v14 }
 0x530   : > { %8355 = vmatprep.mubr.bf16.mxu0 %v4923_v30 }
 0x531   : > { %v11022_v32 = vadd.f32 %v7934_v48, %v7822_v63 }
 0x532   : > { %v7829_v36 = vpop.f32.mrb[60].mxu0 }
 0x533   : > { %v7935_v52 = vpop.f32.mrb[88].mxu1  ;;  %v7830_v12 = vpop.f32.mrb[61].mxu0 }
 0x534   : > { %v7831_v26 = vadd.f32 %v7830_v12, %v7829_v36  ;;  %v7936_v60 = vpop.f32.mrb[89].mxu1  ;;  %v7832_v61 = vpop.f32.mrb[62].mxu0 }
 0x535   : > { %v7937_v47 = vadd.f32 %v7936_v60, %v7935_v52  ;;  %v7938_v43 = vpop.f32.mrb[90].mxu1  ;;  %v7833_v33 = vpop.f32.mrb[63].mxu0 }
 0x536   : > { %v7834_v57 = vadd.f32 %v7833_v33, %v7832_v61  ;;  %v7939_v18 = vpop.f32.mrb[91].mxu1 }
 0x537   : > { %v11024_v3 = vadd.f32 %v7937_v47, %v7825_v16  ;;  %v7940_v56 = vadd.f32 %v7939_v18, %v7938_v43  ;;  %8356 = vmatmul.mubr.bf16.gmra.mrb[168].mxu0 %v4924_v42 }
 0x538   : > { %8359 = vmatprep.mubr.bf16.mxu0 %v10987_v8 }
 0x539   : > { %v11027_v51 = vadd.f32 %v7940_v56, %v7828_v23 }
 0x53a   : > { %v7835_v5 = vpop.f32.mrb[64].mxu0 }
 0x53b   : > { %v7941_v35 = vpop.f32.mrb[92].mxu1  ;;  %v7836_v63 = vpop.f32.mrb[65].mxu0 }
 0x53c   : > { %v7837_v11 = vadd.f32 %v7836_v63, %v7835_v5  ;;  %v7942_v13 = vpop.f32.mrb[93].mxu1  ;;  %v7838_v21 = vpop.f32.mrb[66].mxu0 }
 0x53d   : > { %v7943_v62 = vadd.f32 %v7942_v13, %v7941_v35  ;;  %v7944_v41 = vpop.f32.mrb[94].mxu1  ;;  %v7839_v10 = vpop.f32.mrb[67].mxu0 }
 0x53e   : > { %v7840_v4 = vadd.f32 %v7839_v10, %v7838_v21  ;;  %v7945_v40 = vpop.f32.mrb[95].mxu1 }
 0x53f   : > { %v11029_v53 = vadd.f32 %v7943_v62, %v7831_v26  ;;  %v7946_v16 = vadd.f32 %v7945_v40, %v7944_v41  ;;  %8360 = vmatmul.mubr.bf16.gmra.mrb[172].mxu0 %v4926_v9 }
 0x541   : > { %v11031_v8 = vadd.f32 %v7946_v16, %v7834_v57 }
 0x542   : > { %v7841_v29 = vpop.f32.mrb[68].mxu0 }
 0x543   : > { %v7947_v58 = vpop.f32.mrb[96].mxu1  ;;  %v7842_v34 = vpop.f32.mrb[69].mxu0 }
 0x544   : > { %v7843_v20 = vadd.f32 %v7842_v34, %v7841_v29  ;;  %v7948_v24 = vpop.f32.mrb[97].mxu1  ;;  %v7844_v14 = vpop.f32.mrb[70].mxu0 }
 0x545   : > { %v7949_v23 = vadd.f32 %v7948_v24, %v7947_v58  ;;  %v7950_v55 = vpop.f32.mrb[98].mxu1  ;;  %v7845_v30 = vpop.f32.mrb[71].mxu0 }
 0x546   : > { %v7846_v48 = vadd.f32 %v7845_v30, %v7844_v14  ;;  %v7951_v36 = vpop.f32.mrb[99].mxu1 }
 0x547   : > { %v11033_v1 = vadd.f32 %v7949_v23, %v7837_v11  ;;  %v7952_v2 = vadd.f32 %v7951_v36, %v7950_v55 }
 0x549   : > { %v11035_v52 = vadd.f32 %v7952_v2, %v7840_v4 }
 0x54a   : > { %v7847_v12 = vpop.f32.mrb[72].mxu0 }
 0x54b   : > { %v7953_v26 = vpop.f32.mrb[100].mxu1  ;;  %v7848_v60 = vpop.f32.mrb[73].mxu0 }
 0x54c   : > { %v7849_v61 = vadd.f32 %v7848_v60, %v7847_v12  ;;  %v7954_v47 = vpop.f32.mrb[101].mxu1  ;;  %v7850_v43 = vpop.f32.mrb[74].mxu0 }
 0x54d   : > { %v7955_v33 = vadd.f32 %v7954_v47, %v7953_v26  ;;  %v7956_v42 = vpop.f32.mrb[102].mxu1  ;;  %v7851_v57 = vpop.f32.mrb[75].mxu0 }
 0x54e   : > { %v7852_v18 = vadd.f32 %v7851_v57, %v7850_v43  ;;  %v7957_v56 = vpop.f32.mrb[103].mxu1 }
 0x54f   : > { %v11037_v54 = vadd.f32 %v7955_v33, %v7843_v20  ;;  %v7958_v28 = vadd.f32 %v7957_v56, %v7956_v42 }
 0x551   : > { %v11039_v5 = vadd.f32 %v7958_v28, %v7846_v48 }
 0x552   : > { %v7853_v35 = vpop.f32.mrb[76].mxu0 }
 0x553   : > { %v7959_v63 = vpop.f32.mrb[104].mxu1  ;;  %v7854_v9 = vpop.f32.mrb[77].mxu0 }
 0x554   : > { %v7855_v11 = vadd.f32 %v7854_v9, %v7853_v35  ;;  %v7960_v13 = vpop.f32.mrb[105].mxu1  ;;  %v7856_v21 = vpop.f32.mrb[78].mxu0 }
 0x555   : > { %v7961_v62 = vadd.f32 %v7960_v13, %v7959_v63  ;;  %v7962_v41 = vpop.f32.mrb[106].mxu1  ;;  %v7857_v10 = vpop.f32.mrb[79].mxu0 }
 0x556   : > { %v7858_v4 = vadd.f32 %v7857_v10, %v7856_v21  ;;  %v7963_v40 = vpop.f32.mrb[107].mxu1 }
 0x557   : > { %v11041_v16 = vadd.f32 %v7961_v62, %v7849_v61  ;;  %v7964_v29 = vadd.f32 %v7963_v40, %v7962_v41 }
 0x559   : > { %v11043_v58 = vadd.f32 %v7964_v29, %v7852_v18 }
 0x55a   : > { %v7987_v34 = vpop.f32.mrb[80].mxu0 }
 0x55b   : > { %v7965_v20 = vpop.f32.mrb[108].mxu1  ;;  %v7988_v24 = vpop.f32.mrb[81].mxu0 }
 0x55c   : > { %v7966_v14 = vpop.f32.mrb[109].mxu1  ;;  %v7989_v23 = vadd.f32 %v7988_v24, %v7987_v34  ;;  %v7990_v55 = vpop.f32.mrb[82].mxu0 }
 0x55d   : > { %v7967_v30 = vadd.f32 %v7966_v14, %v7965_v20  ;;  %v7968_v48 = vpop.f32.mrb[110].mxu1  ;;  %v7991_v36 = vpop.f32.mrb[83].mxu0 }
 0x55e   : > { %v5860_v2 = vadd.f32 %v7989_v23, %v10974_v27  ;;  %v7969_v12 = vpop.f32.mrb[111].mxu1  ;;  %v7992_v26 = vadd.f32 %v7991_v36, %v7990_v55 }
 0x55f   : > { %v11046_v60 = vadd.f32 %v7967_v30, %v7855_v11  ;;  %v7970_v61 = vadd.f32 %v7969_v12, %v7968_v48 }
 0x560   : > { %v5863_v47 = vadd.f32 %v7992_v26, %v10979_v15 }
 0x561   : > { %v11049_v43 = vadd.f32 %v7970_v61, %v7858_v4 }
 0x562   : > { %v7993_v33 = vpop.f32.mrb[84].mxu0 }
 0x563   : > { %v8099_v42 = vpop.f32.mrb[112].mxu1  ;;  %v7994_v57 = vpop.f32.mrb[85].mxu0 }
 0x564   : > { %v7995_v18 = vadd.f32 %v7994_v57, %v7993_v33  ;;  %v8100_v56 = vpop.f32.mrb[113].mxu1  ;;  %v7996_v28 = vpop.f32.mrb[86].mxu0 }
 0x565   : > { %v8101_v35 = vadd.f32 %v8100_v56, %v8099_v42  ;;  %v8102_v63 = vpop.f32.mrb[114].mxu1  ;;  %v7997_v9 = vpop.f32.mrb[87].mxu0 }
 0x566   : > { %v5868_v27 = vadd.f32 %v7995_v18, %v10981_v37  ;;  %v7998_v13 = vadd.f32 %v7997_v9, %v7996_v28  ;;  %v8103_v21 = vpop.f32.mrb[115].mxu1 }
 0x567   : > { %v8104_v11 = vadd.f32 %v8103_v21, %v8102_v63  ;;  %v11052_v62 = vadd.f32 %v8101_v35, %v5860_v2 }
 0x568   : > { %v5871_v15 = vadd.f32 %v7998_v13, %v10985_v50 }
 0x569   : > { %v11055_v41 = vadd.f32 %v8104_v11, %v5863_v47 }
 0x56a   : > { %v7999_v10 = vpop.f32.mrb[88].mxu0 }
 0x56b   : > { %v8105_v4 = vpop.f32.mrb[116].mxu1  ;;  %v8000_v40 = vpop.f32.mrb[89].mxu0 }
 0x56c   : > { %v8001_v29 = vadd.f32 %v8000_v40, %v7999_v10  ;;  %v8106_v34 = vpop.f32.mrb[117].mxu1  ;;  %v8002_v20 = vpop.f32.mrb[90].mxu0 }
 0x56d   : > { %v8107_v24 = vadd.f32 %v8106_v34, %v8105_v4  ;;  %v8108_v14 = vpop.f32.mrb[118].mxu1  ;;  %v8003_v23 = vpop.f32.mrb[91].mxu0 }
 0x56e   : > { %v5876_v37 = vadd.f32 %v8001_v29, %v10989_v59  ;;  %v8004_v55 = vadd.f32 %v8003_v23, %v8002_v20  ;;  %v8109_v30 = vpop.f32.mrb[119].mxu1 }
 0x56f   : > { %v8110_v48 = vadd.f32 %v8109_v30, %v8108_v14  ;;  %v11058_v36 = vadd.f32 %v8107_v24, %v5868_v27 }
 0x570   : > { %v5879_v50 = vadd.f32 %v8004_v55, %v10993_v19 }
 0x571   : > { %v11061_v2 = vadd.f32 %v8110_v48, %v5871_v15 }
 0x572   : > { %v8005_v12 = vpop.f32.mrb[92].mxu0 }
 0x573   : > { %v8111_v26 = vpop.f32.mrb[120].mxu1  ;;  %v8006_v61 = vpop.f32.mrb[93].mxu0 }
 0x574   : > { %v8007_v47 = vadd.f32 %v8006_v61, %v8005_v12  ;;  %v8112_v33 = vpop.f32.mrb[121].mxu1  ;;  %v8008_v42 = vpop.f32.mrb[94].mxu0 }
 0x575   : > { %v8113_v57 = vadd.f32 %v8112_v33, %v8111_v26  ;;  %v8114_v18 = vpop.f32.mrb[122].mxu1  ;;  %v8009_v56 = vpop.f32.mrb[95].mxu0 }
 0x576   : > { %v5884_v59 = vadd.f32 %v8007_v47, %v10995_v25  ;;  %v8010_v28 = vadd.f32 %v8009_v56, %v8008_v42  ;;  %v8115_v35 = vpop.f32.mrb[123].mxu1 }
 0x577   : > { %v8116_v63 = vadd.f32 %v8115_v35, %v8114_v18  ;;  %v11064_v9 = vadd.f32 %v8113_v57, %v5876_v37 }
 0x578   : > { %v5887_v19 = vadd.f32 %v8010_v28, %v10998_v38 }
 0x579   : > { %v11067_v27 = vadd.f32 %v8116_v63, %v5879_v50 }
 0x57a   : > { %v8011_v13 = vpop.f32.mrb[96].mxu0 }
 0x57b   : > { %v8117_v21 = vpop.f32.mrb[124].mxu1  ;;  %v8012_v11 = vpop.f32.mrb[97].mxu0 }
 0x57c   : > { %v8013_v15 = vadd.f32 %v8012_v11, %v8011_v13  ;;  %v8118_v10 = vpop.f32.mrb[125].mxu1  ;;  %v8014_v4 = vpop.f32.mrb[98].mxu0 }
 0x57d   : > { %v8119_v40 = vadd.f32 %v8118_v10, %v8117_v21  ;;  %v8120_v29 = vpop.f32.mrb[126].mxu1  ;;  %v8015_v34 = vpop.f32.mrb[99].mxu0 }
 0x57e   : > { %v5892_v25 = vadd.f32 %v8013_v15, %v11000_v0  ;;  %v8016_v20 = vadd.f32 %v8015_v34, %v8014_v4  ;;  %v8121_v24 = vpop.f32.mrb[127].mxu1 }
 0x57f   : > { %v8122_v14 = vadd.f32 %v8121_v24, %v8120_v29  ;;  %v11070_v23 = vadd.f32 %v8119_v40, %v5884_v59 }
 0x580   : > { %v5895_v38 = vadd.f32 %v8016_v20, %v11002_v46 }
 0x581   : > { %v11073_v37 = vadd.f32 %v8122_v14, %v5887_v19 }
 0x582   : > { %v8017_v55 = vpop.f32.mrb[100].mxu0 }
 0x583   : > { %v8123_v30 = vpop.f32.mrb[128].mxu1  ;;  %v8018_v48 = vpop.f32.mrb[101].mxu0 }
 0x584   : > { %v8019_v50 = vadd.f32 %v8018_v48, %v8017_v55  ;;  %v8124_v12 = vpop.f32.mrb[129].mxu1  ;;  %v8020_v26 = vpop.f32.mrb[102].mxu0 }
 0x585   : > { %v8125_v61 = vadd.f32 %v8124_v12, %v8123_v30  ;;  %v8126_v47 = vpop.f32.mrb[130].mxu1  ;;  %v8021_v33 = vpop.f32.mrb[103].mxu0 }
 0x586   : > { %v5900_v0 = vadd.f32 %v8019_v50, %v11004_v45  ;;  %v8022_v42 = vadd.f32 %v8021_v33, %v8020_v26  ;;  %v8127_v57 = vpop.f32.mrb[131].mxu1 }
 0x587   : > { %v8128_v18 = vadd.f32 %v8127_v57, %v8126_v47  ;;  %v11076_v56 = vadd.f32 %v8125_v61, %v5892_v25 }
 0x588   : > { %v5903_v46 = vadd.f32 %v8022_v42, %v11006_v44 }
 0x589   : > { %v11079_v59 = vadd.f32 %v8128_v18, %v5895_v38 }
 0x58a   : > { %v8023_v28 = vpop.f32.mrb[104].mxu0 }
 0x58b   : > { %v8129_v35 = vpop.f32.mrb[132].mxu1  ;;  %v8024_v63 = vpop.f32.mrb[105].mxu0 }
 0x58c   : > { %v8025_v19 = vadd.f32 %v8024_v63, %v8023_v28  ;;  %v8130_v13 = vpop.f32.mrb[133].mxu1  ;;  %v8026_v21 = vpop.f32.mrb[106].mxu0 }
 0x58d   : > { %v8131_v11 = vadd.f32 %v8130_v13, %v8129_v35  ;;  %v8132_v15 = vpop.f32.mrb[134].mxu1  ;;  %v8027_v10 = vpop.f32.mrb[107].mxu0 }
 0x58e   : > { %v5908_v45 = vadd.f32 %v8025_v19, %v11008_v22  ;;  %v8028_v4 = vadd.f32 %v8027_v10, %v8026_v21  ;;  %v8133_v40 = vpop.f32.mrb[135].mxu1 }
 0x58f   : > { %v8134_v29 = vadd.f32 %v8133_v40, %v8132_v15  ;;  %v11082_v34 = vadd.f32 %v8131_v11, %v5900_v0 }
 0x590   : > { %v5911_v44 = vadd.f32 %v8028_v4, %v11010_v7 }
 0x591   : > { %v11085_v25 = vadd.f32 %v8134_v29, %v5903_v46 }
 0x592   : > { %v8029_v20 = vpop.f32.mrb[108].mxu0 }
 0x593   : > { %v8135_v24 = vpop.f32.mrb[136].mxu1  ;;  %v8030_v14 = vpop.f32.mrb[109].mxu0 }
 0x594   : > { %v8031_v38 = vadd.f32 %v8030_v14, %v8029_v20  ;;  %v8136_v55 = vpop.f32.mrb[137].mxu1  ;;  %v8032_v30 = vpop.f32.mrb[110].mxu0 }
 0x595   : > { %v8137_v48 = vadd.f32 %v8136_v55, %v8135_v24  ;;  %v8138_v50 = vpop.f32.mrb[138].mxu1  ;;  %v8033_v12 = vpop.f32.mrb[111].mxu0 }
 0x596   : > { %v5916_v22 = vadd.f32 %v8031_v38, %v11012_v6  ;;  %v8034_v26 = vadd.f32 %v8033_v12, %v8032_v30  ;;  %v8139_v61 = vpop.f32.mrb[139].mxu1 }
 0x597   : > { %v8140_v47 = vadd.f32 %v8139_v61, %v8138_v50  ;;  %v11088_v33 = vadd.f32 %v8137_v48, %v5908_v45 }
 0x598   : > { %v5919_v7 = vadd.f32 %v8034_v26, %v11014_v31 }
 0x599   : > { %v11091_v0 = vadd.f32 %v8140_v47, %v5911_v44 }
 0x59a   : > { %v8035_v42 = vpop.f32.mrb[112].mxu0 }
 0x59b   : > { %v8141_v57 = vpop.f32.mrb[140].mxu1  ;;  %v8036_v18 = vpop.f32.mrb[113].mxu0 }
 0x59c   : > { %v8037_v46 = vadd.f32 %v8036_v18, %v8035_v42  ;;  %v8142_v28 = vpop.f32.mrb[141].mxu1  ;;  %v8038_v35 = vpop.f32.mrb[114].mxu0 }
 0x59d   : > { %v8143_v63 = vadd.f32 %v8142_v28, %v8141_v57  ;;  %v8144_v19 = vpop.f32.mrb[142].mxu1  ;;  %v8039_v13 = vpop.f32.mrb[115].mxu0 }
 0x59e   : > { %v5924_v6 = vadd.f32 %v8037_v46, %v11016_v49  ;;  %v8040_v21 = vadd.f32 %v8039_v13, %v8038_v35  ;;  %v8145_v11 = vpop.f32.mrb[143].mxu1 }
 0x59f   : > { %v8146_v15 = vadd.f32 %v8145_v11, %v8144_v19  ;;  %v11094_v10 = vadd.f32 %v8143_v63, %v5916_v22 }
 0x5a0   : > { %v5927_v31 = vadd.f32 %v8040_v21, %v11018_v17 }
 0x5a1   : > { %v11097_v45 = vadd.f32 %v8146_v15, %v5919_v7 }
 0x5a2   : > { %v8041_v4 = vpop.f32.mrb[116].mxu0 }
 0x5a3   : > { %v8147_v40 = vpop.f32.mrb[144].mxu1  ;;  %v8042_v29 = vpop.f32.mrb[117].mxu0 }
 0x5a4   : > { %v8043_v44 = vadd.f32 %v8042_v29, %v8041_v4  ;;  %v8148_v20 = vpop.f32.mrb[145].mxu1  ;;  %v8044_v24 = vpop.f32.mrb[118].mxu0 }
 0x5a5   : > { %v8149_v14 = vadd.f32 %v8148_v20, %v8147_v40  ;;  %v8150_v38 = vpop.f32.mrb[146].mxu1  ;;  %v8045_v55 = vpop.f32.mrb[119].mxu0 }
 0x5a6   : > { %v5932_v49 = vadd.f32 %v8043_v44, %v11020_v39  ;;  %v8046_v30 = vadd.f32 %v8045_v55, %v8044_v24  ;;  %v8151_v48 = vpop.f32.mrb[147].mxu1 }
 0x5a7   : > { %v8152_v50 = vadd.f32 %v8151_v48, %v8150_v38  ;;  %v11100_v12 = vadd.f32 %v8149_v14, %v5924_v6 }
 0x5a8   : > { %v5935_v17 = vadd.f32 %v8046_v30, %v11022_v32 }
 0x5a9   : > { %v11103_v22 = vadd.f32 %v8152_v50, %v5927_v31 }
 0x5aa   : > { %v8047_v26 = vpop.f32.mrb[120].mxu0 }
 0x5ab   : > { %v8153_v61 = vpop.f32.mrb[148].mxu1  ;;  %v8048_v47 = vpop.f32.mrb[121].mxu0 }
 0x5ac   : > { %v8049_v7 = vadd.f32 %v8048_v47, %v8047_v26  ;;  %v8154_v42 = vpop.f32.mrb[149].mxu1  ;;  %v8050_v57 = vpop.f32.mrb[122].mxu0 }
 0x5ad   : > { %v8155_v18 = vadd.f32 %v8154_v42, %v8153_v61  ;;  %v8156_v46 = vpop.f32.mrb[150].mxu1  ;;  %v8051_v28 = vpop.f32.mrb[123].mxu0 }
 0x5ae   : > { %v5940_v39 = vadd.f32 %v8049_v7, %v11024_v3  ;;  %v8052_v35 = vadd.f32 %v8051_v28, %v8050_v57  ;;  %v8157_v63 = vpop.f32.mrb[151].mxu1 }
 0x5af   : > { %v8158_v19 = vadd.f32 %v8157_v63, %v8156_v46  ;;  %v11106_v13 = vadd.f32 %v8155_v18, %v5932_v49 }
 0x5b0   : > { %v5943_v32 = vadd.f32 %v8052_v35, %v11027_v51 }
 0x5b1   : > { %v11109_v6 = vadd.f32 %v8158_v19, %v5935_v17 }
 0x5b2   : > { %v8053_v21 = vpop.f32.mrb[124].mxu0 }
 0x5b3   : > { %v8159_v11 = vpop.f32.mrb[152].mxu1  ;;  %v8054_v15 = vpop.f32.mrb[125].mxu0 }
 0x5b4   : > { %v8055_v31 = vadd.f32 %v8054_v15, %v8053_v21  ;;  %v8160_v4 = vpop.f32.mrb[153].mxu1  ;;  %v8056_v40 = vpop.f32.mrb[126].mxu0 }
 0x5b5   : > { %v8161_v29 = vadd.f32 %v8160_v4, %v8159_v11  ;;  %v8162_v44 = vpop.f32.mrb[154].mxu1  ;;  %v8057_v20 = vpop.f32.mrb[127].mxu0 }
 0x5b6   : > { %v5948_v3 = vadd.f32 %v8055_v31, %v11029_v53  ;;  %v8058_v24 = vadd.f32 %v8057_v20, %v8056_v40  ;;  %v8163_v14 = vpop.f32.mrb[155].mxu1 }
 0x5b7   : > { %v8164_v38 = vadd.f32 %v8163_v14, %v8162_v44  ;;  %v11112_v55 = vadd.f32 %v8161_v29, %v5940_v39 }
 0x5b8   : > { %v5951_v51 = vadd.f32 %v8058_v24, %v11031_v8 }
 0x5b9   : > { %v11115_v49 = vadd.f32 %v8164_v38, %v5943_v32 }
 0x5ba   : > { %v8059_v30 = vpop.f32.mrb[128].mxu0 }
 0x5bb   : > { %v8165_v48 = vpop.f32.mrb[156].mxu1  ;;  %v8060_v50 = vpop.f32.mrb[129].mxu0 }
 0x5bc   : > { %v8061_v17 = vadd.f32 %v8060_v50, %v8059_v30  ;;  %v8166_v26 = vpop.f32.mrb[157].mxu1  ;;  %v8062_v61 = vpop.f32.mrb[130].mxu0 }
 0x5bd   : > { %v8167_v47 = vadd.f32 %v8166_v26, %v8165_v48  ;;  %v8168_v7 = vpop.f32.mrb[158].mxu1  ;;  %v8063_v42 = vpop.f32.mrb[131].mxu0 }
 0x5be   : > { %v5956_v53 = vadd.f32 %v8061_v17, %v11033_v1  ;;  %v8064_v57 = vadd.f32 %v8063_v42, %v8062_v61  ;;  %v8169_v18 = vpop.f32.mrb[159].mxu1 }
 0x5bf   : > { %v8170_v46 = vadd.f32 %v8169_v18, %v8168_v7  ;;  %v11118_v28 = vadd.f32 %v8167_v47, %v5948_v3 }
 0x5c0   : > { %v5959_v8 = vadd.f32 %v8064_v57, %v11035_v52 }
 0x5c1   : > { %v11121_v39 = vadd.f32 %v8170_v46, %v5951_v51 }
 0x5c2   : > { %v8065_v35 = vpop.f32.mrb[132].mxu0 }
 0x5c3   : > { %v8171_v63 = vpop.f32.mrb[160].mxu1  ;;  %v8066_v19 = vpop.f32.mrb[133].mxu0 }
 0x5c4   : > { %v8067_v32 = vadd.f32 %v8066_v19, %v8065_v35  ;;  %v8172_v21 = vpop.f32.mrb[161].mxu1  ;;  %v8068_v11 = vpop.f32.mrb[134].mxu0 }
 0x5c5   : > { %v8173_v15 = vadd.f32 %v8172_v21, %v8171_v63  ;;  %v8174_v31 = vpop.f32.mrb[162].mxu1  ;;  %v8069_v4 = vpop.f32.mrb[135].mxu0 }
 0x5c6   : > { %v5964_v1 = vadd.f32 %v8067_v32, %v11037_v54  ;;  %v8070_v40 = vadd.f32 %v8069_v4, %v8068_v11  ;;  %v8175_v29 = vpop.f32.mrb[163].mxu1 }
 0x5c7   : > { %v8176_v44 = vadd.f32 %v8175_v29, %v8174_v31  ;;  %v11124_v20 = vadd.f32 %v8173_v15, %v5956_v53  ;;  %v11144_v29 = vld [vmem:[%s11306_s8] ss:$0 sm:$0xff] }
 0x5c8   : > { %v5967_v52 = vadd.f32 %v8070_v40, %v11039_v5 }
 0x5c9   : > { %v11127_v3 = vadd.f32 %v8176_v44, %v5959_v8 }
 0x5ca   : > { %v8071_v24 = vpop.f32.mrb[136].mxu0 }
 0x5cb   : > { %v8177_v14 = vpop.f32.mrb[164].mxu1  ;;  %v8072_v38 = vpop.f32.mrb[137].mxu0 }
 0x5cc   : > { %v8073_v51 = vadd.f32 %v8072_v38, %v8071_v24  ;;  %v8178_v30 = vpop.f32.mrb[165].mxu1  ;;  %v8074_v48 = vpop.f32.mrb[138].mxu0 }
 0x5cd   : > { %v8179_v50 = vadd.f32 %v8178_v30, %v8177_v14  ;;  %v8180_v17 = vpop.f32.mrb[166].mxu1  ;;  %v8075_v26 = vpop.f32.mrb[139].mxu0 }
 0x5ce   : > { %v5972_v54 = vadd.f32 %v8073_v51, %v11041_v16  ;;  %v8076_v61 = vadd.f32 %v8075_v26, %v8074_v48  ;;  %v8181_v47 = vpop.f32.mrb[167].mxu1 }
 0x5cf   : > { %v8182_v7 = vadd.f32 %v8181_v47, %v8180_v17  ;;  %v11130_v42 = vadd.f32 %v8179_v50, %v5964_v1 }
 0x5d0   : > { %v5975_v5 = vadd.f32 %v8076_v61, %v11043_v58 }
 0x5d1   : > { %v11133_v53 = vadd.f32 %v8182_v7, %v5967_v52 }
 0x5d2   : > { %v8077_v57 = vpop.f32.mrb[140].mxu0 }
 0x5d3   : > { %v8183_v18 = vpop.f32.mrb[168].mxu1  ;;  %v8078_v46 = vpop.f32.mrb[141].mxu0 }
 0x5d4   : > { %v8079_v8 = vadd.f32 %v8078_v46, %v8077_v57  ;;  %v8184_v35 = vpop.f32.mrb[169].mxu1  ;;  %v8080_v63 = vpop.f32.mrb[142].mxu0  ;;  %v8651_v46 = vld [vmem:[#allocation3 + $0x28] sm:$0xff] }
 0x5d5   : > { %v8185_v19 = vadd.f32 %v8184_v35, %v8183_v18  ;;  %v8186_v32 = vpop.f32.mrb[170].mxu1  ;;  %v8081_v21 = vpop.f32.mrb[143].mxu0 }
 0x5d6   : > { %v5980_v16 = vadd.f32 %v8079_v8, %v11046_v60  ;;  %v8082_v11 = vadd.f32 %v8081_v21, %v8080_v63  ;;  %v8187_v15 = vpop.f32.mrb[171].mxu1 }
 0x5d7   : > { %v8188_v31 = vadd.f32 %v8187_v15, %v8186_v32  ;;  %v11136_v4 = vadd.f32 %v8185_v19, %v5972_v54  ;;  %v8652_v32 = vld [vmem:[#allocation3 + $0x48] sm:$0xff] }
 0x5d8   : > { %v5983_v58 = vadd.f32 %v8082_v11, %v11049_v43  ;;  %v11152_v43 = vld [vmem:[%s11307_s9] ss:$0 sm:$0xff] }
 0x5d9   : > { %v11139_v1 = vadd.f32 %v8188_v31, %v5975_v5 }
 0x5da   : > { %v8333_v40 = vpop.f32.mrb[144].mxu0 }
 0x5db   : > { %v8189_v44 = vpop.f32.mrb[172].mxu1  ;;  %v6190_v52 = vadd.f32 %v8333_v40, %v11058_v36  ;;  %v6181_v24 = vpop.f32.mrb[145].mxu0  ;;  %v8654_v40 = vld [vmem:[#allocation3 + $0x50] sm:$0xff] }
 0x5dc   : > { %v8190_v60 = vpop.f32.mrb[173].mxu1  ;;  %v6182_v14 = vadd.f32 %v6181_v24, %v11052_v62  ;;  %v8334_v38 = vpop.f32.mrb[146].mxu0 }
 0x5dd   : > { %v6317_v51 = vmul.f32 %v11144_v29, %v6190_v52  ;;  %v8191_v30 = vadd.f32 %v8190_v60, %v8189_v44  ;;  %v8192_v48 = vpop.f32.mrb[174].mxu1  ;;  %v6193_v50 = vadd.f32 %v8334_v38, %v11061_v2  ;;  %v6184_v17 = vpop.f32.mrb[147].mxu0 }
 0x5de   : > { %v6315_v26 = vmul.f32 %v11144_v29, %v6182_v14  ;;  %v8193_v36 = vpop.f32.mrb[175].mxu1  ;;  %v6185_v54 = vadd.f32 %v6184_v17, %v11055_v41 }
 0x5df   : > { %v6318_v62 = vmul.f32 %v11144_v29, %v6193_v50  ;;  %v8194_v61 = vadd.f32 %v8193_v36, %v8192_v48  ;;  %v11158_v47 = vadd.f32 %v8191_v30, %v5980_v16  ;;  %v6356_v7 = vadd.f32 %v11152_v43, %v6317_v51  ;;  %v8653_v16 = vld [vmem:[#allocation3 + $0x30] sm:$0xff] }
 0x5e0   : > { %v6354_v5 = vadd.f32 %v11152_v43, %v6315_v26  ;;  %v6316_v57 = vmul.f32 %v11144_v29, %v6185_v54  ;;  %v8655_v54 = vld [vmem:[#allocation3 + $0x68] sm:$0xff] }
 0x5e1   : > { %v6357_v18 = vadd.f32 %v11152_v43, %v6318_v62  ;;  %v11164_v2 = vadd.f32 %v8194_v61, %v5983_v58  ;;  %v6388_v21 = vadd.f32 %v8652_v32, %v6356_v7  ;;  %v8658_v32 = vld [vmem:[#allocation3 + $0x90] sm:$0xff] }
 0x5e2   : > { %v6386_v8 = vadd.f32 %v8651_v46, %v6354_v5  ;;  %v6355_v35 = vadd.f32 %v11152_v43, %v6316_v57  ;;  %v8337_v41 = vpop.f32.mrb[148].mxu0 }
 0x5e3   : > { %v6206_v63 = vadd.f32 %v8337_v41, %v11070_v23  ;;  %v6197_v19 = vpop.f32.mrb[149].mxu0  ;;  %v6389_v44 = vadd.f32 %v8654_v40, %v6357_v18  ;;  %v6420_v48 = vmax.f32 %v6388_v21, 0.0 }
 0x5e4   : > { %v6387_v11 = vadd.f32 %v8653_v16, %v6355_v35  ;;  %v6198_v15 = vadd.f32 %v6197_v19, %v11064_v9  ;;  %v8338_v31 = vpop.f32.mrb[150].mxu0  ;;  %v6418_v60 = vmax.f32 %v6386_v8, 0.0  ;;  %v8657_v35 = vld [vmem:[#allocation3 + $0x70] sm:$0xff] }
 0x5e5   : > { %v6321_v58 = vmul.f32 %v11144_v29, %v6206_v63  ;;  %v6209_v52 = vadd.f32 %v8338_v31, %v11073_v37  ;;  %v6200_v24 = vpop.f32.mrb[151].mxu0  ;;  %v6421_v37 = vmax.f32 %v6389_v44, 0.0 }
 0x5e6   : > { %v6419_v14 = vmax.f32 %v6387_v11, 0.0  ;;  %v6319_v38 = vmul.f32 %v11144_v29, %v6198_v15  ;;  %v6201_v23 = vadd.f32 %v6200_v24, %v11067_v27  ;;  %v8656_v27 = vld [vmem:[#allocation3 + $0x88] sm:$0xff] }
 0x5e7   : > { %v6360_v51 = vadd.f32 %v11152_v43, %v6321_v58  ;;  %v6322_v30 = vmul.f32 %v11144_v29, %v6209_v52 }
 0x5e8   : > { %v6450_v9 = vadd.f32 %v6419_v14, %v6418_v60  ;;  %v6358_v50 = vadd.f32 %v11152_v43, %v6319_v38  ;;  %v6320_v17 = vmul.f32 %v11144_v29, %v6201_v23 }
 0x5e9   : > { %v6361_v26 = vadd.f32 %v11152_v43, %v6322_v30  ;;  %v6392_v5 = vadd.f32 %v8656_v27, %v6360_v51  ;;  %v8659_v51 = vld [vmem:[#allocation3 + $0xa8] sm:$0xff]  ;;  %v8662_v27 = vld [vmem:[#allocation3 + $0xd0] sm:$0xff] }
 0x5ea   : > { %v6451_v36 = vadd.f32 %v6450_v9, %v6420_v48  ;;  %v6390_v62 = vadd.f32 %v8655_v54, %v6358_v50  ;;  %v6359_v61 = vadd.f32 %v11152_v43, %v6320_v17  ;;  %v8341_v7 = vpop.f32.mrb[152].mxu0  ;;  %v8661_v54 = vld [vmem:[#allocation3 + $0xb0] sm:$0xff] }
 0x5eb   : > { %v6222_v57 = vadd.f32 %v8341_v7, %v11082_v34  ;;  %v6213_v18 = vpop.f32.mrb[153].mxu0  ;;  %v6393_v21 = vadd.f32 %v8658_v32, %v6361_v26  ;;  %v6424_v24 = vmax.f32 %v6392_v5, 0.0 }
 0x5ec   : > { %v6422_v46 = vmax.f32 %v6390_v62, 0.0  ;;  %v6452_v8 = vadd.f32 %v6451_v36, %v6421_v37  ;;  %v6391_v41 = vadd.f32 %v8657_v35, %v6359_v61  ;;  %v6214_v63 = vadd.f32 %v6213_v18, %v11076_v56  ;;  %v8342_v19 = vpop.f32.mrb[154].mxu0 }
 0x5ed   : > { %v6325_v16 = vmul.f32 %v11144_v29, %v6222_v57  ;;  %v6225_v11 = vadd.f32 %v8342_v19, %v11085_v25  ;;  %v6216_v15 = vpop.f32.mrb[155].mxu0  ;;  %v6425_v25 = vmax.f32 %v6393_v21, 0.0 }
 0x5ee   : > { %v6453_v31 = vadd.f32 %v6452_v8, %v6422_v46  ;;  %v6423_v40 = vmax.f32 %v6391_v41, 0.0  ;;  %v6323_v44 = vmul.f32 %v11144_v29, %v6214_v63  ;;  %v6217_v34 = vadd.f32 %v6216_v15, %v11079_v59  ;;  %v8660_v59 = vld [vmem:[#allocation3 + $0xc8] sm:$0xff] }
 0x5ef   : > { %v6364_v58 = vadd.f32 %v11152_v43, %v6325_v16  ;;  %v6326_v52 = vmul.f32 %v11144_v29, %v6225_v11 }
 0x5f0   : > { %v6454_v56 = vadd.f32 %v6453_v31, %v6423_v40  ;;  %v6362_v60 = vadd.f32 %v11152_v43, %v6323_v44  ;;  %v6324_v14 = vmul.f32 %v11144_v29, %v6217_v34  ;;  %v8663_v31 = vld [vmem:[#allocation3 + $0xe8] sm:$0xff] }
 0x5f1   : > { %v6365_v38 = vadd.f32 %v11152_v43, %v6326_v52  ;;  %v6396_v50 = vadd.f32 %v8660_v59, %v6364_v58 }
 0x5f2   : > { %v6455_v23 = vadd.f32 %v6454_v56, %v6424_v24  ;;  %v6394_v30 = vadd.f32 %v8659_v51, %v6362_v60  ;;  %v6363_v48 = vadd.f32 %v11152_v43, %v6324_v14  ;;  %v8345_v9 = vpop.f32.mrb[156].mxu0  ;;  %v8665_v14 = vld [vmem:[#allocation3 + $0xf0] sm:$0xff] }
 0x5f3   : > { %v6238_v17 = vadd.f32 %v8345_v9, %v11094_v10  ;;  %v6229_v26 = vpop.f32.mrb[157].mxu0  ;;  %v6397_v5 = vadd.f32 %v8662_v27, %v6365_v38  ;;  %v6428_v32 = vmax.f32 %v6396_v50, 0.0  ;;  %v8666_v51 = vld [vmem:[#allocation3 + $0x110] sm:$0xff] }
 0x5f4   : > { %v6426_v37 = vmax.f32 %v6394_v30, 0.0  ;;  %v6456_v36 = vadd.f32 %v6455_v23, %v6425_v25  ;;  %v6395_v62 = vadd.f32 %v8661_v54, %v6363_v48  ;;  %v6230_v61 = vadd.f32 %v6229_v26, %v11088_v33  ;;  %v8346_v7 = vpop.f32.mrb[158].mxu0 }
 0x5f5   : > { %v6329_v57 = vmul.f32 %v11144_v29, %v6238_v17  ;;  %v6241_v18 = vadd.f32 %v8346_v7, %v11097_v45  ;;  %v6232_v46 = vpop.f32.mrb[159].mxu0  ;;  %v6429_v45 = vmax.f32 %v6397_v5, 0.0  ;;  %v8667_v5 = vld [vmem:[#allocation3 + $0x128] sm:$0xff] }
 0x5f6   : > { %v6457_v8 = vadd.f32 %v6456_v36, %v6426_v37  ;;  %v6427_v35 = vmax.f32 %v6395_v62, 0.0  ;;  %v6327_v41 = vmul.f32 %v11144_v29, %v6230_v61  ;;  %v6233_v10 = vadd.f32 %v6232_v46, %v11091_v0  ;;  %v8664_v0 = vld [vmem:[#allocation3 + $0x108] sm:$0xff] }
 0x5f7   : > { %v6368_v63 = vadd.f32 %v11152_v43, %v6329_v57  ;;  %v6330_v19 = vmul.f32 %v11144_v29, %v6241_v18 }
 0x5f8   : > { %v6458_v33 = vadd.f32 %v6457_v8, %v6427_v35  ;;  %v6366_v21 = vadd.f32 %v11152_v43, %v6327_v41  ;;  %v6328_v16 = vmul.f32 %v11144_v29, %v6233_v10 }
 0x5f9   : > { %v6369_v11 = vadd.f32 %v11152_v43, %v6330_v19  ;;  %v6400_v58 = vadd.f32 %v8664_v0, %v6368_v63  ;;  %v8669_v19 = vld [vmem:[#allocation3 + $0x130] sm:$0xff] }
 0x5fa   : > { %v6459_v15 = vadd.f32 %v6458_v33, %v6428_v32  ;;  %v6398_v40 = vadd.f32 %v8663_v31, %v6366_v21  ;;  %v6367_v44 = vadd.f32 %v11152_v43, %v6328_v16  ;;  %v8349_v34 = vpop.f32.mrb[160].mxu0  ;;  %v8670_v16 = vld [vmem:[#allocation3 + $0x150] sm:$0xff] }
 0x5fb   : > { %v6254_v52 = vadd.f32 %v8349_v34, %v11106_v13  ;;  %v6245_v24 = vpop.f32.mrb[161].mxu0  ;;  %v6401_v30 = vadd.f32 %v8666_v51, %v6369_v11  ;;  %v6432_v54 = vmax.f32 %v6400_v58, 0.0 }
 0x5fc   : > { %v6430_v56 = vmax.f32 %v6398_v40, 0.0  ;;  %v6460_v60 = vadd.f32 %v6459_v15, %v6429_v45  ;;  %v6399_v38 = vadd.f32 %v8665_v14, %v6367_v44  ;;  %v6246_v25 = vadd.f32 %v6245_v24, %v11100_v12  ;;  %v8350_v23 = vpop.f32.mrb[162].mxu0 }
 0x5fd   : > { %v6333_v48 = vmul.f32 %v11144_v29, %v6254_v52  ;;  %v6257_v9 = vadd.f32 %v8350_v23, %v11109_v6  ;;  %v6248_v59 = vpop.f32.mrb[163].mxu0  ;;  %v6433_v6 = vmax.f32 %v6401_v30, 0.0 }
 0x5fe   : > { %v6461_v50 = vadd.f32 %v6460_v60, %v6430_v56  ;;  %v6431_v17 = vmax.f32 %v6399_v38, 0.0  ;;  %v6331_v26 = vmul.f32 %v11144_v29, %v6246_v25  ;;  %v6249_v13 = vadd.f32 %v6248_v59, %v11103_v22  ;;  %v8668_v22 = vld [vmem:[#allocation3 + $0x148] sm:$0xff] }
 0x5ff   : > { %v6372_v37 = vadd.f32 %v11152_v43, %v6333_v48  ;;  %v6334_v36 = vmul.f32 %v11144_v29, %v6257_v9  ;;  %v8671_v38 = vld [vmem:[#allocation3 + $0x168] sm:$0xff] }
 0x600   : > { %v6462_v12 = vadd.f32 %v6461_v50, %v6431_v17  ;;  %v6370_v62 = vadd.f32 %v11152_v43, %v6331_v26  ;;  %v6332_v61 = vmul.f32 %v11144_v29, %v6249_v13  ;;  %v8673_v17 = vld [vmem:[#allocation3 + $0x170] sm:$0xff] }
 0x601   : > { %v6373_v7 = vadd.f32 %v11152_v43, %v6334_v36  ;;  %v6404_v8 = vadd.f32 %v8668_v22, %v6372_v37  ;;  %v8674_v36 = vld [vmem:[#allocation3 + $0x190] sm:$0xff] }
 0x602   : > { %v6463_v27 = vadd.f32 %v6462_v12, %v6432_v54  ;;  %v6402_v57 = vadd.f32 %v8667_v5, %v6370_v62  ;;  %v6371_v18 = vadd.f32 %v11152_v43, %v6332_v61  ;;  %v8353_v46 = vpop.f32.mrb[164].mxu0 }
 0x603   : > { %v6270_v35 = vadd.f32 %v8353_v46, %v11118_v28  ;;  %v6261_v41 = vpop.f32.mrb[165].mxu0  ;;  %v6405_v11 = vadd.f32 %v8670_v16, %v6373_v7  ;;  %v6436_v52 = vmax.f32 %v6404_v8, 0.0 }
 0x604   : > { %v6434_v10 = vmax.f32 %v6402_v57, 0.0  ;;  %v6464_v63 = vadd.f32 %v6463_v27, %v6433_v6  ;;  %v6403_v32 = vadd.f32 %v8669_v19, %v6371_v18  ;;  %v6262_v33 = vadd.f32 %v6261_v41, %v11112_v55  ;;  %v8354_v21 = vpop.f32.mrb[166].mxu0  ;;  %v8675_v41 = vld [vmem:[#allocation3 + $0x1a8] sm:$0xff] }
 0x605   : > { %v6337_v45 = vmul.f32 %v11144_v29, %v6270_v35  ;;  %v6273_v15 = vadd.f32 %v8354_v21, %v11121_v39  ;;  %v6264_v31 = vpop.f32.mrb[167].mxu0  ;;  %v6437_v39 = vmax.f32 %v6405_v11, 0.0 }
 0x606   : > { %v6465_v40 = vadd.f32 %v6464_v63, %v6434_v10  ;;  %v6435_v44 = vmax.f32 %v6403_v32, 0.0  ;;  %v6335_v34 = vmul.f32 %v11144_v29, %v6262_v33  ;;  %v6265_v28 = vadd.f32 %v6264_v31, %v11115_v49  ;;  %v8672_v49 = vld [vmem:[#allocation3 + $0x188] sm:$0xff] }
 0x607   : > { %v6376_v0 = vadd.f32 %v11152_v43, %v6337_v45  ;;  %v6338_v58 = vmul.f32 %v11144_v29, %v6273_v15  ;;  %v8677_v45 = vld [vmem:[#allocation3 + $0x1b0] sm:$0xff] }
 0x608   : > { %v6466_v55 = vadd.f32 %v6465_v40, %v6435_v44  ;;  %v6374_v24 = vadd.f32 %v11152_v43, %v6335_v34  ;;  %v6336_v56 = vmul.f32 %v11144_v29, %v6265_v28  ;;  %v8678_v44 = vld [vmem:[#allocation3 + $0x1d0] sm:$0xff] }
 0x609   : > { %v6377_v60 = vadd.f32 %v11152_v43, %v6338_v58  ;;  %v6408_v30 = vadd.f32 %v8672_v49, %v6376_v0 }
 0x60a   : > { %v6467_v14 = vadd.f32 %v6466_v55, %v6436_v52  ;;  %v6406_v25 = vadd.f32 %v8671_v38, %v6374_v24  ;;  %v6375_v23 = vadd.f32 %v11152_v43, %v6336_v56  ;;  %v8357_v51 = vpop.f32.mrb[168].mxu0 }
 0x60b   : > { %v6286_v48 = vadd.f32 %v8357_v51, %v11130_v42  ;;  %v6277_v9 = vpop.f32.mrb[169].mxu0  ;;  %v6409_v54 = vadd.f32 %v8674_v36, %v6377_v60  ;;  %v6440_v18 = vmax.f32 %v6408_v30, 0.0 }
 0x60c   : > { %v6438_v59 = vmax.f32 %v6406_v25, 0.0  ;;  %v6468_v50 = vadd.f32 %v6467_v14, %v6437_v39  ;;  %v6407_v26 = vadd.f32 %v8673_v17, %v6375_v23  ;;  %v6278_v13 = vadd.f32 %v6277_v9, %v11124_v20  ;;  %v8358_v37 = vpop.f32.mrb[170].mxu0 }
 0x60d   : > { %v6341_v12 = vmul.f32 %v11144_v29, %v6286_v48  ;;  %v6289_v62 = vadd.f32 %v8358_v37, %v11133_v53  ;;  %v6280_v61 = vpop.f32.mrb[171].mxu0  ;;  %v6441_v53 = vmax.f32 %v6409_v54, 0.0  ;;  %v8680_v48 = vld [vmem:[#allocation3 + $0x208] sm:$0xff] }
 0x60e   : > { %v6469_v7 = vadd.f32 %v6468_v50, %v6438_v59  ;;  %v6439_v6 = vmax.f32 %v6407_v26, 0.0  ;;  %v6339_v27 = vmul.f32 %v11144_v29, %v6278_v13  ;;  %v6281_v42 = vadd.f32 %v6280_v61, %v11127_v3  ;;  %v8676_v3 = vld [vmem:[#allocation3 + $0x1c8] sm:$0xff]  ;;  %v8681_v50 = vld [vmem:[#allocation3 + $0x1f0] sm:$0xff] }
 0x60f   : > { %v6380_v5 = vadd.f32 %v11152_v43, %v6341_v12  ;;  %v6342_v57 = vmul.f32 %v11144_v29, %v6289_v62  ;;  %v8682_v13 = vld [vmem:[#allocation3 + $0x210] sm:$0xff] }
 0x610   : > { %v6470_v20 = vadd.f32 %v6469_v7, %v6439_v6  ;;  %v6378_v46 = vadd.f32 %v11152_v43, %v6339_v27  ;;  %v6340_v22 = vmul.f32 %v11144_v29, %v6281_v42 }
 0x611   : > { %v6381_v8 = vadd.f32 %v11152_v43, %v6342_v57  ;;  %v6412_v32 = vadd.f32 %v8676_v3, %v6380_v5 }
 0x612   : > { %v6471_v35 = vadd.f32 %v6470_v20, %v6440_v18  ;;  %v6410_v10 = vadd.f32 %v8675_v41, %v6378_v46  ;;  %v6379_v63 = vadd.f32 %v11152_v43, %v6340_v22  ;;  %v8361_v19 = vpop.f32.mrb[172].mxu0 }
 0x613   : > { %v6302_v33 = vadd.f32 %v8361_v19, %v11158_v47  ;;  %v6293_v21 = vpop.f32.mrb[173].mxu0  ;;  %v6413_v34 = vadd.f32 %v8678_v44, %v6381_v8  ;;  %v6444_v56 = vmax.f32 %v6412_v32, 0.0 }
 0x614   : > { %v6442_v16 = vmax.f32 %v6410_v10, 0.0  ;;  %v6472_v11 = vadd.f32 %v6471_v35, %v6441_v53  ;;  %v6411_v15 = vadd.f32 %v8677_v45, %v6379_v63  ;;  %v6294_v31 = vadd.f32 %v6293_v21, %v11136_v4  ;;  %v8362_v40 = vpop.f32.mrb[174].mxu0 }
 0x615   : > { %v6345_v28 = vmul.f32 %v11144_v29, %v6302_v33  ;;  %v6305_v0 = vadd.f32 %v8362_v40, %v11164_v2  ;;  %v6296_v58 = vpop.f32.mrb[175].mxu0  ;;  %v6445_v25 = vmax.f32 %v6413_v34, 0.0  ;;  %v8679_v2 = vld [vmem:[#allocation3 + $0x1e8] sm:$0xff] }
 0x616   : > { %v6473_v52 = vadd.f32 %v6472_v11, %v6442_v16  ;;  %v6443_v55 = vmax.f32 %v6411_v15, 0.0  ;;  %v6343_v24 = vmul.f32 %v11144_v29, %v6294_v31  ;;  %v6297_v47 = vadd.f32 %v6296_v58, %v11139_v1 }
 0x617   : > { %v6346_v60 = vmul.f32 %v11144_v29, %v6305_v0  ;;  %v6384_v4 = vadd.f32 %v11152_v43, %v6345_v28 }
 0x618   : > { %v6474_v39 = vadd.f32 %v6473_v52, %v6443_v55  ;;  %v6382_v14 = vadd.f32 %v11152_v43, %v6343_v24  ;;  %v6344_v38 = vmul.f32 %v11144_v29, %v6297_v47 }
 0x619   : > { %v6385_v49 = vadd.f32 %v11152_v43, %v6346_v60  ;;  %v6416_v1 = vadd.f32 %v8680_v48, %v6384_v4 }
 0x61a   : > { %v6475_v23 = vadd.f32 %v6474_v39, %v6444_v56  ;;  %v6414_v51 = vadd.f32 %v8679_v2, %v6382_v14  ;;  %v6383_v30 = vadd.f32 %v11152_v43, %v6344_v38 }
 0x61b   : > { %v6417_v37 = vadd.f32 %v8682_v13, %v6385_v49  ;;  %v6448_v36 = vmax.f32 %v6416_v1, 0.0 }
 0x61c   : > { %v6446_v9 = vmax.f32 %v6414_v51, 0.0  ;;  %v6476_v59 = vadd.f32 %v6475_v23, %v6445_v25  ;;  %v6415_v17 = vadd.f32 %v8681_v50, %v6383_v30 }
 0x61d   : > { %v6449_v12 = vmax.f32 %v6417_v37, 0.0 }
 0x61e   : > { %v6477_v26 = vadd.f32 %v6476_v59, %v6446_v9  ;;  %v6447_v29 = vmax.f32 %v6415_v17, 0.0 }
 0x620   : > { %v6478_v54 = vadd.f32 %v6477_v26, %v6447_v29 }
 0x622   : > { %v6479_v62 = vadd.f32 %v6478_v54, %v6448_v36 }
 0x624   : > { %v6480_v61 = vadd.f32 %v6479_v62, %v6449_v12 }
 0x626   : > { %v6481_v7 = vrot.slane %v6480_v61, 4 }
 0x628   : > { %v6482_v6 = vadd.f32 %v6481_v7, %v6480_v61 }
 0x62a   : > { %v6483_v43 = vrot.slane %v6482_v6, 2 }
 0x62c   : > { %v6484_v27 = vadd.f32 %v6483_v43, %v6482_v6 }
 0x62e   : > { %v6485_v42 = vrot.slane %v6484_v27, 1 }
 0x630   : > { %v6486_v5 = vadd.f32 %v6485_v42, %v6484_v27 }
 0x632   : > { %v6487_v57 = vmul.f32 0.00390625, %v6486_v5 }
 0x634   : > { %6488 = vst [vmem:[%s366_s30] sm:$0x1] %v6487_v57 }
 0x635   : > { %8724 = shalt.err (!%p8721_p7)
}
 0x636   : > { %s8725_s27 = scalar_lea.hbm %s11256_s28, 16  ;;  %s8729_s25 = scalar_lea.hbm %s11308_s10, 32 }
 0x637   : > { %p8726_p8 = scmp.ne.s32.totalorder %s11256_s28, %s8725_s27  ;;  %p8730_p1 = scmp.lt.u32.totalorder %s11256_s28, %s11308_s10 }
 0x638   : > { %p8731_p0 = scmp.lt.u32.totalorder %s8729_s25, %s8725_s27  ;;  %p8733_p6 = scmp.lt.u32.totalorder %s8725_s27, %s11256_s28 }
 0x639   : > { %p8727_p11 = pnand %p8726_p8, %p11323_p9 }
 0x63a   : > { %p8732_p5 = por %p8731_p0, %p8730_p1 }
 0x63b   : > { %p8728_p13 = pneg %p8727_p11 }
 0x63c   : > { %p8734_p10 = por %p8733_p6, %p8732_p5 }
 0x63e   : > { %p8735_p12 = pnand %p8734_p10, %p8728_p13 }
 0x640   : > { %8738 = shalt.err (!%p8735_p12)
}
 0x641   : > { %8383 = dma.vmem_to_hbm [thread:$0]  (%p11323_p9), %s11258_s12, 16, %s11256_s28, %s6490_s11  }
 0x642 PF: > { %p8395_p2 = scmp.ge.s32.totalorder %s8777_s16, 2  ;;  %s6514_s21 = sand.u32 1, %s8765_s13  }
 0x643   : > { %p11324_p3 = scmp.ne.s32.totalorder %s11315_s24, 0  ;;  %s6515_s20 = scalar_lea.sflag [#allocation6], %s6514_s21 }
 0x645   : > { %p8390_p4 = pnand %p8395_p2, %p11324_p3 }
 0x647   : > { %8760 = dma.done.wait (!%p8390_p4), %s6515_s20, 16  }
 0x648   : > { %8762 = vsyncadd (!%p8390_p4), %s6515_s20, 4294967280  ;;  %p21_p7 = scmp.ge.s32.totalorder %s8865_s19, 4   ;;  %s11325_s13 = smov %s8769_s14 }
 0x649   : > { %s11326_s14 = smov %s8773_s15  ;;  %s11327_s15 = smov %s8876_s22 }
 0x64a   : > { %s11328_s16 = smov %s8865_s19  ;;  %23 = sbr.rel (!%p21_p7) target bundleno = 4 (0x4), region = 104 }
 0x651   :  { %6519 = vsyncpa [#allocation5], 1 }
 0x652   :  { %6521 = vsyncpa [#allocation5 + $0x1], 1 }
 0x653   :  { %6522 = vsyncpa [#allocation6], 1 }
 0x654   :  { %6524 = vsyncpa [#allocation6 + $0x1], 1 }

</bundles_post_ra>
